<compile_context>
chip_gen: v5e
topology: v5e:2x2
jax: 0.10.0
libtpu: 0.0.40
codegen_flags: <defaults>
</compile_context>

<pallas_src>
import numpy as np
import jax
import jax.numpy as jnp
from jax.experimental import pallas as pl
from jax.experimental.pallas import tpu as pltpu


# -----------------------------------------------------------------------------
# Fused forward kernel builder
# -----------------------------------------------------------------------------
def _make_fused_kernel(B, T, F, layer_dims, n_enc, H_lat):
    """layer_dims: [(Fin, H), ...] for every LSTM layer (encoder then decoder)."""
    n_layers = len(layer_dims)

    def lstm_layer(x_stacked, w_x, w_h, b, H):
        # x_stacked: (T*B, Fin) time-major stacked activation.
        # Hoisted input projection: one big dot, off the serial chain.
        xproj = jnp.dot(x_stacked, w_x,
                        preferred_element_type=jnp.float32) + b        # (T*B, 4H)
        # Per-step views of the precomputed projection (no h dependency, so
        # these slices sit off the recurrent critical path).
        xp = [xproj[t * B:(t + 1) * B, :] for t in range(T)]

        h = jnp.zeros((B, H), jnp.float32)
        c = jnp.zeros((B, H), jnp.float32)
        hs = []
        for t in range(T):
            # Serial chain: one small recurrent matmul + gate math per step.
            gates = xp[t] + jnp.dot(h, w_h,
                                    preferred_element_type=jnp.float32)  # (B, 4H)
            # Gate order (i, f, o, g): one sigmoid over the contiguous 3H
            # slice, one tanh over the trailing H slice (2 EUP pushes/step).
            sig = jax.nn.sigmoid(gates[:, :3 * H])
            i_g = sig[:, 0 * H:1 * H]
            f_g = sig[:, 1 * H:2 * H]
            o_g = sig[:, 2 * H:3 * H]
            g_g = jnp.tanh(gates[:, 3 * H:])
            c = f_g * c + i_g * g_g
            h = o_g * jnp.tanh(c)
            hs.append(h)
        return hs                                                       # T x (B, H)

    def kernel(*refs):
        x_ref, eps_ref = refs[0], refs[1]
        w_refs = refs[2:2 + 3 * n_layers]             # (w_x, w_h, b) per layer
        w_out_ref = refs[2 + 3 * n_layers]
        b_out_ref = refs[3 + 3 * n_layers]
        out_ref = refs[4 + 3 * n_layers]
        mu_ref = refs[5 + 3 * n_layers]

        # Batch-first (B, T*F) input -> time-major stacked (T*B, F).
        x = x_ref[...]
        cur = jnp.concatenate([x[:, t * F:(t + 1) * F] for t in range(T)], axis=0)

        # ---- encoder --------------------------------------------------------
        for li in range(n_enc):
            H = layer_dims[li][1]
            hs = lstm_layer(cur, w_refs[3 * li][...], w_refs[3 * li + 1][...],
                            w_refs[3 * li + 2][...], H)
            if li < n_enc - 1:
                # hidden_activation applied to the emitted sequence only.
                cur = jnp.tanh(jnp.concatenate(hs, axis=0))
            else:
                # Latent written lane-dense: (B, T*H_lat) with per-step
                # static lane-slice stores.
                for t in range(T):
                    mu_ref[:, t * H:(t + 1) * H] = jnp.tanh(hs[t])

        # ---- reparameterize on the lane-dense (B, T*H_lat) slab --------------
        mu_slab = mu_ref[...]                                   # (B, T*H_lat)
        samp = mu_slab + eps_ref[...] * jnp.exp(0.5 * mu_slab)  # mu + eps*exp(.5*logvar)

        # Decoder input as time-major stacked (T*B, H_lat).
        cur = jnp.concatenate(
            [samp[:, t * H_lat:(t + 1) * H_lat] for t in range(T)], axis=0)

        # ---- decoder ---------------------------------------------------------
        for li in range(n_enc, n_layers):
            H = layer_dims[li][1]
            hs = lstm_layer(cur, w_refs[3 * li][...], w_refs[3 * li + 1][...],
                            w_refs[3 * li + 2][...], H)
            cur = jnp.tanh(jnp.concatenate(hs, axis=0))

        # ---- output Linear(F, F) + sigmoid: ONE batched dot over (T*B, F) ----
        y = jax.nn.sigmoid(
            jnp.dot(cur, w_out_ref[...], preferred_element_type=jnp.float32)
            + b_out_ref[...])                                   # (T*B, F)

        # (B, T*F) output via per-step static lane-slice stores.
        for t in range(T):
            out_ref[:, t * F:(t + 1) * F] = y[t * B:(t + 1) * B, :]

    return kernel


# -----------------------------------------------------------------------------
# Parameter init / prep (PyTorch-style U(-1/sqrt(H), 1/sqrt(H)))
# -----------------------------------------------------------------------------
def _prep_lstm(wih, whh, bih, bhh, H):
    """PyTorch (4H,Fin)/(4H,H), gate order (i,f,g,o)  ->  separate W_x (Fin,4H)
    and W_h (H,4H) with gate order (i,f,o,g), plus pre-summed bias (1,4H)."""
    def reorder_cols(w_t):
        return jnp.concatenate([w_t[:, 0 * H:1 * H], w_t[:, 1 * H:2 * H],
                                w_t[:, 3 * H:4 * H], w_t[:, 2 * H:3 * H]],
                               axis=1)
    w_x = reorder_cols(wih.T)
    w_h = reorder_cols(whh.T)
    b = reorder_cols((bih + bhh).reshape(1, 4 * H))
    return dict(w_x=w_x, w_h=w_h, b=b)


def init_lstm_params(key, input_size, hidden_size):
    bound = 1.0 / np.sqrt(hidden_size)
    k1, k2, k3, k4 = jax.random.split(key, 4)
    wih = jax.random.uniform(k1, (4 * hidden_size, input_size), jnp.float32,
                             -bound, bound)
    whh = jax.random.uniform(k2, (4 * hidden_size, hidden_size), jnp.float32,
                             -bound, bound)
    bih = jax.random.uniform(k3, (4 * hidden_size,), jnp.float32, -bound, bound)
    bhh = jax.random.uniform(k4, (4 * hidden_size,), jnp.float32, -bound, bound)
    return _prep_lstm(wih, whh, bih, bhh, hidden_size)


def init_params(key, n_features, hidden_neurons):
    L = len(hidden_neurons)
    keys = jax.random.split(key, 16)
    ki = iter(keys)

    layer_dims = []
    layers = []

    # Encoder: n_features -> h[0]; then h[i-1] -> h[i] for i in 1..(L+1)//2 - 1
    layer_dims.append((n_features, hidden_neurons[0]))
    layers.append(init_lstm_params(next(ki), n_features, hidden_neurons[0]))
    last = hidden_neurons[0]
    for i in range(1, (L + 1) // 2):
        layer_dims.append((last, hidden_neurons[i]))
        layers.append(init_lstm_params(next(ki), last, hidden_neurons[i]))
        last = hidden_neurons[i]
    n_enc = len(layers)

    # Decoder: h[i] -> h[i+1] for i in L//2 .. L-2; then h[-1] -> n_features
    for i in range(L // 2, L - 1):
        layer_dims.append((hidden_neurons[i], hidden_neurons[i + 1]))
        layers.append(init_lstm_params(next(ki), hidden_neurons[i],
                                       hidden_neurons[i + 1]))
    layer_dims.append((hidden_neurons[-1], n_features))
    layers.append(init_lstm_params(next(ki), hidden_neurons[-1], n_features))

    # Output Linear(n_features, n_features)
    bound = 1.0 / np.sqrt(n_features)
    kw, kb = jax.random.split(next(ki))
    out_w = jax.random.uniform(kw, (n_features, n_features), jnp.float32,
                               -bound, bound)
    out_b = jax.random.uniform(kb, (n_features,), jnp.float32, -bound, bound)

    return dict(layers=layers, layer_dims=layer_dims, n_enc=n_enc,
                out_w_t=out_w.T, out_b=out_b.reshape(1, n_features))


# -----------------------------------------------------------------------------
# Full LSTM_VAE forward: one pallas_call (no grid, no pipelining)
# -----------------------------------------------------------------------------
def lstm_vae_forward(w, params, eps, n_samples, n_features):
    B = w.shape[0]
    T, F = n_samples, n_features
    layer_dims = params['layer_dims']
    n_enc = params['n_enc']
    H_lat = layer_dims[n_enc - 1][1]

    weight_args = []
    for lp in params['layers']:
        weight_args += [lp['w_x'], lp['w_h'], lp['b']]
    weight_args += [params['out_w_t'], params['out_b']]

    # eps drawn as (B, T, H_lat) like torch.randn_like(std); passed lane-dense.
    eps_flat = eps.reshape(B, T * H_lat)

    kernel = _make_fused_kernel(B, T, F, layer_dims, n_enc, H_lat)
    n_in = 2 + len(weight_args)
    vmem = pltpu.MemorySpace.VMEM

    out, mu_flat = pl.pallas_call(
        kernel,
        out_shape=(jax.ShapeDtypeStruct((B, T * F), jnp.float32),
                   jax.ShapeDtypeStruct((B, T * H_lat), jnp.float32)),
        in_specs=[pl.BlockSpec(memory_space=vmem) for _ in range(n_in)],
        out_specs=(pl.BlockSpec(memory_space=vmem),
                   pl.BlockSpec(memory_space=vmem)),
    )(w, eps_flat, *weight_args)

    mu = mu_flat.reshape(B, T, H_lat)
    log_var = mu     # module sets mu = log_var = z (same tensor)
    return out, mu, log_var


if __name__ == "__main__":
    n_features = 4
    n_samples = 8
    hidden_neurons = [32, 16, 32]
    batch = 2

    key = jax.random.PRNGKey(0)
    kp, kx, ke = jax.random.split(key, 3)

    params = init_params(kp, n_features, hidden_neurons)
    w = jax.random.normal(kx, (batch, n_samples * n_features), jnp.float32)

    h_last = hidden_neurons[(len(hidden_neurons) + 1) // 2 - 1]   # 16
    # TODO(synk): torch.randn_like(std) inside reparameterize is replaced by a
    # deterministic eps input (shaped like std), so outputs are reproducible.
    eps = jax.random.normal(ke, (batch, n_samples, h_last), jnp.float32)

    out, mu, log_var = lstm_vae_forward(w, params, eps, n_samples, n_features)
    jax.block_until_ready((out, mu, log_var))

    assert out.shape == (batch, n_samples * n_features)
    assert mu.shape == (batch, n_samples, h_last)
    assert log_var.shape == (batch, n_samples, h_last)
    print("KERNEL_OK")
</pallas_src>

<mosaic_0001>
module attributes {stable_mosaic.version = 11 : i64} {
  func.func @kernel(%arg0: memref<2x32xf32, #tpu.memory_space<vmem>>, %arg1: memref<2x128xf32, #tpu.memory_space<vmem>>, %arg2: memref<4x128xf32, #tpu.memory_space<vmem>>, %arg3: memref<32x128xf32, #tpu.memory_space<vmem>>, %arg4: memref<1x128xf32, #tpu.memory_space<vmem>>, %arg5: memref<32x64xf32, #tpu.memory_space<vmem>>, %arg6: memref<16x64xf32, #tpu.memory_space<vmem>>, %arg7: memref<1x64xf32, #tpu.memory_space<vmem>>, %arg8: memref<16x128xf32, #tpu.memory_space<vmem>>, %arg9: memref<32x128xf32, #tpu.memory_space<vmem>>, %arg10: memref<1x128xf32, #tpu.memory_space<vmem>>, %arg11: memref<32x16xf32, #tpu.memory_space<vmem>>, %arg12: memref<4x16xf32, #tpu.memory_space<vmem>>, %arg13: memref<1x16xf32, #tpu.memory_space<vmem>>, %arg14: memref<4x4xf32, #tpu.memory_space<vmem>>, %arg15: memref<1x4xf32, #tpu.memory_space<vmem>>, %arg16: memref<2x32xf32, #tpu.memory_space<vmem>>, %arg17: memref<2x128xf32, #tpu.memory_space<vmem>>) attributes {dimension_semantics = [], scalar_prefetch = 0 : i64, scratch_operands = 0 : i64, tpu.core_type = #tpu.core_type<tc>} {
    %c0 = arith.constant 0 : index
    %c0_0 = arith.constant 0 : index
    %0 = vector.load %arg0[%c0, %c0_0] : memref<2x32xf32, #tpu.memory_space<vmem>>, vector<2x32xf32>
    %1 = vector.extract_strided_slice %0 {offsets = [0, 0], sizes = [2, 4], strides = [1, 1]} : vector<2x32xf32> to vector<2x4xf32>
    %2 = vector.extract_strided_slice %0 {offsets = [0, 4], sizes = [2, 4], strides = [1, 1]} : vector<2x32xf32> to vector<2x4xf32>
    %3 = vector.extract_strided_slice %0 {offsets = [0, 8], sizes = [2, 4], strides = [1, 1]} : vector<2x32xf32> to vector<2x4xf32>
    %4 = vector.extract_strided_slice %0 {offsets = [0, 12], sizes = [2, 4], strides = [1, 1]} : vector<2x32xf32> to vector<2x4xf32>
    %5 = vector.extract_strided_slice %0 {offsets = [0, 16], sizes = [2, 4], strides = [1, 1]} : vector<2x32xf32> to vector<2x4xf32>
    %6 = vector.extract_strided_slice %0 {offsets = [0, 20], sizes = [2, 4], strides = [1, 1]} : vector<2x32xf32> to vector<2x4xf32>
    %7 = vector.extract_strided_slice %0 {offsets = [0, 24], sizes = [2, 4], strides = [1, 1]} : vector<2x32xf32> to vector<2x4xf32>
    %8 = vector.extract_strided_slice %0 {offsets = [0, 28], sizes = [2, 4], strides = [1, 1]} : vector<2x32xf32> to vector<2x4xf32>
    %9 = tpu.concatenate %1, %2, %3, %4, %5, %6, %7, %8 in 0 : vector<2x4xf32>, vector<2x4xf32>, vector<2x4xf32>, vector<2x4xf32>, vector<2x4xf32>, vector<2x4xf32>, vector<2x4xf32>, vector<2x4xf32> -> vector<16x4xf32>
    %c0_1 = arith.constant 0 : index
    %c0_2 = arith.constant 0 : index
    %10 = vector.load %arg2[%c0_1, %c0_2] : memref<4x128xf32, #tpu.memory_space<vmem>>, vector<4x128xf32>
    %c0_3 = arith.constant 0 : index
    %c0_4 = arith.constant 0 : index
    %11 = vector.load %arg3[%c0_3, %c0_4] : memref<32x128xf32, #tpu.memory_space<vmem>>, vector<32x128xf32>
    %c0_5 = arith.constant 0 : index
    %c0_6 = arith.constant 0 : index
    %12 = vector.load %arg4[%c0_5, %c0_6] : memref<1x128xf32, #tpu.memory_space<vmem>>, vector<1x128xf32>
    %cst = arith.constant dense<0.000000e+00> : vector<16x128xf32>
    %13 = tpu.matmul %9, %10, %cst {dimension_numbers = #tpu.dot_dimension_numbers<[1], [0], [0], [1], [0, 0, 1, 1], [], []>} : vector<16x4xf32>, vector<4x128xf32>, vector<16x128xf32> -> vector<16x128xf32>
    %14 = vector.broadcast %12 : vector<1x128xf32> to vector<16x128xf32>
    %15 = arith.addf %13, %14 : vector<16x128xf32>
    %16 = vector.extract_strided_slice %15 {offsets = [0, 0], sizes = [2, 128], strides = [1, 1]} : vector<16x128xf32> to vector<2x128xf32>
    %17 = vector.extract_strided_slice %15 {offsets = [2, 0], sizes = [2, 128], strides = [1, 1]} : vector<16x128xf32> to vector<2x128xf32>
    %18 = vector.extract_strided_slice %15 {offsets = [4, 0], sizes = [2, 128], strides = [1, 1]} : vector<16x128xf32> to vector<2x128xf32>
    %19 = vector.extract_strided_slice %15 {offsets = [6, 0], sizes = [2, 128], strides = [1, 1]} : vector<16x128xf32> to vector<2x128xf32>
    %20 = vector.extract_strided_slice %15 {offsets = [8, 0], sizes = [2, 128], strides = [1, 1]} : vector<16x128xf32> to vector<2x128xf32>
    %21 = vector.extract_strided_slice %15 {offsets = [10, 0], sizes = [2, 128], strides = [1, 1]} : vector<16x128xf32> to vector<2x128xf32>
    %22 = vector.extract_strided_slice %15 {offsets = [12, 0], sizes = [2, 128], strides = [1, 1]} : vector<16x128xf32> to vector<2x128xf32>
    %23 = vector.extract_strided_slice %15 {offsets = [14, 0], sizes = [2, 128], strides = [1, 1]} : vector<16x128xf32> to vector<2x128xf32>
    %cst_7 = arith.constant 0.000000e+00 : f32
    %24 = vector.broadcast %cst_7 : f32 to vector<2x32xf32>
    %cst_8 = arith.constant 0.000000e+00 : f32
    %25 = vector.broadcast %cst_8 : f32 to vector<2x32xf32>
    %cst_9 = arith.constant dense<0.000000e+00> : vector<2x128xf32>
    %26 = tpu.matmul %24, %11, %cst_9 {dimension_numbers = #tpu.dot_dimension_numbers<[1], [0], [0], [1], [0, 0, 1, 1], [], []>} : vector<2x32xf32>, vector<32x128xf32>, vector<2x128xf32> -> vector<2x128xf32>
    %27 = arith.addf %16, %26 : vector<2x128xf32>
    %28 = vector.extract_strided_slice %27 {offsets = [0, 0], sizes = [2, 96], strides = [1, 1]} : vector<2x128xf32> to vector<2x96xf32>
    %29 = arith.negf %28 : vector<2x96xf32>
    %30 = math.exp %29 : vector<2x96xf32>
    %cst_10 = arith.constant 1.000000e+00 : f32
    %31 = vector.broadcast %cst_10 : f32 to vector<2x96xf32>
    %32 = arith.addf %31, %30 : vector<2x96xf32>
    %33 = arith.divf %31, %32 : vector<2x96xf32>
    %34 = vector.extract_strided_slice %33 {offsets = [0, 0], sizes = [2, 32], strides = [1, 1]} : vector<2x96xf32> to vector<2x32xf32>
    %35 = vector.extract_strided_slice %33 {offsets = [0, 32], sizes = [2, 32], strides = [1, 1]} : vector<2x96xf32> to vector<2x32xf32>
    %36 = vector.extract_strided_slice %33 {offsets = [0, 64], sizes = [2, 32], strides = [1, 1]} : vector<2x96xf32> to vector<2x32xf32>
    %37 = vector.extract_strided_slice %27 {offsets = [0, 96], sizes = [2, 32], strides = [1, 1]} : vector<2x128xf32> to vector<2x32xf32>
    %38 = math.tanh %37 : vector<2x32xf32>
    %39 = arith.mulf %35, %25 : vector<2x32xf32>
    %40 = arith.mulf %34, %38 : vector<2x32xf32>
    %41 = arith.addf %39, %40 : vector<2x32xf32>
    %42 = math.tanh %41 : vector<2x32xf32>
    %43 = arith.mulf %36, %42 : vector<2x32xf32>
    %cst_11 = arith.constant dense<0.000000e+00> : vector<2x128xf32>
    %44 = tpu.matmul %43, %11, %cst_11 {dimension_numbers = #tpu.dot_dimension_numbers<[1], [0], [0], [1], [0, 0, 1, 1], [], []>} : vector<2x32xf32>, vector<32x128xf32>, vector<2x128xf32> -> vector<2x128xf32>
    %45 = arith.addf %17, %44 : vector<2x128xf32>
    %46 = vector.extract_strided_slice %45 {offsets = [0, 0], sizes = [2, 96], strides = [1, 1]} : vector<2x128xf32> to vector<2x96xf32>
    %47 = arith.negf %46 : vector<2x96xf32>
    %48 = math.exp %47 : vector<2x96xf32>
    %cst_12 = arith.constant 1.000000e+00 : f32
    %49 = vector.broadcast %cst_12 : f32 to vector<2x96xf32>
    %50 = arith.addf %49, %48 : vector<2x96xf32>
    %51 = arith.divf %49, %50 : vector<2x96xf32>
    %52 = vector.extract_strided_slice %51 {offsets = [0, 0], sizes = [2, 32], strides = [1, 1]} : vector<2x96xf32> to vector<2x32xf32>
    %53 = vector.extract_strided_slice %51 {offsets = [0, 32], sizes = [2, 32], strides = [1, 1]} : vector<2x96xf32> to vector<2x32xf32>
    %54 = vector.extract_strided_slice %51 {offsets = [0, 64], sizes = [2, 32], strides = [1, 1]} : vector<2x96xf32> to vector<2x32xf32>
    %55 = vector.extract_strided_slice %45 {offsets = [0, 96], sizes = [2, 32], strides = [1, 1]} : vector<2x128xf32> to vector<2x32xf32>
    %56 = math.tanh %55 : vector<2x32xf32>
    %57 = arith.mulf %53, %41 : vector<2x32xf32>
    %58 = arith.mulf %52, %56 : vector<2x32xf32>
    %59 = arith.addf %57, %58 : vector<2x32xf32>
    %60 = math.tanh %59 : vector<2x32xf32>
    %61 = arith.mulf %54, %60 : vector<2x32xf32>
    %cst_13 = arith.constant dense<0.000000e+00> : vector<2x128xf32>
    %62 = tpu.matmul %61, %11, %cst_13 {dimension_numbers = #tpu.dot_dimension_numbers<[1], [0], [0], [1], [0, 0, 1, 1], [], []>} : vector<2x32xf32>, vector<32x128xf32>, vector<2x128xf32> -> vector<2x128xf32>
    %63 = arith.addf %18, %62 : vector<2x128xf32>
    %64 = vector.extract_strided_slice %63 {offsets = [0, 0], sizes = [2, 96], strides = [1, 1]} : vector<2x128xf32> to vector<2x96xf32>
    %65 = arith.negf %64 : vector<2x96xf32>
    %66 = math.exp %65 : vector<2x96xf32>
    %cst_14 = arith.constant 1.000000e+00 : f32
    %67 = vector.broadcast %cst_14 : f32 to vector<2x96xf32>
    %68 = arith.addf %67, %66 : vector<2x96xf32>
    %69 = arith.divf %67, %68 : vector<2x96xf32>
    %70 = vector.extract_strided_slice %69 {offsets = [0, 0], sizes = [2, 32], strides = [1, 1]} : vector<2x96xf32> to vector<2x32xf32>
    %71 = vector.extract_strided_slice %69 {offsets = [0, 32], sizes = [2, 32], strides = [1, 1]} : vector<2x96xf32> to vector<2x32xf32>
    %72 = vector.extract_strided_slice %69 {offsets = [0, 64], sizes = [2, 32], strides = [1, 1]} : vector<2x96xf32> to vector<2x32xf32>
    %73 = vector.extract_strided_slice %63 {offsets = [0, 96], sizes = [2, 32], strides = [1, 1]} : vector<2x128xf32> to vector<2x32xf32>
    %74 = math.tanh %73 : vector<2x32xf32>
    %75 = arith.mulf %71, %59 : vector<2x32xf32>
    %76 = arith.mulf %70, %74 : vector<2x32xf32>
    %77 = arith.addf %75, %76 : vector<2x32xf32>
    %78 = math.tanh %77 : vector<2x32xf32>
    %79 = arith.mulf %72, %78 : vector<2x32xf32>
    %cst_15 = arith.constant dense<0.000000e+00> : vector<2x128xf32>
    %80 = tpu.matmul %79, %11, %cst_15 {dimension_numbers = #tpu.dot_dimension_numbers<[1], [0], [0], [1], [0, 0, 1, 1], [], []>} : vector<2x32xf32>, vector<32x128xf32>, vector<2x128xf32> -> vector<2x128xf32>
    %81 = arith.addf %19, %80 : vector<2x128xf32>
    %82 = vector.extract_strided_slice %81 {offsets = [0, 0], sizes = [2, 96], strides = [1, 1]} : vector<2x128xf32> to vector<2x96xf32>
    %83 = arith.negf %82 : vector<2x96xf32>
    %84 = math.exp %83 : vector<2x96xf32>
    %cst_16 = arith.constant 1.000000e+00 : f32
    %85 = vector.broadcast %cst_16 : f32 to vector<2x96xf32>
    %86 = arith.addf %85, %84 : vector<2x96xf32>
    %87 = arith.divf %85, %86 : vector<2x96xf32>
    %88 = vector.extract_strided_slice %87 {offsets = [0, 0], sizes = [2, 32], strides = [1, 1]} : vector<2x96xf32> to vector<2x32xf32>
    %89 = vector.extract_strided_slice %87 {offsets = [0, 32], sizes = [2, 32], strides = [1, 1]} : vector<2x96xf32> to vector<2x32xf32>
    %90 = vector.extract_strided_slice %87 {offsets = [0, 64], sizes = [2, 32], strides = [1, 1]} : vector<2x96xf32> to vector<2x32xf32>
    %91 = vector.extract_strided_slice %81 {offsets = [0, 96], sizes = [2, 32], strides = [1, 1]} : vector<2x128xf32> to vector<2x32xf32>
    %92 = math.tanh %91 : vector<2x32xf32>
    %93 = arith.mulf %89, %77 : vector<2x32xf32>
    %94 = arith.mulf %88, %92 : vector<2x32xf32>
    %95 = arith.addf %93, %94 : vector<2x32xf32>
    %96 = math.tanh %95 : vector<2x32xf32>
    %97 = arith.mulf %90, %96 : vector<2x32xf32>
    %cst_17 = arith.constant dense<0.000000e+00> : vector<2x128xf32>
    %98 = tpu.matmul %97, %11, %cst_17 {dimension_numbers = #tpu.dot_dimension_numbers<[1], [0], [0], [1], [0, 0, 1, 1], [], []>} : vector<2x32xf32>, vector<32x128xf32>, vector<2x128xf32> -> vector<2x128xf32>
    %99 = arith.addf %20, %98 : vector<2x128xf32>
    %100 = vector.extract_strided_slice %99 {offsets = [0, 0], sizes = [2, 96], strides = [1, 1]} : vector<2x128xf32> to vector<2x96xf32>
    %101 = arith.negf %100 : vector<2x96xf32>
    %102 = math.exp %101 : vector<2x96xf32>
    %cst_18 = arith.constant 1.000000e+00 : f32
    %103 = vector.broadcast %cst_18 : f32 to vector<2x96xf32>
    %104 = arith.addf %103, %102 : vector<2x96xf32>
    %105 = arith.divf %103, %104 : vector<2x96xf32>
    %106 = vector.extract_strided_slice %105 {offsets = [0, 0], sizes = [2, 32], strides = [1, 1]} : vector<2x96xf32> to vector<2x32xf32>
    %107 = vector.extract_strided_slice %105 {offsets = [0, 32], sizes = [2, 32], strides = [1, 1]} : vector<2x96xf32> to vector<2x32xf32>
    %108 = vector.extract_strided_slice %105 {offsets = [0, 64], sizes = [2, 32], strides = [1, 1]} : vector<2x96xf32> to vector<2x32xf32>
    %109 = vector.extract_strided_slice %99 {offsets = [0, 96], sizes = [2, 32], strides = [1, 1]} : vector<2x128xf32> to vector<2x32xf32>
    %110 = math.tanh %109 : vector<2x32xf32>
    %111 = arith.mulf %107, %95 : vector<2x32xf32>
    %112 = arith.mulf %106, %110 : vector<2x32xf32>
    %113 = arith.addf %111, %112 : vector<2x32xf32>
    %114 = math.tanh %113 : vector<2x32xf32>
    %115 = arith.mulf %108, %114 : vector<2x32xf32>
    %cst_19 = arith.constant dense<0.000000e+00> : vector<2x128xf32>
    %116 = tpu.matmul %115, %11, %cst_19 {dimension_numbers = #tpu.dot_dimension_numbers<[1], [0], [0], [1], [0, 0, 1, 1], [], []>} : vector<2x32xf32>, vector<32x128xf32>, vector<2x128xf32> -> vector<2x128xf32>
    %117 = arith.addf %21, %116 : vector<2x128xf32>
    %118 = vector.extract_strided_slice %117 {offsets = [0, 0], sizes = [2, 96], strides = [1, 1]} : vector<2x128xf32> to vector<2x96xf32>
    %119 = arith.negf %118 : vector<2x96xf32>
    %120 = math.exp %119 : vector<2x96xf32>
    %cst_20 = arith.constant 1.000000e+00 : f32
    %121 = vector.broadcast %cst_20 : f32 to vector<2x96xf32>
    %122 = arith.addf %121, %120 : vector<2x96xf32>
    %123 = arith.divf %121, %122 : vector<2x96xf32>
    %124 = vector.extract_strided_slice %123 {offsets = [0, 0], sizes = [2, 32], strides = [1, 1]} : vector<2x96xf32> to vector<2x32xf32>
    %125 = vector.extract_strided_slice %123 {offsets = [0, 32], sizes = [2, 32], strides = [1, 1]} : vector<2x96xf32> to vector<2x32xf32>
    %126 = vector.extract_strided_slice %123 {offsets = [0, 64], sizes = [2, 32], strides = [1, 1]} : vector<2x96xf32> to vector<2x32xf32>
    %127 = vector.extract_strided_slice %117 {offsets = [0, 96], sizes = [2, 32], strides = [1, 1]} : vector<2x128xf32> to vector<2x32xf32>
    %128 = math.tanh %127 : vector<2x32xf32>
    %129 = arith.mulf %125, %113 : vector<2x32xf32>
    %130 = arith.mulf %124, %128 : vector<2x32xf32>
    %131 = arith.addf %129, %130 : vector<2x32xf32>
    %132 = math.tanh %131 : vector<2x32xf32>
    %133 = arith.mulf %126, %132 : vector<2x32xf32>
    %cst_21 = arith.constant dense<0.000000e+00> : vector<2x128xf32>
    %134 = tpu.matmul %133, %11, %cst_21 {dimension_numbers = #tpu.dot_dimension_numbers<[1], [0], [0], [1], [0, 0, 1, 1], [], []>} : vector<2x32xf32>, vector<32x128xf32>, vector<2x128xf32> -> vector<2x128xf32>
    %135 = arith.addf %22, %134 : vector<2x128xf32>
    %136 = vector.extract_strided_slice %135 {offsets = [0, 0], sizes = [2, 96], strides = [1, 1]} : vector<2x128xf32> to vector<2x96xf32>
    %137 = arith.negf %136 : vector<2x96xf32>
    %138 = math.exp %137 : vector<2x96xf32>
    %cst_22 = arith.constant 1.000000e+00 : f32
    %139 = vector.broadcast %cst_22 : f32 to vector<2x96xf32>
    %140 = arith.addf %139, %138 : vector<2x96xf32>
    %141 = arith.divf %139, %140 : vector<2x96xf32>
    %142 = vector.extract_strided_slice %141 {offsets = [0, 0], sizes = [2, 32], strides = [1, 1]} : vector<2x96xf32> to vector<2x32xf32>
    %143 = vector.extract_strided_slice %141 {offsets = [0, 32], sizes = [2, 32], strides = [1, 1]} : vector<2x96xf32> to vector<2x32xf32>
    %144 = vector.extract_strided_slice %141 {offsets = [0, 64], sizes = [2, 32], strides = [1, 1]} : vector<2x96xf32> to vector<2x32xf32>
    %145 = vector.extract_strided_slice %135 {offsets = [0, 96], sizes = [2, 32], strides = [1, 1]} : vector<2x128xf32> to vector<2x32xf32>
    %146 = math.tanh %145 : vector<2x32xf32>
    %147 = arith.mulf %143, %131 : vector<2x32xf32>
    %148 = arith.mulf %142, %146 : vector<2x32xf32>
    %149 = arith.addf %147, %148 : vector<2x32xf32>
    %150 = math.tanh %149 : vector<2x32xf32>
    %151 = arith.mulf %144, %150 : vector<2x32xf32>
    %cst_23 = arith.constant dense<0.000000e+00> : vector<2x128xf32>
    %152 = tpu.matmul %151, %11, %cst_23 {dimension_numbers = #tpu.dot_dimension_numbers<[1], [0], [0], [1], [0, 0, 1, 1], [], []>} : vector<2x32xf32>, vector<32x128xf32>, vector<2x128xf32> -> vector<2x128xf32>
    %153 = arith.addf %23, %152 : vector<2x128xf32>
    %154 = vector.extract_strided_slice %153 {offsets = [0, 0], sizes = [2, 96], strides = [1, 1]} : vector<2x128xf32> to vector<2x96xf32>
    %155 = arith.negf %154 : vector<2x96xf32>
    %156 = math.exp %155 : vector<2x96xf32>
    %cst_24 = arith.constant 1.000000e+00 : f32
    %157 = vector.broadcast %cst_24 : f32 to vector<2x96xf32>
    %158 = arith.addf %157, %156 : vector<2x96xf32>
    %159 = arith.divf %157, %158 : vector<2x96xf32>
    %160 = vector.extract_strided_slice %159 {offsets = [0, 0], sizes = [2, 32], strides = [1, 1]} : vector<2x96xf32> to vector<2x32xf32>
    %161 = vector.extract_strided_slice %159 {offsets = [0, 32], sizes = [2, 32], strides = [1, 1]} : vector<2x96xf32> to vector<2x32xf32>
    %162 = vector.extract_strided_slice %159 {offsets = [0, 64], sizes = [2, 32], strides = [1, 1]} : vector<2x96xf32> to vector<2x32xf32>
    %163 = vector.extract_strided_slice %153 {offsets = [0, 96], sizes = [2, 32], strides = [1, 1]} : vector<2x128xf32> to vector<2x32xf32>
    %164 = math.tanh %163 : vector<2x32xf32>
    %165 = arith.mulf %161, %149 : vector<2x32xf32>
    %166 = arith.mulf %160, %164 : vector<2x32xf32>
    %167 = arith.addf %165, %166 : vector<2x32xf32>
    %168 = math.tanh %167 : vector<2x32xf32>
    %169 = arith.mulf %162, %168 : vector<2x32xf32>
    %170 = tpu.concatenate %43, %61, %79, %97, %115, %133, %151, %169 in 0 : vector<2x32xf32>, vector<2x32xf32>, vector<2x32xf32>, vector<2x32xf32>, vector<2x32xf32>, vector<2x32xf32>, vector<2x32xf32>, vector<2x32xf32> -> vector<16x32xf32>
    %171 = math.tanh %170 : vector<16x32xf32>
    %c0_25 = arith.constant 0 : index
    %c0_26 = arith.constant 0 : index
    %172 = vector.load %arg5[%c0_25, %c0_26] : memref<32x64xf32, #tpu.memory_space<vmem>>, vector<32x64xf32>
    %c0_27 = arith.constant 0 : index
    %c0_28 = arith.constant 0 : index
    %173 = vector.load %arg6[%c0_27, %c0_28] : memref<16x64xf32, #tpu.memory_space<vmem>>, vector<16x64xf32>
    %c0_29 = arith.constant 0 : index
    %c0_30 = arith.constant 0 : index
    %174 = vector.load %arg7[%c0_29, %c0_30] : memref<1x64xf32, #tpu.memory_space<vmem>>, vector<1x64xf32>
    %cst_31 = arith.constant dense<0.000000e+00> : vector<16x64xf32>
    %175 = tpu.matmul %171, %172, %cst_31 {dimension_numbers = #tpu.dot_dimension_numbers<[1], [0], [0], [1], [0, 0, 1, 1], [], []>} : vector<16x32xf32>, vector<32x64xf32>, vector<16x64xf32> -> vector<16x64xf32>
    %176 = vector.broadcast %174 : vector<1x64xf32> to vector<16x64xf32>
    %177 = arith.addf %175, %176 : vector<16x64xf32>
    %178 = vector.extract_strided_slice %177 {offsets = [0, 0], sizes = [2, 64], strides = [1, 1]} : vector<16x64xf32> to vector<2x64xf32>
    %179 = vector.extract_strided_slice %177 {offsets = [2, 0], sizes = [2, 64], strides = [1, 1]} : vector<16x64xf32> to vector<2x64xf32>
    %180 = vector.extract_strided_slice %177 {offsets = [4, 0], sizes = [2, 64], strides = [1, 1]} : vector<16x64xf32> to vector<2x64xf32>
    %181 = vector.extract_strided_slice %177 {offsets = [6, 0], sizes = [2, 64], strides = [1, 1]} : vector<16x64xf32> to vector<2x64xf32>
    %182 = vector.extract_strided_slice %177 {offsets = [8, 0], sizes = [2, 64], strides = [1, 1]} : vector<16x64xf32> to vector<2x64xf32>
    %183 = vector.extract_strided_slice %177 {offsets = [10, 0], sizes = [2, 64], strides = [1, 1]} : vector<16x64xf32> to vector<2x64xf32>
    %184 = vector.extract_strided_slice %177 {offsets = [12, 0], sizes = [2, 64], strides = [1, 1]} : vector<16x64xf32> to vector<2x64xf32>
    %185 = vector.extract_strided_slice %177 {offsets = [14, 0], sizes = [2, 64], strides = [1, 1]} : vector<16x64xf32> to vector<2x64xf32>
    %cst_32 = arith.constant 0.000000e+00 : f32
    %186 = vector.broadcast %cst_32 : f32 to vector<2x16xf32>
    %cst_33 = arith.constant 0.000000e+00 : f32
    %187 = vector.broadcast %cst_33 : f32 to vector<2x16xf32>
    %cst_34 = arith.constant dense<0.000000e+00> : vector<2x64xf32>
    %188 = tpu.matmul %186, %173, %cst_34 {dimension_numbers = #tpu.dot_dimension_numbers<[1], [0], [0], [1], [0, 0, 1, 1], [], []>} : vector<2x16xf32>, vector<16x64xf32>, vector<2x64xf32> -> vector<2x64xf32>
    %189 = arith.addf %178, %188 : vector<2x64xf32>
    %190 = vector.extract_strided_slice %189 {offsets = [0, 0], sizes = [2, 48], strides = [1, 1]} : vector<2x64xf32> to vector<2x48xf32>
    %191 = arith.negf %190 : vector<2x48xf32>
    %192 = math.exp %191 : vector<2x48xf32>
    %cst_35 = arith.constant 1.000000e+00 : f32
    %193 = vector.broadcast %cst_35 : f32 to vector<2x48xf32>
    %194 = arith.addf %193, %192 : vector<2x48xf32>
    %195 = arith.divf %193, %194 : vector<2x48xf32>
    %196 = vector.extract_strided_slice %195 {offsets = [0, 0], sizes = [2, 16], strides = [1, 1]} : vector<2x48xf32> to vector<2x16xf32>
    %197 = vector.extract_strided_slice %195 {offsets = [0, 16], sizes = [2, 16], strides = [1, 1]} : vector<2x48xf32> to vector<2x16xf32>
    %198 = vector.extract_strided_slice %195 {offsets = [0, 32], sizes = [2, 16], strides = [1, 1]} : vector<2x48xf32> to vector<2x16xf32>
    %199 = vector.extract_strided_slice %189 {offsets = [0, 48], sizes = [2, 16], strides = [1, 1]} : vector<2x64xf32> to vector<2x16xf32>
    %200 = math.tanh %199 : vector<2x16xf32>
    %201 = arith.mulf %197, %187 : vector<2x16xf32>
    %202 = arith.mulf %196, %200 : vector<2x16xf32>
    %203 = arith.addf %201, %202 : vector<2x16xf32>
    %204 = math.tanh %203 : vector<2x16xf32>
    %205 = arith.mulf %198, %204 : vector<2x16xf32>
    %cst_36 = arith.constant dense<0.000000e+00> : vector<2x64xf32>
    %206 = tpu.matmul %205, %173, %cst_36 {dimension_numbers = #tpu.dot_dimension_numbers<[1], [0], [0], [1], [0, 0, 1, 1], [], []>} : vector<2x16xf32>, vector<16x64xf32>, vector<2x64xf32> -> vector<2x64xf32>
    %207 = arith.addf %179, %206 : vector<2x64xf32>
    %208 = vector.extract_strided_slice %207 {offsets = [0, 0], sizes = [2, 48], strides = [1, 1]} : vector<2x64xf32> to vector<2x48xf32>
    %209 = arith.negf %208 : vector<2x48xf32>
    %210 = math.exp %209 : vector<2x48xf32>
    %cst_37 = arith.constant 1.000000e+00 : f32
    %211 = vector.broadcast %cst_37 : f32 to vector<2x48xf32>
    %212 = arith.addf %211, %210 : vector<2x48xf32>
    %213 = arith.divf %211, %212 : vector<2x48xf32>
    %214 = vector.extract_strided_slice %213 {offsets = [0, 0], sizes = [2, 16], strides = [1, 1]} : vector<2x48xf32> to vector<2x16xf32>
    %215 = vector.extract_strided_slice %213 {offsets = [0, 16], sizes = [2, 16], strides = [1, 1]} : vector<2x48xf32> to vector<2x16xf32>
    %216 = vector.extract_strided_slice %213 {offsets = [0, 32], sizes = [2, 16], strides = [1, 1]} : vector<2x48xf32> to vector<2x16xf32>
    %217 = vector.extract_strided_slice %207 {offsets = [0, 48], sizes = [2, 16], strides = [1, 1]} : vector<2x64xf32> to vector<2x16xf32>
    %218 = math.tanh %217 : vector<2x16xf32>
    %219 = arith.mulf %215, %203 : vector<2x16xf32>
    %220 = arith.mulf %214, %218 : vector<2x16xf32>
    %221 = arith.addf %219, %220 : vector<2x16xf32>
    %222 = math.tanh %221 : vector<2x16xf32>
    %223 = arith.mulf %216, %222 : vector<2x16xf32>
    %cst_38 = arith.constant dense<0.000000e+00> : vector<2x64xf32>
    %224 = tpu.matmul %223, %173, %cst_38 {dimension_numbers = #tpu.dot_dimension_numbers<[1], [0], [0], [1], [0, 0, 1, 1], [], []>} : vector<2x16xf32>, vector<16x64xf32>, vector<2x64xf32> -> vector<2x64xf32>
    %225 = arith.addf %180, %224 : vector<2x64xf32>
    %226 = vector.extract_strided_slice %225 {offsets = [0, 0], sizes = [2, 48], strides = [1, 1]} : vector<2x64xf32> to vector<2x48xf32>
    %227 = arith.negf %226 : vector<2x48xf32>
    %228 = math.exp %227 : vector<2x48xf32>
    %cst_39 = arith.constant 1.000000e+00 : f32
    %229 = vector.broadcast %cst_39 : f32 to vector<2x48xf32>
    %230 = arith.addf %229, %228 : vector<2x48xf32>
    %231 = arith.divf %229, %230 : vector<2x48xf32>
    %232 = vector.extract_strided_slice %231 {offsets = [0, 0], sizes = [2, 16], strides = [1, 1]} : vector<2x48xf32> to vector<2x16xf32>
    %233 = vector.extract_strided_slice %231 {offsets = [0, 16], sizes = [2, 16], strides = [1, 1]} : vector<2x48xf32> to vector<2x16xf32>
    %234 = vector.extract_strided_slice %231 {offsets = [0, 32], sizes = [2, 16], strides = [1, 1]} : vector<2x48xf32> to vector<2x16xf32>
    %235 = vector.extract_strided_slice %225 {offsets = [0, 48], sizes = [2, 16], strides = [1, 1]} : vector<2x64xf32> to vector<2x16xf32>
    %236 = math.tanh %235 : vector<2x16xf32>
    %237 = arith.mulf %233, %221 : vector<2x16xf32>
    %238 = arith.mulf %232, %236 : vector<2x16xf32>
    %239 = arith.addf %237, %238 : vector<2x16xf32>
    %240 = math.tanh %239 : vector<2x16xf32>
    %241 = arith.mulf %234, %240 : vector<2x16xf32>
    %cst_40 = arith.constant dense<0.000000e+00> : vector<2x64xf32>
    %242 = tpu.matmul %241, %173, %cst_40 {dimension_numbers = #tpu.dot_dimension_numbers<[1], [0], [0], [1], [0, 0, 1, 1], [], []>} : vector<2x16xf32>, vector<16x64xf32>, vector<2x64xf32> -> vector<2x64xf32>
    %243 = arith.addf %181, %242 : vector<2x64xf32>
    %244 = vector.extract_strided_slice %243 {offsets = [0, 0], sizes = [2, 48], strides = [1, 1]} : vector<2x64xf32> to vector<2x48xf32>
    %245 = arith.negf %244 : vector<2x48xf32>
    %246 = math.exp %245 : vector<2x48xf32>
    %cst_41 = arith.constant 1.000000e+00 : f32
    %247 = vector.broadcast %cst_41 : f32 to vector<2x48xf32>
    %248 = arith.addf %247, %246 : vector<2x48xf32>
    %249 = arith.divf %247, %248 : vector<2x48xf32>
    %250 = vector.extract_strided_slice %249 {offsets = [0, 0], sizes = [2, 16], strides = [1, 1]} : vector<2x48xf32> to vector<2x16xf32>
    %251 = vector.extract_strided_slice %249 {offsets = [0, 16], sizes = [2, 16], strides = [1, 1]} : vector<2x48xf32> to vector<2x16xf32>
    %252 = vector.extract_strided_slice %249 {offsets = [0, 32], sizes = [2, 16], strides = [1, 1]} : vector<2x48xf32> to vector<2x16xf32>
    %253 = vector.extract_strided_slice %243 {offsets = [0, 48], sizes = [2, 16], strides = [1, 1]} : vector<2x64xf32> to vector<2x16xf32>
    %254 = math.tanh %253 : vector<2x16xf32>
    %255 = arith.mulf %251, %239 : vector<2x16xf32>
    %256 = arith.mulf %250, %254 : vector<2x16xf32>
    %257 = arith.addf %255, %256 : vector<2x16xf32>
    %258 = math.tanh %257 : vector<2x16xf32>
    %259 = arith.mulf %252, %258 : vector<2x16xf32>
    %cst_42 = arith.constant dense<0.000000e+00> : vector<2x64xf32>
    %260 = tpu.matmul %259, %173, %cst_42 {dimension_numbers = #tpu.dot_dimension_numbers<[1], [0], [0], [1], [0, 0, 1, 1], [], []>} : vector<2x16xf32>, vector<16x64xf32>, vector<2x64xf32> -> vector<2x64xf32>
    %261 = arith.addf %182, %260 : vector<2x64xf32>
    %262 = vector.extract_strided_slice %261 {offsets = [0, 0], sizes = [2, 48], strides = [1, 1]} : vector<2x64xf32> to vector<2x48xf32>
    %263 = arith.negf %262 : vector<2x48xf32>
    %264 = math.exp %263 : vector<2x48xf32>
    %cst_43 = arith.constant 1.000000e+00 : f32
    %265 = vector.broadcast %cst_43 : f32 to vector<2x48xf32>
    %266 = arith.addf %265, %264 : vector<2x48xf32>
    %267 = arith.divf %265, %266 : vector<2x48xf32>
    %268 = vector.extract_strided_slice %267 {offsets = [0, 0], sizes = [2, 16], strides = [1, 1]} : vector<2x48xf32> to vector<2x16xf32>
    %269 = vector.extract_strided_slice %267 {offsets = [0, 16], sizes = [2, 16], strides = [1, 1]} : vector<2x48xf32> to vector<2x16xf32>
    %270 = vector.extract_strided_slice %267 {offsets = [0, 32], sizes = [2, 16], strides = [1, 1]} : vector<2x48xf32> to vector<2x16xf32>
    %271 = vector.extract_strided_slice %261 {offsets = [0, 48], sizes = [2, 16], strides = [1, 1]} : vector<2x64xf32> to vector<2x16xf32>
    %272 = math.tanh %271 : vector<2x16xf32>
    %273 = arith.mulf %269, %257 : vector<2x16xf32>
    %274 = arith.mulf %268, %272 : vector<2x16xf32>
    %275 = arith.addf %273, %274 : vector<2x16xf32>
    %276 = math.tanh %275 : vector<2x16xf32>
    %277 = arith.mulf %270, %276 : vector<2x16xf32>
    %cst_44 = arith.constant dense<0.000000e+00> : vector<2x64xf32>
    %278 = tpu.matmul %277, %173, %cst_44 {dimension_numbers = #tpu.dot_dimension_numbers<[1], [0], [0], [1], [0, 0, 1, 1], [], []>} : vector<2x16xf32>, vector<16x64xf32>, vector<2x64xf32> -> vector<2x64xf32>
    %279 = arith.addf %183, %278 : vector<2x64xf32>
    %280 = vector.extract_strided_slice %279 {offsets = [0, 0], sizes = [2, 48], strides = [1, 1]} : vector<2x64xf32> to vector<2x48xf32>
    %281 = arith.negf %280 : vector<2x48xf32>
    %282 = math.exp %281 : vector<2x48xf32>
    %cst_45 = arith.constant 1.000000e+00 : f32
    %283 = vector.broadcast %cst_45 : f32 to vector<2x48xf32>
    %284 = arith.addf %283, %282 : vector<2x48xf32>
    %285 = arith.divf %283, %284 : vector<2x48xf32>
    %286 = vector.extract_strided_slice %285 {offsets = [0, 0], sizes = [2, 16], strides = [1, 1]} : vector<2x48xf32> to vector<2x16xf32>
    %287 = vector.extract_strided_slice %285 {offsets = [0, 16], sizes = [2, 16], strides = [1, 1]} : vector<2x48xf32> to vector<2x16xf32>
    %288 = vector.extract_strided_slice %285 {offsets = [0, 32], sizes = [2, 16], strides = [1, 1]} : vector<2x48xf32> to vector<2x16xf32>
    %289 = vector.extract_strided_slice %279 {offsets = [0, 48], sizes = [2, 16], strides = [1, 1]} : vector<2x64xf32> to vector<2x16xf32>
    %290 = math.tanh %289 : vector<2x16xf32>
    %291 = arith.mulf %287, %275 : vector<2x16xf32>
    %292 = arith.mulf %286, %290 : vector<2x16xf32>
    %293 = arith.addf %291, %292 : vector<2x16xf32>
    %294 = math.tanh %293 : vector<2x16xf32>
    %295 = arith.mulf %288, %294 : vector<2x16xf32>
    %cst_46 = arith.constant dense<0.000000e+00> : vector<2x64xf32>
    %296 = tpu.matmul %295, %173, %cst_46 {dimension_numbers = #tpu.dot_dimension_numbers<[1], [0], [0], [1], [0, 0, 1, 1], [], []>} : vector<2x16xf32>, vector<16x64xf32>, vector<2x64xf32> -> vector<2x64xf32>
    %297 = arith.addf %184, %296 : vector<2x64xf32>
    %298 = vector.extract_strided_slice %297 {offsets = [0, 0], sizes = [2, 48], strides = [1, 1]} : vector<2x64xf32> to vector<2x48xf32>
    %299 = arith.negf %298 : vector<2x48xf32>
    %300 = math.exp %299 : vector<2x48xf32>
    %cst_47 = arith.constant 1.000000e+00 : f32
    %301 = vector.broadcast %cst_47 : f32 to vector<2x48xf32>
    %302 = arith.addf %301, %300 : vector<2x48xf32>
    %303 = arith.divf %301, %302 : vector<2x48xf32>
    %304 = vector.extract_strided_slice %303 {offsets = [0, 0], sizes = [2, 16], strides = [1, 1]} : vector<2x48xf32> to vector<2x16xf32>
    %305 = vector.extract_strided_slice %303 {offsets = [0, 16], sizes = [2, 16], strides = [1, 1]} : vector<2x48xf32> to vector<2x16xf32>
    %306 = vector.extract_strided_slice %303 {offsets = [0, 32], sizes = [2, 16], strides = [1, 1]} : vector<2x48xf32> to vector<2x16xf32>
    %307 = vector.extract_strided_slice %297 {offsets = [0, 48], sizes = [2, 16], strides = [1, 1]} : vector<2x64xf32> to vector<2x16xf32>
    %308 = math.tanh %307 : vector<2x16xf32>
    %309 = arith.mulf %305, %293 : vector<2x16xf32>
    %310 = arith.mulf %304, %308 : vector<2x16xf32>
    %311 = arith.addf %309, %310 : vector<2x16xf32>
    %312 = math.tanh %311 : vector<2x16xf32>
    %313 = arith.mulf %306, %312 : vector<2x16xf32>
    %cst_48 = arith.constant dense<0.000000e+00> : vector<2x64xf32>
    %314 = tpu.matmul %313, %173, %cst_48 {dimension_numbers = #tpu.dot_dimension_numbers<[1], [0], [0], [1], [0, 0, 1, 1], [], []>} : vector<2x16xf32>, vector<16x64xf32>, vector<2x64xf32> -> vector<2x64xf32>
    %315 = arith.addf %185, %314 : vector<2x64xf32>
    %316 = vector.extract_strided_slice %315 {offsets = [0, 0], sizes = [2, 48], strides = [1, 1]} : vector<2x64xf32> to vector<2x48xf32>
    %317 = arith.negf %316 : vector<2x48xf32>
    %318 = math.exp %317 : vector<2x48xf32>
    %cst_49 = arith.constant 1.000000e+00 : f32
    %319 = vector.broadcast %cst_49 : f32 to vector<2x48xf32>
    %320 = arith.addf %319, %318 : vector<2x48xf32>
    %321 = arith.divf %319, %320 : vector<2x48xf32>
    %322 = vector.extract_strided_slice %321 {offsets = [0, 0], sizes = [2, 16], strides = [1, 1]} : vector<2x48xf32> to vector<2x16xf32>
    %323 = vector.extract_strided_slice %321 {offsets = [0, 16], sizes = [2, 16], strides = [1, 1]} : vector<2x48xf32> to vector<2x16xf32>
    %324 = vector.extract_strided_slice %321 {offsets = [0, 32], sizes = [2, 16], strides = [1, 1]} : vector<2x48xf32> to vector<2x16xf32>
    %325 = vector.extract_strided_slice %315 {offsets = [0, 48], sizes = [2, 16], strides = [1, 1]} : vector<2x64xf32> to vector<2x16xf32>
    %326 = math.tanh %325 : vector<2x16xf32>
    %327 = arith.mulf %323, %311 : vector<2x16xf32>
    %328 = arith.mulf %322, %326 : vector<2x16xf32>
    %329 = arith.addf %327, %328 : vector<2x16xf32>
    %330 = math.tanh %329 : vector<2x16xf32>
    %331 = arith.mulf %324, %330 : vector<2x16xf32>
    %332 = math.tanh %205 : vector<2x16xf32>
    %c0_50 = arith.constant 0 : index
    %c0_51 = arith.constant 0 : index
    %333 = vector.load %arg17[%c0_50, %c0_51] : memref<2x128xf32, #tpu.memory_space<vmem>>, vector<2x16xf32>
    tpu.vector_store %arg17[%c0_50, %c0_51], %332 {strides = array<i32>} : memref<2x128xf32, #tpu.memory_space<vmem>>, vector<2x16xf32>,
    %334 = math.tanh %223 : vector<2x16xf32>
    %c0_52 = arith.constant 0 : index
    %c16 = arith.constant 16 : index
    %335 = vector.load %arg17[%c0_52, %c16] : memref<2x128xf32, #tpu.memory_space<vmem>>, vector<2x16xf32>
    tpu.vector_store %arg17[%c0_52, %c16], %334 {strides = array<i32>} : memref<2x128xf32, #tpu.memory_space<vmem>>, vector<2x16xf32>,
    %336 = math.tanh %241 : vector<2x16xf32>
    %c0_53 = arith.constant 0 : index
    %c32 = arith.constant 32 : index
    %337 = vector.load %arg17[%c0_53, %c32] : memref<2x128xf32, #tpu.memory_space<vmem>>, vector<2x16xf32>
    tpu.vector_store %arg17[%c0_53, %c32], %336 {strides = array<i32>} : memref<2x128xf32, #tpu.memory_space<vmem>>, vector<2x16xf32>,
    %338 = math.tanh %259 : vector<2x16xf32>
    %c0_54 = arith.constant 0 : index
    %c48 = arith.constant 48 : index
    %339 = vector.load %arg17[%c0_54, %c48] : memref<2x128xf32, #tpu.memory_space<vmem>>, vector<2x16xf32>
    tpu.vector_store %arg17[%c0_54, %c48], %338 {strides = array<i32>} : memref<2x128xf32, #tpu.memory_space<vmem>>, vector<2x16xf32>,
    %340 = math.tanh %277 : vector<2x16xf32>
    %c0_55 = arith.constant 0 : index
    %c64 = arith.constant 64 : index
    %341 = vector.load %arg17[%c0_55, %c64] : memref<2x128xf32, #tpu.memory_space<vmem>>, vector<2x16xf32>
    tpu.vector_store %arg17[%c0_55, %c64], %340 {strides = array<i32>} : memref<2x128xf32, #tpu.memory_space<vmem>>, vector<2x16xf32>,
    %342 = math.tanh %295 : vector<2x16xf32>
    %c0_56 = arith.constant 0 : index
    %c80 = arith.constant 80 : index
    %343 = vector.load %arg17[%c0_56, %c80] : memref<2x128xf32, #tpu.memory_space<vmem>>, vector<2x16xf32>
    tpu.vector_store %arg17[%c0_56, %c80], %342 {strides = array<i32>} : memref<2x128xf32, #tpu.memory_space<vmem>>, vector<2x16xf32>,
    %344 = math.tanh %313 : vector<2x16xf32>
    %c0_57 = arith.constant 0 : index
    %c96 = arith.constant 96 : index
    %345 = vector.load %arg17[%c0_57, %c96] : memref<2x128xf32, #tpu.memory_space<vmem>>, vector<2x16xf32>
    tpu.vector_store %arg17[%c0_57, %c96], %344 {strides = array<i32>} : memref<2x128xf32, #tpu.memory_space<vmem>>, vector<2x16xf32>,
    %346 = math.tanh %331 : vector<2x16xf32>
    %c0_58 = arith.constant 0 : index
    %c112 = arith.constant 112 : index
    %347 = vector.load %arg17[%c0_58, %c112] : memref<2x128xf32, #tpu.memory_space<vmem>>, vector<2x16xf32>
    tpu.vector_store %arg17[%c0_58, %c112], %346 {strides = array<i32>} : memref<2x128xf32, #tpu.memory_space<vmem>>, vector<2x16xf32>,
    %c0_59 = arith.constant 0 : index
    %c0_60 = arith.constant 0 : index
    %348 = vector.load %arg17[%c0_59, %c0_60] : memref<2x128xf32, #tpu.memory_space<vmem>>, vector<2x128xf32>
    %c0_61 = arith.constant 0 : index
    %c0_62 = arith.constant 0 : index
    %349 = vector.load %arg1[%c0_61, %c0_62] : memref<2x128xf32, #tpu.memory_space<vmem>>, vector<2x128xf32>
    %cst_63 = arith.constant 5.000000e-01 : f32
    %350 = vector.broadcast %cst_63 : f32 to vector<2x128xf32>
    %351 = arith.mulf %350, %348 : vector<2x128xf32>
    %352 = math.exp %351 : vector<2x128xf32>
    %353 = arith.mulf %349, %352 : vector<2x128xf32>
    %354 = arith.addf %348, %353 : vector<2x128xf32>
    %355 = vector.extract_strided_slice %354 {offsets = [0, 0], sizes = [2, 16], strides = [1, 1]} : vector<2x128xf32> to vector<2x16xf32>
    %356 = vector.extract_strided_slice %354 {offsets = [0, 16], sizes = [2, 16], strides = [1, 1]} : vector<2x128xf32> to vector<2x16xf32>
    %357 = vector.extract_strided_slice %354 {offsets = [0, 32], sizes = [2, 16], strides = [1, 1]} : vector<2x128xf32> to vector<2x16xf32>
    %358 = vector.extract_strided_slice %354 {offsets = [0, 48], sizes = [2, 16], strides = [1, 1]} : vector<2x128xf32> to vector<2x16xf32>
    %359 = vector.extract_strided_slice %354 {offsets = [0, 64], sizes = [2, 16], strides = [1, 1]} : vector<2x128xf32> to vector<2x16xf32>
    %360 = vector.extract_strided_slice %354 {offsets = [0, 80], sizes = [2, 16], strides = [1, 1]} : vector<2x128xf32> to vector<2x16xf32>
    %361 = vector.extract_strided_slice %354 {offsets = [0, 96], sizes = [2, 16], strides = [1, 1]} : vector<2x128xf32> to vector<2x16xf32>
    %362 = vector.extract_strided_slice %354 {offsets = [0, 112], sizes = [2, 16], strides = [1, 1]} : vector<2x128xf32> to vector<2x16xf32>
    %363 = tpu.concatenate %355, %356, %357, %358, %359, %360, %361, %362 in 0 : vector<2x16xf32>, vector<2x16xf32>, vector<2x16xf32>, vector<2x16xf32>, vector<2x16xf32>, vector<2x16xf32>, vector<2x16xf32>, vector<2x16xf32> -> vector<16x16xf32>
    %c0_64 = arith.constant 0 : index
    %c0_65 = arith.constant 0 : index
    %364 = vector.load %arg8[%c0_64, %c0_65] : memref<16x128xf32, #tpu.memory_space<vmem>>, vector<16x128xf32>
    %c0_66 = arith.constant 0 : index
    %c0_67 = arith.constant 0 : index
    %365 = vector.load %arg9[%c0_66, %c0_67] : memref<32x128xf32, #tpu.memory_space<vmem>>, vector<32x128xf32>
    %c0_68 = arith.constant 0 : index
    %c0_69 = arith.constant 0 : index
    %366 = vector.load %arg10[%c0_68, %c0_69] : memref<1x128xf32, #tpu.memory_space<vmem>>, vector<1x128xf32>
    %cst_70 = arith.constant dense<0.000000e+00> : vector<16x128xf32>
    %367 = tpu.matmul %363, %364, %cst_70 {dimension_numbers = #tpu.dot_dimension_numbers<[1], [0], [0], [1], [0, 0, 1, 1], [], []>} : vector<16x16xf32>, vector<16x128xf32>, vector<16x128xf32> -> vector<16x128xf32>
    %368 = vector.broadcast %366 : vector<1x128xf32> to vector<16x128xf32>
    %369 = arith.addf %367, %368 : vector<16x128xf32>
    %370 = vector.extract_strided_slice %369 {offsets = [0, 0], sizes = [2, 128], strides = [1, 1]} : vector<16x128xf32> to vector<2x128xf32>
    %371 = vector.extract_strided_slice %369 {offsets = [2, 0], sizes = [2, 128], strides = [1, 1]} : vector<16x128xf32> to vector<2x128xf32>
    %372 = vector.extract_strided_slice %369 {offsets = [4, 0], sizes = [2, 128], strides = [1, 1]} : vector<16x128xf32> to vector<2x128xf32>
    %373 = vector.extract_strided_slice %369 {offsets = [6, 0], sizes = [2, 128], strides = [1, 1]} : vector<16x128xf32> to vector<2x128xf32>
    %374 = vector.extract_strided_slice %369 {offsets = [8, 0], sizes = [2, 128], strides = [1, 1]} : vector<16x128xf32> to vector<2x128xf32>
    %375 = vector.extract_strided_slice %369 {offsets = [10, 0], sizes = [2, 128], strides = [1, 1]} : vector<16x128xf32> to vector<2x128xf32>
    %376 = vector.extract_strided_slice %369 {offsets = [12, 0], sizes = [2, 128], strides = [1, 1]} : vector<16x128xf32> to vector<2x128xf32>
    %377 = vector.extract_strided_slice %369 {offsets = [14, 0], sizes = [2, 128], strides = [1, 1]} : vector<16x128xf32> to vector<2x128xf32>
    %cst_71 = arith.constant 0.000000e+00 : f32
    %378 = vector.broadcast %cst_71 : f32 to vector<2x32xf32>
    %cst_72 = arith.constant 0.000000e+00 : f32
    %379 = vector.broadcast %cst_72 : f32 to vector<2x32xf32>
    %cst_73 = arith.constant dense<0.000000e+00> : vector<2x128xf32>
    %380 = tpu.matmul %378, %365, %cst_73 {dimension_numbers = #tpu.dot_dimension_numbers<[1], [0], [0], [1], [0, 0, 1, 1], [], []>} : vector<2x32xf32>, vector<32x128xf32>, vector<2x128xf32> -> vector<2x128xf32>
    %381 = arith.addf %370, %380 : vector<2x128xf32>
    %382 = vector.extract_strided_slice %381 {offsets = [0, 0], sizes = [2, 96], strides = [1, 1]} : vector<2x128xf32> to vector<2x96xf32>
    %383 = arith.negf %382 : vector<2x96xf32>
    %384 = math.exp %383 : vector<2x96xf32>
    %cst_74 = arith.constant 1.000000e+00 : f32
    %385 = vector.broadcast %cst_74 : f32 to vector<2x96xf32>
    %386 = arith.addf %385, %384 : vector<2x96xf32>
    %387 = arith.divf %385, %386 : vector<2x96xf32>
    %388 = vector.extract_strided_slice %387 {offsets = [0, 0], sizes = [2, 32], strides = [1, 1]} : vector<2x96xf32> to vector<2x32xf32>
    %389 = vector.extract_strided_slice %387 {offsets = [0, 32], sizes = [2, 32], strides = [1, 1]} : vector<2x96xf32> to vector<2x32xf32>
    %390 = vector.extract_strided_slice %387 {offsets = [0, 64], sizes = [2, 32], strides = [1, 1]} : vector<2x96xf32> to vector<2x32xf32>
    %391 = vector.extract_strided_slice %381 {offsets = [0, 96], sizes = [2, 32], strides = [1, 1]} : vector<2x128xf32> to vector<2x32xf32>
    %392 = math.tanh %391 : vector<2x32xf32>
    %393 = arith.mulf %389, %379 : vector<2x32xf32>
    %394 = arith.mulf %388, %392 : vector<2x32xf32>
    %395 = arith.addf %393, %394 : vector<2x32xf32>
    %396 = math.tanh %395 : vector<2x32xf32>
    %397 = arith.mulf %390, %396 : vector<2x32xf32>
    %cst_75 = arith.constant dense<0.000000e+00> : vector<2x128xf32>
    %398 = tpu.matmul %397, %365, %cst_75 {dimension_numbers = #tpu.dot_dimension_numbers<[1], [0], [0], [1], [0, 0, 1, 1], [], []>} : vector<2x32xf32>, vector<32x128xf32>, vector<2x128xf32> -> vector<2x128xf32>
    %399 = arith.addf %371, %398 : vector<2x128xf32>
    %400 = vector.extract_strided_slice %399 {offsets = [0, 0], sizes = [2, 96], strides = [1, 1]} : vector<2x128xf32> to vector<2x96xf32>
    %401 = arith.negf %400 : vector<2x96xf32>
    %402 = math.exp %401 : vector<2x96xf32>
    %cst_76 = arith.constant 1.000000e+00 : f32
    %403 = vector.broadcast %cst_76 : f32 to vector<2x96xf32>
    %404 = arith.addf %403, %402 : vector<2x96xf32>
    %405 = arith.divf %403, %404 : vector<2x96xf32>
    %406 = vector.extract_strided_slice %405 {offsets = [0, 0], sizes = [2, 32], strides = [1, 1]} : vector<2x96xf32> to vector<2x32xf32>
    %407 = vector.extract_strided_slice %405 {offsets = [0, 32], sizes = [2, 32], strides = [1, 1]} : vector<2x96xf32> to vector<2x32xf32>
    %408 = vector.extract_strided_slice %405 {offsets = [0, 64], sizes = [2, 32], strides = [1, 1]} : vector<2x96xf32> to vector<2x32xf32>
    %409 = vector.extract_strided_slice %399 {offsets = [0, 96], sizes = [2, 32], strides = [1, 1]} : vector<2x128xf32> to vector<2x32xf32>
    %410 = math.tanh %409 : vector<2x32xf32>
    %411 = arith.mulf %407, %395 : vector<2x32xf32>
    %412 = arith.mulf %406, %410 : vector<2x32xf32>
    %413 = arith.addf %411, %412 : vector<2x32xf32>
    %414 = math.tanh %413 : vector<2x32xf32>
    %415 = arith.mulf %408, %414 : vector<2x32xf32>
    %cst_77 = arith.constant dense<0.000000e+00> : vector<2x128xf32>
    %416 = tpu.matmul %415, %365, %cst_77 {dimension_numbers = #tpu.dot_dimension_numbers<[1], [0], [0], [1], [0, 0, 1, 1], [], []>} : vector<2x32xf32>, vector<32x128xf32>, vector<2x128xf32> -> vector<2x128xf32>
    %417 = arith.addf %372, %416 : vector<2x128xf32>
    %418 = vector.extract_strided_slice %417 {offsets = [0, 0], sizes = [2, 96], strides = [1, 1]} : vector<2x128xf32> to vector<2x96xf32>
    %419 = arith.negf %418 : vector<2x96xf32>
    %420 = math.exp %419 : vector<2x96xf32>
    %cst_78 = arith.constant 1.000000e+00 : f32
    %421 = vector.broadcast %cst_78 : f32 to vector<2x96xf32>
    %422 = arith.addf %421, %420 : vector<2x96xf32>
    %423 = arith.divf %421, %422 : vector<2x96xf32>
    %424 = vector.extract_strided_slice %423 {offsets = [0, 0], sizes = [2, 32], strides = [1, 1]} : vector<2x96xf32> to vector<2x32xf32>
    %425 = vector.extract_strided_slice %423 {offsets = [0, 32], sizes = [2, 32], strides = [1, 1]} : vector<2x96xf32> to vector<2x32xf32>
    %426 = vector.extract_strided_slice %423 {offsets = [0, 64], sizes = [2, 32], strides = [1, 1]} : vector<2x96xf32> to vector<2x32xf32>
    %427 = vector.extract_strided_slice %417 {offsets = [0, 96], sizes = [2, 32], strides = [1, 1]} : vector<2x128xf32> to vector<2x32xf32>
    %428 = math.tanh %427 : vector<2x32xf32>
    %429 = arith.mulf %425, %413 : vector<2x32xf32>
    %430 = arith.mulf %424, %428 : vector<2x32xf32>
    %431 = arith.addf %429, %430 : vector<2x32xf32>
    %432 = math.tanh %431 : vector<2x32xf32>
    %433 = arith.mulf %426, %432 : vector<2x32xf32>
    %cst_79 = arith.constant dense<0.000000e+00> : vector<2x128xf32>
    %434 = tpu.matmul %433, %365, %cst_79 {dimension_numbers = #tpu.dot_dimension_numbers<[1], [0], [0], [1], [0, 0, 1, 1], [], []>} : vector<2x32xf32>, vector<32x128xf32>, vector<2x128xf32> -> vector<2x128xf32>
    %435 = arith.addf %373, %434 : vector<2x128xf32>
    %436 = vector.extract_strided_slice %435 {offsets = [0, 0], sizes = [2, 96], strides = [1, 1]} : vector<2x128xf32> to vector<2x96xf32>
    %437 = arith.negf %436 : vector<2x96xf32>
    %438 = math.exp %437 : vector<2x96xf32>
    %cst_80 = arith.constant 1.000000e+00 : f32
    %439 = vector.broadcast %cst_80 : f32 to vector<2x96xf32>
    %440 = arith.addf %439, %438 : vector<2x96xf32>
    %441 = arith.divf %439, %440 : vector<2x96xf32>
    %442 = vector.extract_strided_slice %441 {offsets = [0, 0], sizes = [2, 32], strides = [1, 1]} : vector<2x96xf32> to vector<2x32xf32>
    %443 = vector.extract_strided_slice %441 {offsets = [0, 32], sizes = [2, 32], strides = [1, 1]} : vector<2x96xf32> to vector<2x32xf32>
    %444 = vector.extract_strided_slice %441 {offsets = [0, 64], sizes = [2, 32], strides = [1, 1]} : vector<2x96xf32> to vector<2x32xf32>
    %445 = vector.extract_strided_slice %435 {offsets = [0, 96], sizes = [2, 32], strides = [1, 1]} : vector<2x128xf32> to vector<2x32xf32>
    %446 = math.tanh %445 : vector<2x32xf32>
    %447 = arith.mulf %443, %431 : vector<2x32xf32>
    %448 = arith.mulf %442, %446 : vector<2x32xf32>
    %449 = arith.addf %447, %448 : vector<2x32xf32>
    %450 = math.tanh %449 : vector<2x32xf32>
    %451 = arith.mulf %444, %450 : vector<2x32xf32>
    %cst_81 = arith.constant dense<0.000000e+00> : vector<2x128xf32>
    %452 = tpu.matmul %451, %365, %cst_81 {dimension_numbers = #tpu.dot_dimension_numbers<[1], [0], [0], [1], [0, 0, 1, 1], [], []>} : vector<2x32xf32>, vector<32x128xf32>, vector<2x128xf32> -> vector<2x128xf32>
    %453 = arith.addf %374, %452 : vector<2x128xf32>
    %454 = vector.extract_strided_slice %453 {offsets = [0, 0], sizes = [2, 96], strides = [1, 1]} : vector<2x128xf32> to vector<2x96xf32>
    %455 = arith.negf %454 : vector<2x96xf32>
    %456 = math.exp %455 : vector<2x96xf32>
    %cst_82 = arith.constant 1.000000e+00 : f32
    %457 = vector.broadcast %cst_82 : f32 to vector<2x96xf32>
    %458 = arith.addf %457, %456 : vector<2x96xf32>
    %459 = arith.divf %457, %458 : vector<2x96xf32>
    %460 = vector.extract_strided_slice %459 {offsets = [0, 0], sizes = [2, 32], strides = [1, 1]} : vector<2x96xf32> to vector<2x32xf32>
    %461 = vector.extract_strided_slice %459 {offsets = [0, 32], sizes = [2, 32], strides = [1, 1]} : vector<2x96xf32> to vector<2x32xf32>
    %462 = vector.extract_strided_slice %459 {offsets = [0, 64], sizes = [2, 32], strides = [1, 1]} : vector<2x96xf32> to vector<2x32xf32>
    %463 = vector.extract_strided_slice %453 {offsets = [0, 96], sizes = [2, 32], strides = [1, 1]} : vector<2x128xf32> to vector<2x32xf32>
    %464 = math.tanh %463 : vector<2x32xf32>
    %465 = arith.mulf %461, %449 : vector<2x32xf32>
    %466 = arith.mulf %460, %464 : vector<2x32xf32>
    %467 = arith.addf %465, %466 : vector<2x32xf32>
    %468 = math.tanh %467 : vector<2x32xf32>
    %469 = arith.mulf %462, %468 : vector<2x32xf32>
    %cst_83 = arith.constant dense<0.000000e+00> : vector<2x128xf32>
    %470 = tpu.matmul %469, %365, %cst_83 {dimension_numbers = #tpu.dot_dimension_numbers<[1], [0], [0], [1], [0, 0, 1, 1], [], []>} : vector<2x32xf32>, vector<32x128xf32>, vector<2x128xf32> -> vector<2x128xf32>
    %471 = arith.addf %375, %470 : vector<2x128xf32>
    %472 = vector.extract_strided_slice %471 {offsets = [0, 0], sizes = [2, 96], strides = [1, 1]} : vector<2x128xf32> to vector<2x96xf32>
    %473 = arith.negf %472 : vector<2x96xf32>
    %474 = math.exp %473 : vector<2x96xf32>
    %cst_84 = arith.constant 1.000000e+00 : f32
    %475 = vector.broadcast %cst_84 : f32 to vector<2x96xf32>
    %476 = arith.addf %475, %474 : vector<2x96xf32>
    %477 = arith.divf %475, %476 : vector<2x96xf32>
    %478 = vector.extract_strided_slice %477 {offsets = [0, 0], sizes = [2, 32], strides = [1, 1]} : vector<2x96xf32> to vector<2x32xf32>
    %479 = vector.extract_strided_slice %477 {offsets = [0, 32], sizes = [2, 32], strides = [1, 1]} : vector<2x96xf32> to vector<2x32xf32>
    %480 = vector.extract_strided_slice %477 {offsets = [0, 64], sizes = [2, 32], strides = [1, 1]} : vector<2x96xf32> to vector<2x32xf32>
    %481 = vector.extract_strided_slice %471 {offsets = [0, 96], sizes = [2, 32], strides = [1, 1]} : vector<2x128xf32> to vector<2x32xf32>
    %482 = math.tanh %481 : vector<2x32xf32>
    %483 = arith.mulf %479, %467 : vector<2x32xf32>
    %484 = arith.mulf %478, %482 : vector<2x32xf32>
    %485 = arith.addf %483, %484 : vector<2x32xf32>
    %486 = math.tanh %485 : vector<2x32xf32>
    %487 = arith.mulf %480, %486 : vector<2x32xf32>
    %cst_85 = arith.constant dense<0.000000e+00> : vector<2x128xf32>
    %488 = tpu.matmul %487, %365, %cst_85 {dimension_numbers = #tpu.dot_dimension_numbers<[1], [0], [0], [1], [0, 0, 1, 1], [], []>} : vector<2x32xf32>, vector<32x128xf32>, vector<2x128xf32> -> vector<2x128xf32>
    %489 = arith.addf %376, %488 : vector<2x128xf32>
    %490 = vector.extract_strided_slice %489 {offsets = [0, 0], sizes = [2, 96], strides = [1, 1]} : vector<2x128xf32> to vector<2x96xf32>
    %491 = arith.negf %490 : vector<2x96xf32>
    %492 = math.exp %491 : vector<2x96xf32>
    %cst_86 = arith.constant 1.000000e+00 : f32
    %493 = vector.broadcast %cst_86 : f32 to vector<2x96xf32>
    %494 = arith.addf %493, %492 : vector<2x96xf32>
    %495 = arith.divf %493, %494 : vector<2x96xf32>
    %496 = vector.extract_strided_slice %495 {offsets = [0, 0], sizes = [2, 32], strides = [1, 1]} : vector<2x96xf32> to vector<2x32xf32>
    %497 = vector.extract_strided_slice %495 {offsets = [0, 32], sizes = [2, 32], strides = [1, 1]} : vector<2x96xf32> to vector<2x32xf32>
    %498 = vector.extract_strided_slice %495 {offsets = [0, 64], sizes = [2, 32], strides = [1, 1]} : vector<2x96xf32> to vector<2x32xf32>
    %499 = vector.extract_strided_slice %489 {offsets = [0, 96], sizes = [2, 32], strides = [1, 1]} : vector<2x128xf32> to vector<2x32xf32>
    %500 = math.tanh %499 : vector<2x32xf32>
    %501 = arith.mulf %497, %485 : vector<2x32xf32>
    %502 = arith.mulf %496, %500 : vector<2x32xf32>
    %503 = arith.addf %501, %502 : vector<2x32xf32>
    %504 = math.tanh %503 : vector<2x32xf32>
    %505 = arith.mulf %498, %504 : vector<2x32xf32>
    %cst_87 = arith.constant dense<0.000000e+00> : vector<2x128xf32>
    %506 = tpu.matmul %505, %365, %cst_87 {dimension_numbers = #tpu.dot_dimension_numbers<[1], [0], [0], [1], [0, 0, 1, 1], [], []>} : vector<2x32xf32>, vector<32x128xf32>, vector<2x128xf32> -> vector<2x128xf32>
    %507 = arith.addf %377, %506 : vector<2x128xf32>
    %508 = vector.extract_strided_slice %507 {offsets = [0, 0], sizes = [2, 96], strides = [1, 1]} : vector<2x128xf32> to vector<2x96xf32>
    %509 = arith.negf %508 : vector<2x96xf32>
    %510 = math.exp %509 : vector<2x96xf32>
    %cst_88 = arith.constant 1.000000e+00 : f32
    %511 = vector.broadcast %cst_88 : f32 to vector<2x96xf32>
    %512 = arith.addf %511, %510 : vector<2x96xf32>
    %513 = arith.divf %511, %512 : vector<2x96xf32>
    %514 = vector.extract_strided_slice %513 {offsets = [0, 0], sizes = [2, 32], strides = [1, 1]} : vector<2x96xf32> to vector<2x32xf32>
    %515 = vector.extract_strided_slice %513 {offsets = [0, 32], sizes = [2, 32], strides = [1, 1]} : vector<2x96xf32> to vector<2x32xf32>
    %516 = vector.extract_strided_slice %513 {offsets = [0, 64], sizes = [2, 32], strides = [1, 1]} : vector<2x96xf32> to vector<2x32xf32>
    %517 = vector.extract_strided_slice %507 {offsets = [0, 96], sizes = [2, 32], strides = [1, 1]} : vector<2x128xf32> to vector<2x32xf32>
    %518 = math.tanh %517 : vector<2x32xf32>
    %519 = arith.mulf %515, %503 : vector<2x32xf32>
    %520 = arith.mulf %514, %518 : vector<2x32xf32>
    %521 = arith.addf %519, %520 : vector<2x32xf32>
    %522 = math.tanh %521 : vector<2x32xf32>
    %523 = arith.mulf %516, %522 : vector<2x32xf32>
    %524 = tpu.concatenate %397, %415, %433, %451, %469, %487, %505, %523 in 0 : vector<2x32xf32>, vector<2x32xf32>, vector<2x32xf32>, vector<2x32xf32>, vector<2x32xf32>, vector<2x32xf32>, vector<2x32xf32>, vector<2x32xf32> -> vector<16x32xf32>
    %525 = math.tanh %524 : vector<16x32xf32>
    %c0_89 = arith.constant 0 : index
    %c0_90 = arith.constant 0 : index
    %526 = vector.load %arg11[%c0_89, %c0_90] : memref<32x16xf32, #tpu.memory_space<vmem>>, vector<32x16xf32>
    %c0_91 = arith.constant 0 : index
    %c0_92 = arith.constant 0 : index
    %527 = vector.load %arg12[%c0_91, %c0_92] : memref<4x16xf32, #tpu.memory_space<vmem>>, vector<4x16xf32>
    %c0_93 = arith.constant 0 : index
    %c0_94 = arith.constant 0 : index
    %528 = vector.load %arg13[%c0_93, %c0_94] : memref<1x16xf32, #tpu.memory_space<vmem>>, vector<1x16xf32>
    %cst_95 = arith.constant dense<0.000000e+00> : vector<16x16xf32>
    %529 = tpu.matmul %525, %526, %cst_95 {dimension_numbers = #tpu.dot_dimension_numbers<[1], [0], [0], [1], [0, 0, 1, 1], [], []>} : vector<16x32xf32>, vector<32x16xf32>, vector<16x16xf32> -> vector<16x16xf32>
    %530 = vector.broadcast %528 : vector<1x16xf32> to vector<16x16xf32>
    %531 = arith.addf %529, %530 : vector<16x16xf32>
    %532 = vector.extract_strided_slice %531 {offsets = [0, 0], sizes = [2, 16], strides = [1, 1]} : vector<16x16xf32> to vector<2x16xf32>
    %533 = vector.extract_strided_slice %531 {offsets = [2, 0], sizes = [2, 16], strides = [1, 1]} : vector<16x16xf32> to vector<2x16xf32>
    %534 = vector.extract_strided_slice %531 {offsets = [4, 0], sizes = [2, 16], strides = [1, 1]} : vector<16x16xf32> to vector<2x16xf32>
    %535 = vector.extract_strided_slice %531 {offsets = [6, 0], sizes = [2, 16], strides = [1, 1]} : vector<16x16xf32> to vector<2x16xf32>
    %536 = vector.extract_strided_slice %531 {offsets = [8, 0], sizes = [2, 16], strides = [1, 1]} : vector<16x16xf32> to vector<2x16xf32>
    %537 = vector.extract_strided_slice %531 {offsets = [10, 0], sizes = [2, 16], strides = [1, 1]} : vector<16x16xf32> to vector<2x16xf32>
    %538 = vector.extract_strided_slice %531 {offsets = [12, 0], sizes = [2, 16], strides = [1, 1]} : vector<16x16xf32> to vector<2x16xf32>
    %539 = vector.extract_strided_slice %531 {offsets = [14, 0], sizes = [2, 16], strides = [1, 1]} : vector<16x16xf32> to vector<2x16xf32>
    %cst_96 = arith.constant 0.000000e+00 : f32
    %540 = vector.broadcast %cst_96 : f32 to vector<2x4xf32>
    %cst_97 = arith.constant 0.000000e+00 : f32
    %541 = vector.broadcast %cst_97 : f32 to vector<2x4xf32>
    %cst_98 = arith.constant dense<0.000000e+00> : vector<2x16xf32>
    %542 = tpu.matmul %540, %527, %cst_98 {dimension_numbers = #tpu.dot_dimension_numbers<[1], [0], [0], [1], [0, 0, 1, 1], [], []>} : vector<2x4xf32>, vector<4x16xf32>, vector<2x16xf32> -> vector<2x16xf32>
    %543 = arith.addf %532, %542 : vector<2x16xf32>
    %544 = vector.extract_strided_slice %543 {offsets = [0, 0], sizes = [2, 12], strides = [1, 1]} : vector<2x16xf32> to vector<2x12xf32>
    %545 = arith.negf %544 : vector<2x12xf32>
    %546 = math.exp %545 : vector<2x12xf32>
    %cst_99 = arith.constant 1.000000e+00 : f32
    %547 = vector.broadcast %cst_99 : f32 to vector<2x12xf32>
    %548 = arith.addf %547, %546 : vector<2x12xf32>
    %549 = arith.divf %547, %548 : vector<2x12xf32>
    %550 = vector.extract_strided_slice %549 {offsets = [0, 0], sizes = [2, 4], strides = [1, 1]} : vector<2x12xf32> to vector<2x4xf32>
    %551 = vector.extract_strided_slice %549 {offsets = [0, 4], sizes = [2, 4], strides = [1, 1]} : vector<2x12xf32> to vector<2x4xf32>
    %552 = vector.extract_strided_slice %549 {offsets = [0, 8], sizes = [2, 4], strides = [1, 1]} : vector<2x12xf32> to vector<2x4xf32>
    %553 = vector.extract_strided_slice %543 {offsets = [0, 12], sizes = [2, 4], strides = [1, 1]} : vector<2x16xf32> to vector<2x4xf32>
    %554 = math.tanh %553 : vector<2x4xf32>
    %555 = arith.mulf %551, %541 : vector<2x4xf32>
    %556 = arith.mulf %550, %554 : vector<2x4xf32>
    %557 = arith.addf %555, %556 : vector<2x4xf32>
    %558 = math.tanh %557 : vector<2x4xf32>
    %559 = arith.mulf %552, %558 : vector<2x4xf32>
    %cst_100 = arith.constant dense<0.000000e+00> : vector<2x16xf32>
    %560 = tpu.matmul %559, %527, %cst_100 {dimension_numbers = #tpu.dot_dimension_numbers<[1], [0], [0], [1], [0, 0, 1, 1], [], []>} : vector<2x4xf32>, vector<4x16xf32>, vector<2x16xf32> -> vector<2x16xf32>
    %561 = arith.addf %533, %560 : vector<2x16xf32>
    %562 = vector.extract_strided_slice %561 {offsets = [0, 0], sizes = [2, 12], strides = [1, 1]} : vector<2x16xf32> to vector<2x12xf32>
    %563 = arith.negf %562 : vector<2x12xf32>
    %564 = math.exp %563 : vector<2x12xf32>
    %cst_101 = arith.constant 1.000000e+00 : f32
    %565 = vector.broadcast %cst_101 : f32 to vector<2x12xf32>
    %566 = arith.addf %565, %564 : vector<2x12xf32>
    %567 = arith.divf %565, %566 : vector<2x12xf32>
    %568 = vector.extract_strided_slice %567 {offsets = [0, 0], sizes = [2, 4], strides = [1, 1]} : vector<2x12xf32> to vector<2x4xf32>
    %569 = vector.extract_strided_slice %567 {offsets = [0, 4], sizes = [2, 4], strides = [1, 1]} : vector<2x12xf32> to vector<2x4xf32>
    %570 = vector.extract_strided_slice %567 {offsets = [0, 8], sizes = [2, 4], strides = [1, 1]} : vector<2x12xf32> to vector<2x4xf32>
    %571 = vector.extract_strided_slice %561 {offsets = [0, 12], sizes = [2, 4], strides = [1, 1]} : vector<2x16xf32> to vector<2x4xf32>
    %572 = math.tanh %571 : vector<2x4xf32>
    %573 = arith.mulf %569, %557 : vector<2x4xf32>
    %574 = arith.mulf %568, %572 : vector<2x4xf32>
    %575 = arith.addf %573, %574 : vector<2x4xf32>
    %576 = math.tanh %575 : vector<2x4xf32>
    %577 = arith.mulf %570, %576 : vector<2x4xf32>
    %cst_102 = arith.constant dense<0.000000e+00> : vector<2x16xf32>
    %578 = tpu.matmul %577, %527, %cst_102 {dimension_numbers = #tpu.dot_dimension_numbers<[1], [0], [0], [1], [0, 0, 1, 1], [], []>} : vector<2x4xf32>, vector<4x16xf32>, vector<2x16xf32> -> vector<2x16xf32>
    %579 = arith.addf %534, %578 : vector<2x16xf32>
    %580 = vector.extract_strided_slice %579 {offsets = [0, 0], sizes = [2, 12], strides = [1, 1]} : vector<2x16xf32> to vector<2x12xf32>
    %581 = arith.negf %580 : vector<2x12xf32>
    %582 = math.exp %581 : vector<2x12xf32>
    %cst_103 = arith.constant 1.000000e+00 : f32
    %583 = vector.broadcast %cst_103 : f32 to vector<2x12xf32>
    %584 = arith.addf %583, %582 : vector<2x12xf32>
    %585 = arith.divf %583, %584 : vector<2x12xf32>
    %586 = vector.extract_strided_slice %585 {offsets = [0, 0], sizes = [2, 4], strides = [1, 1]} : vector<2x12xf32> to vector<2x4xf32>
    %587 = vector.extract_strided_slice %585 {offsets = [0, 4], sizes = [2, 4], strides = [1, 1]} : vector<2x12xf32> to vector<2x4xf32>
    %588 = vector.extract_strided_slice %585 {offsets = [0, 8], sizes = [2, 4], strides = [1, 1]} : vector<2x12xf32> to vector<2x4xf32>
    %589 = vector.extract_strided_slice %579 {offsets = [0, 12], sizes = [2, 4], strides = [1, 1]} : vector<2x16xf32> to vector<2x4xf32>
    %590 = math.tanh %589 : vector<2x4xf32>
    %591 = arith.mulf %587, %575 : vector<2x4xf32>
    %592 = arith.mulf %586, %590 : vector<2x4xf32>
    %593 = arith.addf %591, %592 : vector<2x4xf32>
    %594 = math.tanh %593 : vector<2x4xf32>
    %595 = arith.mulf %588, %594 : vector<2x4xf32>
    %cst_104 = arith.constant dense<0.000000e+00> : vector<2x16xf32>
    %596 = tpu.matmul %595, %527, %cst_104 {dimension_numbers = #tpu.dot_dimension_numbers<[1], [0], [0], [1], [0, 0, 1, 1], [], []>} : vector<2x4xf32>, vector<4x16xf32>, vector<2x16xf32> -> vector<2x16xf32>
    %597 = arith.addf %535, %596 : vector<2x16xf32>
    %598 = vector.extract_strided_slice %597 {offsets = [0, 0], sizes = [2, 12], strides = [1, 1]} : vector<2x16xf32> to vector<2x12xf32>
    %599 = arith.negf %598 : vector<2x12xf32>
    %600 = math.exp %599 : vector<2x12xf32>
    %cst_105 = arith.constant 1.000000e+00 : f32
    %601 = vector.broadcast %cst_105 : f32 to vector<2x12xf32>
    %602 = arith.addf %601, %600 : vector<2x12xf32>
    %603 = arith.divf %601, %602 : vector<2x12xf32>
    %604 = vector.extract_strided_slice %603 {offsets = [0, 0], sizes = [2, 4], strides = [1, 1]} : vector<2x12xf32> to vector<2x4xf32>
    %605 = vector.extract_strided_slice %603 {offsets = [0, 4], sizes = [2, 4], strides = [1, 1]} : vector<2x12xf32> to vector<2x4xf32>
    %606 = vector.extract_strided_slice %603 {offsets = [0, 8], sizes = [2, 4], strides = [1, 1]} : vector<2x12xf32> to vector<2x4xf32>
    %607 = vector.extract_strided_slice %597 {offsets = [0, 12], sizes = [2, 4], strides = [1, 1]} : vector<2x16xf32> to vector<2x4xf32>
    %608 = math.tanh %607 : vector<2x4xf32>
    %609 = arith.mulf %605, %593 : vector<2x4xf32>
    %610 = arith.mulf %604, %608 : vector<2x4xf32>
    %611 = arith.addf %609, %610 : vector<2x4xf32>
    %612 = math.tanh %611 : vector<2x4xf32>
    %613 = arith.mulf %606, %612 : vector<2x4xf32>
    %cst_106 = arith.constant dense<0.000000e+00> : vector<2x16xf32>
    %614 = tpu.matmul %613, %527, %cst_106 {dimension_numbers = #tpu.dot_dimension_numbers<[1], [0], [0], [1], [0, 0, 1, 1], [], []>} : vector<2x4xf32>, vector<4x16xf32>, vector<2x16xf32> -> vector<2x16xf32>
    %615 = arith.addf %536, %614 : vector<2x16xf32>
    %616 = vector.extract_strided_slice %615 {offsets = [0, 0], sizes = [2, 12], strides = [1, 1]} : vector<2x16xf32> to vector<2x12xf32>
    %617 = arith.negf %616 : vector<2x12xf32>
    %618 = math.exp %617 : vector<2x12xf32>
    %cst_107 = arith.constant 1.000000e+00 : f32
    %619 = vector.broadcast %cst_107 : f32 to vector<2x12xf32>
    %620 = arith.addf %619, %618 : vector<2x12xf32>
    %621 = arith.divf %619, %620 : vector<2x12xf32>
    %622 = vector.extract_strided_slice %621 {offsets = [0, 0], sizes = [2, 4], strides = [1, 1]} : vector<2x12xf32> to vector<2x4xf32>
    %623 = vector.extract_strided_slice %621 {offsets = [0, 4], sizes = [2, 4], strides = [1, 1]} : vector<2x12xf32> to vector<2x4xf32>
    %624 = vector.extract_strided_slice %621 {offsets = [0, 8], sizes = [2, 4], strides = [1, 1]} : vector<2x12xf32> to vector<2x4xf32>
    %625 = vector.extract_strided_slice %615 {offsets = [0, 12], sizes = [2, 4], strides = [1, 1]} : vector<2x16xf32> to vector<2x4xf32>
    %626 = math.tanh %625 : vector<2x4xf32>
    %627 = arith.mulf %623, %611 : vector<2x4xf32>
    %628 = arith.mulf %622, %626 : vector<2x4xf32>
    %629 = arith.addf %627, %628 : vector<2x4xf32>
    %630 = math.tanh %629 : vector<2x4xf32>
    %631 = arith.mulf %624, %630 : vector<2x4xf32>
    %cst_108 = arith.constant dense<0.000000e+00> : vector<2x16xf32>
    %632 = tpu.matmul %631, %527, %cst_108 {dimension_numbers = #tpu.dot_dimension_numbers<[1], [0], [0], [1], [0, 0, 1, 1], [], []>} : vector<2x4xf32>, vector<4x16xf32>, vector<2x16xf32> -> vector<2x16xf32>
    %633 = arith.addf %537, %632 : vector<2x16xf32>
    %634 = vector.extract_strided_slice %633 {offsets = [0, 0], sizes = [2, 12], strides = [1, 1]} : vector<2x16xf32> to vector<2x12xf32>
    %635 = arith.negf %634 : vector<2x12xf32>
    %636 = math.exp %635 : vector<2x12xf32>
    %cst_109 = arith.constant 1.000000e+00 : f32
    %637 = vector.broadcast %cst_109 : f32 to vector<2x12xf32>
    %638 = arith.addf %637, %636 : vector<2x12xf32>
    %639 = arith.divf %637, %638 : vector<2x12xf32>
    %640 = vector.extract_strided_slice %639 {offsets = [0, 0], sizes = [2, 4], strides = [1, 1]} : vector<2x12xf32> to vector<2x4xf32>
    %641 = vector.extract_strided_slice %639 {offsets = [0, 4], sizes = [2, 4], strides = [1, 1]} : vector<2x12xf32> to vector<2x4xf32>
    %642 = vector.extract_strided_slice %639 {offsets = [0, 8], sizes = [2, 4], strides = [1, 1]} : vector<2x12xf32> to vector<2x4xf32>
    %643 = vector.extract_strided_slice %633 {offsets = [0, 12], sizes = [2, 4], strides = [1, 1]} : vector<2x16xf32> to vector<2x4xf32>
    %644 = math.tanh %643 : vector<2x4xf32>
    %645 = arith.mulf %641, %629 : vector<2x4xf32>
    %646 = arith.mulf %640, %644 : vector<2x4xf32>
    %647 = arith.addf %645, %646 : vector<2x4xf32>
    %648 = math.tanh %647 : vector<2x4xf32>
    %649 = arith.mulf %642, %648 : vector<2x4xf32>
    %cst_110 = arith.constant dense<0.000000e+00> : vector<2x16xf32>
    %650 = tpu.matmul %649, %527, %cst_110 {dimension_numbers = #tpu.dot_dimension_numbers<[1], [0], [0], [1], [0, 0, 1, 1], [], []>} : vector<2x4xf32>, vector<4x16xf32>, vector<2x16xf32> -> vector<2x16xf32>
    %651 = arith.addf %538, %650 : vector<2x16xf32>
    %652 = vector.extract_strided_slice %651 {offsets = [0, 0], sizes = [2, 12], strides = [1, 1]} : vector<2x16xf32> to vector<2x12xf32>
    %653 = arith.negf %652 : vector<2x12xf32>
    %654 = math.exp %653 : vector<2x12xf32>
    %cst_111 = arith.constant 1.000000e+00 : f32
    %655 = vector.broadcast %cst_111 : f32 to vector<2x12xf32>
    %656 = arith.addf %655, %654 : vector<2x12xf32>
    %657 = arith.divf %655, %656 : vector<2x12xf32>
    %658 = vector.extract_strided_slice %657 {offsets = [0, 0], sizes = [2, 4], strides = [1, 1]} : vector<2x12xf32> to vector<2x4xf32>
    %659 = vector.extract_strided_slice %657 {offsets = [0, 4], sizes = [2, 4], strides = [1, 1]} : vector<2x12xf32> to vector<2x4xf32>
    %660 = vector.extract_strided_slice %657 {offsets = [0, 8], sizes = [2, 4], strides = [1, 1]} : vector<2x12xf32> to vector<2x4xf32>
    %661 = vector.extract_strided_slice %651 {offsets = [0, 12], sizes = [2, 4], strides = [1, 1]} : vector<2x16xf32> to vector<2x4xf32>
    %662 = math.tanh %661 : vector<2x4xf32>
    %663 = arith.mulf %659, %647 : vector<2x4xf32>
    %664 = arith.mulf %658, %662 : vector<2x4xf32>
    %665 = arith.addf %663, %664 : vector<2x4xf32>
    %666 = math.tanh %665 : vector<2x4xf32>
    %667 = arith.mulf %660, %666 : vector<2x4xf32>
    %cst_112 = arith.constant dense<0.000000e+00> : vector<2x16xf32>
    %668 = tpu.matmul %667, %527, %cst_112 {dimension_numbers = #tpu.dot_dimension_numbers<[1], [0], [0], [1], [0, 0, 1, 1], [], []>} : vector<2x4xf32>, vector<4x16xf32>, vector<2x16xf32> -> vector<2x16xf32>
    %669 = arith.addf %539, %668 : vector<2x16xf32>
    %670 = vector.extract_strided_slice %669 {offsets = [0, 0], sizes = [2, 12], strides = [1, 1]} : vector<2x16xf32> to vector<2x12xf32>
    %671 = arith.negf %670 : vector<2x12xf32>
    %672 = math.exp %671 : vector<2x12xf32>
    %cst_113 = arith.constant 1.000000e+00 : f32
    %673 = vector.broadcast %cst_113 : f32 to vector<2x12xf32>
    %674 = arith.addf %673, %672 : vector<2x12xf32>
    %675 = arith.divf %673, %674 : vector<2x12xf32>
    %676 = vector.extract_strided_slice %675 {offsets = [0, 0], sizes = [2, 4], strides = [1, 1]} : vector<2x12xf32> to vector<2x4xf32>
    %677 = vector.extract_strided_slice %675 {offsets = [0, 4], sizes = [2, 4], strides = [1, 1]} : vector<2x12xf32> to vector<2x4xf32>
    %678 = vector.extract_strided_slice %675 {offsets = [0, 8], sizes = [2, 4], strides = [1, 1]} : vector<2x12xf32> to vector<2x4xf32>
    %679 = vector.extract_strided_slice %669 {offsets = [0, 12], sizes = [2, 4], strides = [1, 1]} : vector<2x16xf32> to vector<2x4xf32>
    %680 = math.tanh %679 : vector<2x4xf32>
    %681 = arith.mulf %677, %665 : vector<2x4xf32>
    %682 = arith.mulf %676, %680 : vector<2x4xf32>
    %683 = arith.addf %681, %682 : vector<2x4xf32>
    %684 = math.tanh %683 : vector<2x4xf32>
    %685 = arith.mulf %678, %684 : vector<2x4xf32>
    %686 = tpu.concatenate %559, %577, %595, %613, %631, %649, %667, %685 in 0 : vector<2x4xf32>, vector<2x4xf32>, vector<2x4xf32>, vector<2x4xf32>, vector<2x4xf32>, vector<2x4xf32>, vector<2x4xf32>, vector<2x4xf32> -> vector<16x4xf32>
    %687 = math.tanh %686 : vector<16x4xf32>
    %c0_114 = arith.constant 0 : index
    %c0_115 = arith.constant 0 : index
    %688 = vector.load %arg14[%c0_114, %c0_115] : memref<4x4xf32, #tpu.memory_space<vmem>>, vector<4x4xf32>
    %cst_116 = arith.constant dense<0.000000e+00> : vector<16x4xf32>
    %689 = tpu.matmul %687, %688, %cst_116 {dimension_numbers = #tpu.dot_dimension_numbers<[1], [0], [0], [1], [0, 0, 1, 1], [], []>} : vector<16x4xf32>, vector<4x4xf32>, vector<16x4xf32> -> vector<16x4xf32>
    %c0_117 = arith.constant 0 : index
    %c0_118 = arith.constant 0 : index
    %690 = vector.load %arg15[%c0_117, %c0_118] : memref<1x4xf32, #tpu.memory_space<vmem>>, vector<1x4xf32>
    %691 = vector.broadcast %690 : vector<1x4xf32> to vector<16x4xf32>
    %692 = arith.addf %689, %691 : vector<16x4xf32>
    %693 = arith.negf %692 : vector<16x4xf32>
    %694 = math.exp %693 : vector<16x4xf32>
    %cst_119 = arith.constant 1.000000e+00 : f32
    %695 = vector.broadcast %cst_119 : f32 to vector<16x4xf32>
    %696 = arith.addf %695, %694 : vector<16x4xf32>
    %697 = arith.divf %695, %696 : vector<16x4xf32>
    %698 = vector.extract_strided_slice %697 {offsets = [0, 0], sizes = [2, 4], strides = [1, 1]} : vector<16x4xf32> to vector<2x4xf32>
    %c0_120 = arith.constant 0 : index
    %c0_121 = arith.constant 0 : index
    %699 = vector.load %arg16[%c0_120, %c0_121] : memref<2x32xf32, #tpu.memory_space<vmem>>, vector<2x4xf32>
    tpu.vector_store %arg16[%c0_120, %c0_121], %698 {strides = array<i32>} : memref<2x32xf32, #tpu.memory_space<vmem>>, vector<2x4xf32>,
    %700 = vector.extract_strided_slice %697 {offsets = [2, 0], sizes = [2, 4], strides = [1, 1]} : vector<16x4xf32> to vector<2x4xf32>
    %c0_122 = arith.constant 0 : index
    %c4 = arith.constant 4 : index
    %701 = vector.load %arg16[%c0_122, %c4] : memref<2x32xf32, #tpu.memory_space<vmem>>, vector<2x4xf32>
    tpu.vector_store %arg16[%c0_122, %c4], %700 {strides = array<i32>} : memref<2x32xf32, #tpu.memory_space<vmem>>, vector<2x4xf32>,
    %702 = vector.extract_strided_slice %697 {offsets = [4, 0], sizes = [2, 4], strides = [1, 1]} : vector<16x4xf32> to vector<2x4xf32>
    %c0_123 = arith.constant 0 : index
    %c8 = arith.constant 8 : index
    %703 = vector.load %arg16[%c0_123, %c8] : memref<2x32xf32, #tpu.memory_space<vmem>>, vector<2x4xf32>
    tpu.vector_store %arg16[%c0_123, %c8], %702 {strides = array<i32>} : memref<2x32xf32, #tpu.memory_space<vmem>>, vector<2x4xf32>,
    %704 = vector.extract_strided_slice %697 {offsets = [6, 0], sizes = [2, 4], strides = [1, 1]} : vector<16x4xf32> to vector<2x4xf32>
    %c0_124 = arith.constant 0 : index
    %c12 = arith.constant 12 : index
    %705 = vector.load %arg16[%c0_124, %c12] : memref<2x32xf32, #tpu.memory_space<vmem>>, vector<2x4xf32>
    tpu.vector_store %arg16[%c0_124, %c12], %704 {strides = array<i32>} : memref<2x32xf32, #tpu.memory_space<vmem>>, vector<2x4xf32>,
    %706 = vector.extract_strided_slice %697 {offsets = [8, 0], sizes = [2, 4], strides = [1, 1]} : vector<16x4xf32> to vector<2x4xf32>
    %c0_125 = arith.constant 0 : index
    %c16_126 = arith.constant 16 : index
    %707 = vector.load %arg16[%c0_125, %c16_126] : memref<2x32xf32, #tpu.memory_space<vmem>>, vector<2x4xf32>
    tpu.vector_store %arg16[%c0_125, %c16_126], %706 {strides = array<i32>} : memref<2x32xf32, #tpu.memory_space<vmem>>, vector<2x4xf32>,
    %708 = vector.extract_strided_slice %697 {offsets = [10, 0], sizes = [2, 4], strides = [1, 1]} : vector<16x4xf32> to vector<2x4xf32>
    %c0_127 = arith.constant 0 : index
    %c20 = arith.constant 20 : index
    %709 = vector.load %arg16[%c0_127, %c20] : memref<2x32xf32, #tpu.memory_space<vmem>>, vector<2x4xf32>
    tpu.vector_store %arg16[%c0_127, %c20], %708 {strides = array<i32>} : memref<2x32xf32, #tpu.memory_space<vmem>>, vector<2x4xf32>,
    %710 = vector.extract_strided_slice %697 {offsets = [12, 0], sizes = [2, 4], strides = [1, 1]} : vector<16x4xf32> to vector<2x4xf32>
    %c0_128 = arith.constant 0 : index
    %c24 = arith.constant 24 : index
    %711 = vector.load %arg16[%c0_128, %c24] : memref<2x32xf32, #tpu.memory_space<vmem>>, vector<2x4xf32>
    tpu.vector_store %arg16[%c0_128, %c24], %710 {strides = array<i32>} : memref<2x32xf32, #tpu.memory_space<vmem>>, vector<2x4xf32>,
    %712 = vector.extract_strided_slice %697 {offsets = [14, 0], sizes = [2, 4], strides = [1, 1]} : vector<16x4xf32> to vector<2x4xf32>
    %c0_129 = arith.constant 0 : index
    %c28 = arith.constant 28 : index
    %713 = vector.load %arg16[%c0_129, %c28] : memref<2x32xf32, #tpu.memory_space<vmem>>, vector<2x4xf32>
    tpu.vector_store %arg16[%c0_129, %c28], %712 {strides = array<i32>} : memref<2x32xf32, #tpu.memory_space<vmem>>, vector<2x4xf32>,
    return
  }
}

</mosaic_0001>

<bundles_post_ra>
// kernel: tpu_custom_call.1
= control target key start
LH: loop header
LB: loop body
LE: loop exit
PB: predicated region body
PF: predicated region fallthrough
CT: control target
= control target key end

     0   :  { %s4160_s0 = inlined_call_operand.hbm [shape: f32[2,32], index: 0, kind: input, shape index: {}]   ;;  %s4161_s1 = inlined_call_operand.hbm [shape: f32[2,128], index: 1, kind: input, shape index: {}]   ;;  %s4162_s2 = inlined_call_operand.hbm [shape: f32[4,128], index: 2, kind: input, shape index: {}]   ;;  %s4163_s3 = inlined_call_operand.vmem [shape: f32[32,128], index: 3, kind: input, shape index: {}]   ;;  %s4164_s4 = inlined_call_operand.hbm [shape: f32[1,128], index: 4, kind: input, shape index: {}]   ;;  %s4165_s5 = inlined_call_operand.hbm [shape: f32[32,64], index: 5, kind: input, shape index: {}]   ;;  %s4166_s6 = inlined_call_operand.vmem [shape: f32[16,64], index: 6, kind: input, shape index: {}]   ;;  %s4167_s7 = inlined_call_operand.hbm [shape: f32[1,64], index: 7, kind: input, shape index: {}]   ;;  %s4168_s8 = inlined_call_operand.hbm [shape: f32[16,128], index: 8, kind: input, shape index: {}]   ;;  %s4169_s9 = inlined_call_operand.hbm [shape: f32[32,128], index: 9, kind: input, shape index: {}]   ;;  %s4170_s10 = inlined_call_operand.vmem [shape: f32[1,128], index: 10, kind: input, shape index: {}]   ;;  %s4171_s11 = inlined_call_operand.vmem [shape: f32[32,16], index: 11, kind: input, shape index: {}]   ;;  %s4172_s12 = inlined_call_operand.vmem [shape: f32[4,16], index: 12, kind: input, shape index: {}]   ;;  %s4173_s13 = inlined_call_operand.vmem [shape: f32[1,16], index: 13, kind: input, shape index: {}]   ;;  %s4174_s14 = inlined_call_operand.vmem [shape: f32[4,4], index: 14, kind: input, shape index: {}]   ;;  %s4175_s15 = inlined_call_operand.vmem [shape: f32[1,4], index: 15, kind: input, shape index: {}]   ;;  %s4176_s16 = inlined_call_operand.hbm [shape: f32[2,32], index: 16, kind: output, shape index: {0}]   ;;  %s4177_s17 = inlined_call_operand.hbm [shape: f32[2,128], index: 17, kind: output, shape index: {1}]  }
   0x1   :  { %4178 = sst [smem:[#allocation26_spill]] %s4160_s0 }
   0x2   :  { %4179 = sst [smem:[#allocation27_spill]] %s4161_s1 }
   0x3   :  { %4180 = sst [smem:[#allocation28_spill]] %s4176_s16 }
   0x4   :  { %23 = vsyncpa [#allocation3], 0 }
   0x5   :  { %24 = vsyncpa [#allocation6], 0 }
   0x6   :  { %25 = vsyncpa [#allocation9], 0 }
   0x7   :  { %26 = vsyncpa [#allocation12], 0 }
   0x8   :  { %27 = vsyncpa [#allocation15], 0 }
   0x9   :  { %28 = vsyncpa [#allocation4], 0  ;;  %s4181_s26 = sld [smem:[#allocation27_spill]] }
   0xf   :  { %s46_s27 = sshll.u32 %s4181_s26, 4  ;;  %s47_s27 = int_to_ptr.hbm [resolvable:$true] %s46_s27 }
  0x10   :  { %29 = vsyncpa [#allocation18], 0  ;;  %s3493_s28 = smov [#allocation5]   ;;  %s70_s18 = sshll.u32 %s4164_s4, 4  ;;  %s71_s18 = int_to_ptr.hbm [resolvable:$true] %s70_s18 }
  0x11   :  { %s48_s29 = sshll.u32 %s3493_s28, 4  ;;  %s3494_s19 = smov [#allocation8]   ;;  %s49_s29 = int_to_ptr.vmem [resolvable:$true] %s48_s29 }
  0x12   :  { %51 = dma.hbm_to_vmem [thread:$0]  %s47_s27, 32, %s49_s29, [#allocation6]  }
  0x13   :  { %s72_s1 = sshll.u32 %s3494_s19, 4  ;;  %s96_s22 = sshll.u32 %s4167_s7, 4  ;;  %s73_s1 = int_to_ptr.vmem [resolvable:$true] %s72_s1  ;;  %s97_s22 = int_to_ptr.hbm [resolvable:$true] %s96_s22 }
  0x14   :  { %75 = dma.hbm_to_vmem [thread:$0]  %s71_s18, 16, %s73_s1, [#allocation9]  }
  0x15   :  { %s4182_s25 = sld [smem:[#allocation26_spill]]  ;;  %s3495_s28 = smov [#allocation11]  }
  0x16   :  { %s98_s16 = sshll.u32 %s3495_s28, 4  ;;  %s3496_s4 = smov [#allocation2]   ;;  %s99_s16 = int_to_ptr.vmem [resolvable:$true] %s98_s16 }
  0x17   :  { %101 = dma.hbm_to_vmem [thread:$0]  %s97_s22, 16, %s99_s16, [#allocation12]  }
  0x18   :  { %s37_s27 = sshll.u32 %s3496_s4, 4  ;;  %s57_s30 = sshll.u32 %s4162_s2, 4  ;;  %s38_s27 = int_to_ptr.vmem [resolvable:$true] %s37_s27  ;;  %s58_s30 = int_to_ptr.hbm [resolvable:$true] %s57_s30 }
  0x19   :  { %s80_s19 = sshll.u32 %s4165_s5, 4  ;;  %s3497_s1 = smov [#allocation7]   ;;  %s81_s19 = int_to_ptr.hbm [resolvable:$true] %s80_s19 }
  0x1a   :  { %s59_s20 = sshll.u32 %s3497_s1, 4  ;;  %s3498_s21 = smov [#allocation10]   ;;  %s60_s20 = int_to_ptr.vmem [resolvable:$true] %s59_s20 }
  0x1b   :  { %s35_s26 = sshll.u32 %s4182_s25, 4  ;;  %s82_s16 = sshll.u32 %s3498_s21, 4  ;;  %s36_s26 = int_to_ptr.hbm [resolvable:$true] %s35_s26  ;;  %s83_s16 = int_to_ptr.vmem [resolvable:$true] %s82_s16 }
  0x1c   :  { %40 = dma.hbm_to_vmem [thread:$0]  %s36_s26, 32, %s38_s27, [#allocation3]  }
  0x1d   :  { %62 = dma.hbm_to_vmem [thread:$0]  %s58_s30, 64, %s60_s20, [#allocation6]  }
  0x1e   :  { %s3499_s22 = smov 128   ;;  %s3500_s23 = smov 8  }
  0x1f   :  { %88 = dma.hbm_to_vmem [thread:$0]  %s81_s19, 512, %s83_s16, [#allocation9], %s3499_s22, %s3499_s22, %s3500_s23  }
  0x20   :  { %s106_s25 = sshll.u32 %s4168_s8, 4  ;;  %s3501_s26 = smov [#allocation13]   ;;  %s107_s25 = int_to_ptr.hbm [resolvable:$true] %s106_s25 }
  0x21   :  { %s108_s28 = sshll.u32 %s3501_s26, 4  ;;  %s119_s27 = sshll.u32 %s4169_s9, 4  ;;  %s109_s28 = int_to_ptr.vmem [resolvable:$true] %s108_s28  ;;  %s120_s27 = int_to_ptr.hbm [resolvable:$true] %s119_s27 }
  0x22   :  { %114 = dma.hbm_to_vmem [thread:$0]  %s107_s25, 256, %s109_s28, [#allocation12], %s3499_s22, %s3499_s22, %s3500_s23  }
  0x23   :  { %s3502_s29 = smov [#allocation14]  }
  0x24   :  { %s121_s0 = sshll.u32 %s3502_s29, 4  ;;  %s122_s0 = int_to_ptr.vmem [resolvable:$true] %s121_s0 }
  0x25   :  { %127 = dma.hbm_to_vmem [thread:$0]  %s120_s27, 512, %s122_s0, [#allocation15], %s3499_s22, %s3499_s22, %s3500_s23  }
  0x26   :  { %3479 = dma.done.wait [#allocation3], 32  }
  0x27   :  { %3480 = vsyncadd [#allocation3], 4294967264 }
  0x28   :  { %3481 = dma.done.wait [#allocation6], 96  }
  0x29   :  { %3482 = vsyncadd [#allocation6], 4294967200 }
  0x2a   :  { %3483 = dma.done.wait [#allocation9], 528  }
  0x2b   :  { %3484 = vsyncadd [#allocation9], 4294966768 }
  0x2c   :  { %3485 = dma.done.wait [#allocation12], 272  }
  0x2d   :  { %3486 = vsyncadd [#allocation12], 4294967024 }
  0x2e   :  { %3487 = dma.done.wait [#allocation15], 512  }
  0x2f   :  { %3488 = vsyncadd [#allocation15], 4294966784  ;;  %v3641_v0 = vld [vmem:[#allocation2] sm:$0x3]  ;;  %s3503_s8 = smov 112   ;;  %s3504_s9 = smov 104  }
  0x30   :  { %186 = vrot.lane.b32.xlu0 %v3641_v0, %s3503_s8  ;;  %v178_v1 = vrot.slane %v3641_v0, 4  ;;  %v174_v2 = vrot.slane %v3641_v0, 6  ;;  %s3505_s30 = smov 124   ;;  %v182_v3 = vrot.slane %v3641_v0, 2  ;;  %s3506_s7 = smov 108   ;;  %vm200_vm0 = vcmask 1043456  }
  0x31   :  { %s3507_s18 = smov 100   ;;  %s3508_s19 = smov 120   ;;  %v207_v4 = vld [vmem:[#allocation7] sm:$0xf]  ;;  %v211_v5 = vld [vmem:[%s4163_s3 + $0x18] sm:$0xff]  ;;  %v210_v6 = vld [vmem:[%s4163_s3 + $0x10] sm:$0xff] }
  0x32   :  { %192 = vrot.lane.b32.xlu1 %v178_v1, %s3504_s9  ;;  %175 = vrot.lane.b32.xlu2 %v174_v2, %s3505_s30  ;;  %s3509_s1 = smov 116   ;;  %v209_v7 = vld [vmem:[%s4163_s3 + $0x8] sm:$0xff]  ;;  %v208_v8 = vld [vmem:[%s4163_s3] sm:$0xff]  ;;  %vm198_vm1 = vcmask 1041408   ;;  %vm202_vm2 = vcmask 1045504   ;;  %vm216_vm3 = vcmask 31744  }
  0x33   :  { %2908 = vmatpush.msk.msra.mxu1 %vm200_vm0, %v207_v4  ;;  %2826 = vmatpush.msk.msra.mxu0 %vm200_vm0, %v207_v4  ;;  %v3510_v22 = vmov 0.0   ;;  %v2940_v23 = vld [vmem:[#allocation8] ss:$0 sm:$0xff]  ;;  %s3511_s3 = smov 32   ;;  %s3512_s28 = smov 64   ;;  %vm249_vm8 = vcmask 261120  }
  0x34   :  { %328 = vmatpush.msra.mxu2 %v211_v5  ;;  %398 = vmatpush.msra.mxu3 %v211_v5  ;;  %s3514_s0 = smov 16   ;;  %s3515_s9 = smov 96  }
  0x35   :  { %265 = vmatpush.msrb.mxu1 %v211_v5  ;;  %674 = vmatpush.msrb.mxu0 %v211_v5  ;;  %s3516_s30 = smov 48   ;;  %s2807_s27 = sshll.u32 %s4177_s17, 4  ;;  %s2808_s27 = int_to_ptr.hbm [resolvable:$true] %s2807_s27 }
  0x36   :  { %329 = vmatpush.msra.mxu2 %v210_v6  ;;  %399 = vmatpush.msra.mxu3 %v210_v6  ;;  %s3520_s29 = smov 24   ;;  %s3523_s17 = smov [#allocation16]  }
  0x37   :  { %266 = vmatpush.msrb.mxu1 %v210_v6  ;;  %675 = vmatpush.msrb.mxu0 %v210_v6 }
  0x38   :  { %189 = vrot.lane.b32.xlu0 %v174_v2, %s3506_s7  ;;  %330 = vmatpush.msra.mxu2 %v209_v7 }
  0x39   :  { %267 = vmatpush.msrb.mxu1 %v209_v7  ;;  %400 = vmatpush.msra.mxu3 %v209_v7 }
  0x3a   :  { %195 = vrot.lane.b32.xlu1 %v182_v3, %s3507_s18  ;;  %179 = vrot.lane.b32.xlu2 %v178_v1, %s3508_s19 }
  0x3b   :  { %676 = vmatpush.msrb.mxu0 %v209_v7  ;;  %268 = vmatpush.msrb.mxu1 %v208_v8 }
  0x3c   :  { %331 = vmatpush.msra.mxu2 %v208_v8  ;;  %401 = vmatpush.msra.mxu3 %v208_v8 }
  0x3d   :  { %677 = vmatpush.msrb.mxu0 %v208_v8 }
  0x3e   :  { %538 = vmatpush.msrb.mxu2 %v211_v5  ;;  %604 = vmatpush.msrb.mxu3 %v211_v5 }
  0x40   :  { %183 = vrot.lane.b32.xlu0 %v182_v3, %s3509_s1  ;;  %539 = vmatpush.msrb.mxu2 %v210_v6 }
  0x41   :  { %605 = vmatpush.msrb.mxu3 %v210_v6 }
  0x42   :  { %540 = vmatpush.msrb.mxu2 %v209_v7 }
  0x43   :  { %606 = vmatpush.msrb.mxu3 %v209_v7 }
  0x44   :  { %541 = vmatpush.msrb.mxu2 %v208_v8 }
  0x45   :  { %607 = vmatpush.msrb.mxu3 %v208_v8 }
  0x8c   :  { %v176_v11 = vpop.permute.xlu2 %175 }
  0x8d   :  { %v199_v17 = vsel %vm198_vm1, %v3641_v0, %v176_v11 }
  0x94   :  { %v180_v18 = vpop.permute.xlu2 %179 }
  0x95   :  { %v201_v19 = vsel %vm200_vm0, %v199_v17, %v180_v18 }
  0xa2   :  { %v187_v9 = vpop.permute.xlu0 %186 }
  0xa4   :  { %v193_v10 = vpop.permute.xlu1 %192 }
  0xaa   :  { %v190_v12 = vpop.permute.xlu0 %189 }
  0xab   :  { %v204_v13 = vsel %vm198_vm1, %v187_v9, %v190_v12 }
  0xac   :  { %v196_v14 = vpop.permute.xlu1 %195  ;;  %v205_v15 = vsel %vm200_vm0, %v204_v13, %v193_v10 }
  0xad   :  { %v206_v16 = vsel %vm202_vm2, %v205_v15, %v196_v14 }
  0xae   :  { %2828 = vmatmul.msk.f32.vlgmr.msra.gmra.mxu1 %vm216_vm3, %v206_v16 }
  0xaf   :  { %468 = vmatpush.msra.mxu1 %v211_v5 }
  0xb1   :  { %469 = vmatpush.msra.mxu1 %v210_v6 }
  0xb2   :  { %v184_v20 = vpop.permute.xlu0 %183 }
  0xb3   :  { %v203_v21 = vsel %vm202_vm2, %v201_v19, %v184_v20  ;;  %470 = vmatpush.msra.mxu1 %v209_v7 }
  0xb4   :  { %2827 = vmatmul.msk.f32.vlgmr.msra.gmra.mxu0 %vm216_vm3, %v203_v21 }
  0xb5   :  { %471 = vmatpush.msra.mxu1 %v208_v8 }
  0xb6   :  { %269 = vmatmul.f32.vlgmr.msrb.gmra.mxu1 %v3510_v22 }
  0xb7   :  { %744 = vmatpush.msrb.mxu1 %v211_v5 }
  0xb9   :  { %745 = vmatpush.msrb.mxu1 %v210_v6 }
  0xbb   :  { %746 = vmatpush.msrb.mxu1 %v209_v7 }
  0xbd   :  { %747 = vmatpush.msrb.mxu1 %v208_v8 }
 0x12b   :  { %v246_v24 = vpop.f32.mrf.mxu1 }
 0x12c   :  { %v3674_v25 = vadd.f32 %v2940_v23, %v246_v24 }
 0x131   :  { %v243_v26 = vpop.f32.mrf.mxu0 }
 0x132   :  { %v3676_v27 = vadd.f32 %v2940_v23, %v243_v26 }
 0x133   :  { %v270_v28 = vpop.f32.mrf.mxu1 }
 0x134   :  { %v273_v29 = vadd.f32 %v270_v28, %v3676_v27 }
 0x136   :  { %2945 = vtanh.f32 %v273_v29  ;;  %v2829_v31 = vmul.f32 -1.442695, %v273_v29 }
 0x138   :  { %2947 = vpow2.f32 %v2829_v31 }
 0x13c   :  { %v2946_v30 = vpop.eup %2945 }
 0x13d   :  { %296 = vrot.lane.b32.xlu1 %v2946_v30, %s3511_s3 }
 0x13e   :  { %v2948_v32 = vpop.eup %2947 }
 0x13f   :  { %v277_v33 = vadd.f32 1.0, %v2948_v32 }
 0x141   :  { %2949 = vrcp.f32 %v277_v33  ;;  %v289_v39 = vand.u32 2147483648, %v277_v33  ;;  %vm283_vm5 = vweird.f32 %v277_v33  ;;  %v287_v40 = vand.u32 2147483647, %v277_v33 }
 0x143   :  { %v290_v42 = vor.u32 1.1754944e-38, %v289_v39  ;;  %vm288_vm7 = vcmp.eq.f32.partialorder %v287_v40, 8.507059e+37 }
 0x147   :  { %v2950_v34 = vpop.eup %2949 }
 0x148   :  { %v279_v35 = vmul.f32 %v2950_v34, %v277_v33  ;;  %vm284_vm4 = vweird.f32 %v2950_v34 }
 0x149   :  { %vm285_vm6 = vmor %vm283_vm5, %vm284_vm4 }
 0x14a   :  { %v280_v36 = vsub.f32 1.0, %v279_v35 }
 0x14c   :  { %v281_v37 = vmul.f32 %v2950_v34, %v280_v36 }
 0x14e   :  { %v282_v38 = vadd.f32 %v2950_v34, %v281_v37 }
 0x150   :  { %v286_v41 = vsel %vm285_vm6, %v2950_v34, %v282_v38 }
 0x151   :  { %v291_v44 = vsel %vm288_vm7, %v290_v42, %v286_v41 }
 0x152   :  { %v294_v46 = vmul.f32 0.0, %v291_v44 }
 0x1af   :  { %v297_v43 = vpop.permute.xlu1 %296 }
 0x1b0   :  { %v299_v45 = vmul.f32 %v297_v43, %v291_v44 }
 0x1b2   :  { %301 = vrot.lane.b32.xlu2 %v299_v45, %s3511_s3 }
 0x20c   :  { %v302_v47 = vpop.permute.xlu2 %301 }
 0x20d   :  { %v304_v48 = vadd.f32 %v302_v47, %v294_v46 }
 0x20f   :  { %2951 = vtanh.f32 %v304_v48  ;;  %v361_v8 = vrot.slane %v304_v48, 6 }
 0x215   :  { %v2952_v49 = vpop.eup %2951 }
 0x216   :  { %307 = vrot.lane.b32.xlu0 %v2952_v49, %s3511_s3 }
 0x288   :  { %v308_v50 = vpop.permute.xlu0 %307 }
 0x289   :  { %v3682_v51 = vmul.f32 %v308_v50, %v291_v44 }
 0x28b   :  { %312 = vrot.lane.b32.xlu1 %v3682_v51, %s3512_s28 }
 0x2fd   :  { %v313_v52 = vpop.permute.xlu1 %312 }
 0x2fe   :  { %2830 = vmatmul.msk.f32.vlgmr.msra.gmra.mxu2 %vm249_vm8, %v313_v52 }
 0x381   :  { %v333_v53 = vpop.f32.mrf.mxu2 }
 0x382   :  { %v337_v54 = vrot.slane %v333_v53, 6 }
 0x384   :  { %v339_v55 = vadd.f32 %v337_v54, %v3676_v27 }
 0x386   :  { %2953 = vtanh.f32 %v339_v55  ;;  %v2831_v57 = vmul.f32 -1.442695, %v339_v55 }
 0x388   :  { %2955 = vpow2.f32 %v2831_v57 }
 0x38c   :  { %v2954_v56 = vpop.eup %2953 }
 0x38d   :  { %365 = vrot.lane.b32.xlu2 %v2954_v56, %s3511_s3 }
 0x38e   :  { %v2956_v58 = vpop.eup %2955 }
 0x38f   :  { %v343_v59 = vadd.f32 1.0, %v2956_v58 }
 0x391   :  { %2957 = vrcp.f32 %v343_v59  ;;  %v355_v1 = vand.u32 2147483648, %v343_v59  ;;  %vm349_vm10 = vweird.f32 %v343_v59  ;;  %v353_v2 = vand.u32 2147483647, %v343_v59 }
 0x393   :  { %v356_v4 = vor.u32 1.1754944e-38, %v355_v1  ;;  %vm354_vm12 = vcmp.eq.f32.partialorder %v353_v2, 8.507059e+37 }
 0x397   :  { %v2958_v60 = vpop.eup %2957 }
 0x398   :  { %v345_v61 = vmul.f32 %v2958_v60, %v343_v59  ;;  %vm350_vm9 = vweird.f32 %v2958_v60 }
 0x399   :  { %vm351_vm11 = vmor %vm349_vm10, %vm350_vm9 }
 0x39a   :  { %v346_v62 = vsub.f32 1.0, %v345_v61 }
 0x39c   :  { %v347_v63 = vmul.f32 %v2958_v60, %v346_v62 }
 0x39e   :  { %v348_v0 = vadd.f32 %v2958_v60, %v347_v63 }
 0x3a0   :  { %v352_v3 = vsel %vm351_vm11, %v2958_v60, %v348_v0 }
 0x3a1   :  { %v357_v6 = vsel %vm354_vm12, %v356_v4, %v352_v3 }
 0x3a2   :  { %v363_v9 = vmul.f32 %v361_v8, %v357_v6 }
 0x3e7   :  { %v366_v5 = vpop.permute.xlu2 %365 }
 0x3e8   :  { %v368_v7 = vmul.f32 %v366_v5, %v357_v6 }
 0x3ea   :  { %370 = vrot.lane.b32.xlu0 %v368_v7, %s3511_s3 }
 0x45c   :  { %v371_v10 = vpop.permute.xlu0 %370 }
 0x45d   :  { %v373_v11 = vadd.f32 %v371_v10, %v363_v9 }
 0x45f   :  { %2959 = vtanh.f32 %v373_v11  ;;  %v431_v39 = vrot.slane %v373_v11, 6 }
 0x465   :  { %v2960_v12 = vpop.eup %2959 }
 0x466   :  { %376 = vrot.lane.b32.xlu1 %v2960_v12, %s3511_s3 }
 0x4d8   :  { %v377_v13 = vpop.permute.xlu1 %376 }
 0x4d9   :  { %v379_v14 = vmul.f32 %v377_v13, %v357_v6 }
 0x4db   :  { %v381_v15 = vrot.slane %v379_v14, 2  ;;  %v796_v46 = vsel %vm198_vm1, %v3682_v51, %v379_v14 }
 0x4dd   :  { %382 = vrot.lane.b32.xlu2 %v381_v15, %s3512_s28 }
 0x537   :  { %v383_v16 = vpop.permute.xlu2 %382 }
 0x538   :  { %2832 = vmatmul.msk.f32.vlgmr.msra.gmra.mxu3 %vm249_vm8, %v383_v16 }
 0x5bb   :  { %v403_v17 = vpop.f32.mrf.mxu3 }
 0x5bc   :  { %v407_v18 = vrot.slane %v403_v17, 4 }
 0x5be   :  { %v409_v19 = vadd.f32 %v407_v18, %v3676_v27 }
 0x5c0   :  { %2961 = vtanh.f32 %v409_v19  ;;  %v2833_v21 = vmul.f32 -1.442695, %v409_v19 }
 0x5c2   :  { %2963 = vpow2.f32 %v2833_v21 }
 0x5c6   :  { %v2962_v20 = vpop.eup %2961 }
 0x5c7   :  { %435 = vrot.lane.b32.xlu0 %v2962_v20, %s3511_s3 }
 0x5c8   :  { %v2964_v23 = vpop.eup %2963 }
 0x5c9   :  { %v413_v24 = vadd.f32 1.0, %v2964_v23 }
 0x5cb   :  { %2965 = vrcp.f32 %v413_v24  ;;  %v425_v32 = vand.u32 2147483648, %v413_v24  ;;  %vm419_vm14 = vweird.f32 %v413_v24  ;;  %v423_v33 = vand.u32 2147483647, %v413_v24 }
 0x5cd   :  { %v426_v35 = vor.u32 1.1754944e-38, %v425_v32  ;;  %vm424_vm4 = vcmp.eq.f32.partialorder %v423_v33, 8.507059e+37 }
 0x5d1   :  { %v2966_v26 = vpop.eup %2965 }
 0x5d2   :  { %v415_v28 = vmul.f32 %v2966_v26, %v413_v24  ;;  %vm420_vm13 = vweird.f32 %v2966_v26 }
 0x5d3   :  { %vm421_vm15 = vmor %vm419_vm14, %vm420_vm13 }
 0x5d4   :  { %v416_v29 = vsub.f32 1.0, %v415_v28 }
 0x5d6   :  { %v417_v30 = vmul.f32 %v2966_v26, %v416_v29 }
 0x5d8   :  { %v418_v31 = vadd.f32 %v2966_v26, %v417_v30 }
 0x5da   :  { %v422_v34 = vsel %vm421_vm15, %v2966_v26, %v418_v31 }
 0x5db   :  { %v427_v37 = vsel %vm424_vm4, %v426_v35, %v422_v34 }
 0x5dc   :  { %v433_v40 = vmul.f32 %v431_v39, %v427_v37  ;;  %v804_v39 = vld [vmem:[#allocation10] sm:$0xff] }
 0x639   :  { %v436_v36 = vpop.permute.xlu0 %435 }
 0x63a   :  { %v438_v38 = vmul.f32 %v436_v36, %v427_v37  ;;  %v807_v36 = vld [vmem:[#allocation10 + $0x18] sm:$0xff] }
 0x63b   :  { %836 = vmatpush.msra.mxu2 %v807_v36 }
 0x63c   :  { %440 = vrot.lane.b32.xlu1 %v438_v38, %s3511_s3  ;;  %v805_v38 = vld [vmem:[#allocation10 + $0x8] sm:$0xff] }
 0x6ae   :  { %v441_v41 = vpop.permute.xlu1 %440 }
 0x6af   :  { %v443_v42 = vadd.f32 %v441_v41, %v433_v40 }
 0x6b1   :  { %2967 = vtanh.f32 %v443_v42  ;;  %v501_v4 = vrot.slane %v443_v42, 6 }
 0x6b7   :  { %v2968_v43 = vpop.eup %2967 }
 0x6b8   :  { %446 = vrot.lane.b32.xlu2 %v2968_v43, %s3511_s3 }
 0x712   :  { %v447_v44 = vpop.permute.xlu2 %446 }
 0x713   :  { %v449_v45 = vmul.f32 %v447_v44, %v427_v37  ;;  %v806_v37 = vld [vmem:[#allocation10 + $0x10] sm:$0xff] }
 0x714   :  { %837 = vmatpush.msra.mxu2 %v806_v37 }
 0x715   :  { %v451_v47 = vrot.slane %v449_v45, 4  ;;  %v797_v48 = vsel %vm200_vm0, %v796_v46, %v449_v45 }
 0x716   :  { %838 = vmatpush.msra.mxu2 %v805_v38 }
 0x717   :  { %452 = vrot.lane.b32.xlu0 %v451_v47, %s3512_s28 }
 0x718   :  { %839 = vmatpush.msra.mxu2 %v804_v39 }
 0x789   :  { %v453_v49 = vpop.permute.xlu0 %452 }
 0x78a   :  { %2834 = vmatmul.msk.f32.vlgmr.msra.gmra.mxu1 %vm249_vm8, %v453_v49  ;;  %v3730_v49 = vld [vmem:[%s4166_s6] sm:$0xff] }
 0x807   :  { %v473_v50 = vpop.f32.mrf.mxu1 }
 0x808   :  { %v477_v52 = vrot.slane %v473_v50, 2 }
 0x80a   :  { %v479_v53 = vadd.f32 %v477_v52, %v3676_v27 }
 0x80c   :  { %2969 = vtanh.f32 %v479_v53  ;;  %v2835_v55 = vmul.f32 -1.442695, %v479_v53 }
 0x80e   :  { %2971 = vpow2.f32 %v2835_v55 }
 0x812   :  { %v2970_v54 = vpop.eup %2969 }
 0x813   :  { %505 = vrot.lane.b32.xlu1 %v2970_v54, %s3511_s3  ;;  %v3746_v54 = vld [vmem:[#allocation11] ss:$0 sm:$0xff] }
 0x814   :  { %v2972_v56 = vpop.eup %2971 }
 0x815   :  { %v483_v51 = vadd.f32 1.0, %v2972_v56 }
 0x817   :  { %2973 = vrcp.f32 %v483_v51  ;;  %v495_v62 = vand.u32 2147483648, %v483_v51  ;;  %vm489_vm6 = vweird.f32 %v483_v51  ;;  %v493_v63 = vand.u32 2147483647, %v483_v51 }
 0x819   :  { %v496_v0 = vor.u32 1.1754944e-38, %v495_v62  ;;  %vm494_vm9 = vcmp.eq.f32.partialorder %v493_v63, 8.507059e+37 }
 0x81d   :  { %v2974_v57 = vpop.eup %2973 }
 0x81e   :  { %v485_v58 = vmul.f32 %v2974_v57, %v483_v51  ;;  %vm490_vm5 = vweird.f32 %v2974_v57 }
 0x81f   :  { %vm491_vm7 = vmor %vm489_vm6, %vm490_vm5 }
 0x820   :  { %v486_v59 = vsub.f32 1.0, %v485_v58 }
 0x822   :  { %v487_v60 = vmul.f32 %v2974_v57, %v486_v59 }
 0x824   :  { %v488_v61 = vadd.f32 %v2974_v57, %v487_v60 }
 0x826   :  { %v492_v27 = vsel %vm491_vm7, %v2974_v57, %v488_v61 }
 0x827   :  { %v497_v2 = vsel %vm494_vm9, %v496_v0, %v492_v27 }
 0x828   :  { %v503_v5 = vmul.f32 %v501_v4, %v497_v2 }
 0x885   :  { %v506_v1 = vpop.permute.xlu1 %505 }
 0x886   :  { %v508_v3 = vmul.f32 %v506_v1, %v497_v2 }
 0x888   :  { %510 = vrot.lane.b32.xlu2 %v508_v3, %s3511_s3 }
 0x8e2   :  { %v511_v6 = vpop.permute.xlu2 %510 }
 0x8e3   :  { %v513_v7 = vadd.f32 %v511_v6, %v503_v5 }
 0x8e5   :  { %2975 = vtanh.f32 %v513_v7  ;;  %v568_v40 = vrot.slane %v513_v7, 6 }
 0x8eb   :  { %v2976_v8 = vpop.eup %2975 }
 0x8ec   :  { %516 = vrot.lane.b32.xlu0 %v2976_v8, %s3511_s3 }
 0x95e   :  { %v517_v9 = vpop.permute.xlu0 %516 }
 0x95f   :  { %v519_v10 = vmul.f32 %v517_v9, %v497_v2 }
 0x961   :  { %v521_v11 = vrot.slane %v519_v10, 6  ;;  %v798_v12 = vsel %vm202_vm2, %v797_v48, %v519_v10  ;;  %v3725_v48 = vld [vmem:[%s4166_s6 + $0x8] sm:$0xff]  ;;  %s3513_s6 = smov 80  }
 0x962   :  { %864 = vmatpush.msra.mxu3 %v3725_v48  ;;  %927 = vmatpush.msra.mxu0 %v3725_v48 }
 0x963   :  { %522 = vrot.lane.b32.xlu1 %v521_v11, %s3512_s28  ;;  %997 = vmatpush.msra.mxu1 %v3725_v48 }
 0x964   :  { %865 = vmatpush.msra.mxu3 %v3730_v49  ;;  %928 = vmatpush.msra.mxu0 %v3730_v49 }
 0x965   :  { %998 = vmatpush.msra.mxu1 %v3730_v49 }
 0x9d5   :  { %v523_v13 = vpop.permute.xlu1 %522 }
 0x9d6   :  { %2836 = vmatmul.msk.f32.vlgmr.msrb.gmra.mxu2 %vm249_vm8, %v523_v13 }
 0x9d7   :  { %1273 = vmatpush.msrb.mxu2 %v3725_v48 }
 0x9d9   :  { %1274 = vmatpush.msrb.mxu2 %v3730_v49 }
 0xa59   :  { %v543_v14 = vpop.f32.mrf.mxu2 }
 0xa5a   :  { %v546_v15 = vadd.f32 %v543_v14, %v3674_v25 }
 0xa5c   :  { %2977 = vtanh.f32 %v546_v15  ;;  %v2837_v17 = vmul.f32 -1.442695, %v546_v15 }
 0xa5e   :  { %2979 = vpow2.f32 %v2837_v17 }
 0xa62   :  { %v2978_v16 = vpop.eup %2977 }
 0xa63   :  { %572 = vrot.lane.b32.xlu2 %v2978_v16, %s3511_s3 }
 0xa64   :  { %v2980_v18 = vpop.eup %2979 }
 0xa65   :  { %v550_v19 = vadd.f32 1.0, %v2980_v18 }
 0xa67   :  { %2981 = vrcp.f32 %v550_v19  ;;  %v562_v28 = vand.u32 2147483648, %v550_v19  ;;  %vm556_vm11 = vweird.f32 %v550_v19  ;;  %v560_v29 = vand.u32 2147483647, %v550_v19 }
 0xa68   :  { %2983 = vtanh.f32 %v798_v12 }
 0xa69   :  { %v563_v31 = vor.u32 1.1754944e-38, %v562_v28  ;;  %vm561_vm13 = vcmp.eq.f32.partialorder %v560_v29, 8.507059e+37 }
 0xa6d   :  { %v2982_v20 = vpop.eup %2981 }
 0xa6e   :  { %v552_v21 = vmul.f32 %v2982_v20, %v550_v19  ;;  %vm557_vm10 = vweird.f32 %v2982_v20  ;;  %v2984_v35 = vpop.eup %2983 }
 0xa6f   :  { %vm558_vm12 = vmor %vm556_vm11, %vm557_vm10  ;;  %vm847_vm11 = vcmask 130048  }
 0xa70   :  { %v553_v23 = vsub.f32 1.0, %v552_v21 }
 0xa72   :  { %v554_v24 = vmul.f32 %v2982_v20, %v553_v23 }
 0xa74   :  { %v555_v26 = vadd.f32 %v2982_v20, %v554_v24 }
 0xa76   :  { %v559_v30 = vsel %vm558_vm12, %v2982_v20, %v555_v26 }
 0xa77   :  { %v564_v33 = vsel %vm561_vm13, %v563_v31, %v559_v30 }
 0xa78   :  { %v570_v41 = vmul.f32 %v568_v40, %v564_v33 }
 0xabd   :  { %v573_v32 = vpop.permute.xlu2 %572 }
 0xabe   :  { %v575_v34 = vmul.f32 %v573_v32, %v564_v33 }
 0xac0   :  { %577 = vrot.lane.b32.xlu0 %v575_v34, %s3511_s3 }
 0xac8   :  { %816 = vrot.lane.b32.xlu0 %v2984_v35, %s3512_s28 }
 0xb32   :  { %v578_v42 = vpop.permute.xlu0 %577 }
 0xb33   :  { %v3713_v43 = vadd.f32 %v578_v42, %v570_v41 }
 0xb35   :  { %2985 = vtanh.f32 %v3713_v43 }
 0xb3a   :  { %v817_v44 = vpop.permute.xlu0 %816 }
 0xb3b   :  { %v2986_v45 = vpop.eup %2985  ;;  %2844 = vmatmul.msk.f32.vlgmr.msra.gmra.mxu2 %vm249_vm8, %v817_v44 }
 0xb3c   :  { %583 = vrot.lane.b32.xlu1 %v2986_v45, %s3511_s3 }
 0xbae   :  { %v584_v46 = vpop.permute.xlu1 %583 }
 0xbaf   :  { %v3718_v47 = vmul.f32 %v584_v46, %v564_v33  ;;  %v637_v33 = vrot.slane %v3713_v43, 6 }
 0xbb1   :  { %588 = vrot.lane.b32.xlu2 %v3718_v47, %s3512_s28 }
 0xbbe   :  { %v841_v56 = vpop.f32.mrf.mxu2 }
 0xbbf   :  { %v3750_v51 = vadd.f32 %v3746_v54, %v841_v56 }
 0xc0b   :  { %v589_v50 = vpop.permute.xlu2 %588 }
 0xc0c   :  { %2838 = vmatmul.msk.f32.vlgmr.msrb.gmra.mxu3 %vm249_vm8, %v589_v50 }
 0xc0d   :  { %1067 = vmatpush.msrb.mxu3 %v3725_v48 }
 0xc0f   :  { %1068 = vmatpush.msrb.mxu3 %v3730_v49 }
 0xc14   :  { %866 = vmatmul.f32.vlgmr.msra.gmra.mxu3 %v3510_v22 }
 0xc15   :  { %1343 = vmatpush.msra.mxu3 %v3725_v48 }
 0xc17   :  { %1344 = vmatpush.msra.mxu3 %v3730_v49 }
 0xc8f   :  { %v609_v52 = vpop.f32.mrf.mxu3 }
 0xc90   :  { %v613_v53 = vrot.slane %v609_v52, 6 }
 0xc92   :  { %v615_v55 = vadd.f32 %v613_v53, %v3674_v25 }
 0xc94   :  { %2987 = vtanh.f32 %v615_v55  ;;  %v2839_v27 = vmul.f32 -1.442695, %v615_v55 }
 0xc97   :  { %v867_v57 = vpop.f32.mrf.mxu3 }
 0xc98   :  { %v870_v58 = vadd.f32 %v867_v57, %v3750_v51 }
 0xc9a   :  { %v2988_v59 = vpop.eup %2987  ;;  %2989 = vtanh.f32 %v870_v58  ;;  %v2846_v61 = vmul.f32 -1.442695, %v870_v58 }
 0xc9b   :  { %641 = vrot.lane.b32.xlu1 %v2988_v59, %s3511_s3 }
 0xc9c   :  { %2991 = vpow2.f32 %v2846_v61 }
 0xca0   :  { %v2990_v60 = vpop.eup %2989 }
 0xca1   :  { %893 = vrot.lane.b32.xlu2 %v2990_v60, %s3513_s6 }
 0xca2   :  { %v2992_v62 = vpop.eup %2991 }
 0xca3   :  { %v874_v63 = vadd.f32 1.0, %v2992_v62 }
 0xca5   :  { %2993 = vrcp.f32 %v874_v63  ;;  %v886_v7 = vand.u32 2147483648, %v874_v63  ;;  %vm880_vm15 = vweird.f32 %v874_v63  ;;  %v884_v8 = vand.u32 2147483647, %v874_v63 }
 0xca6   :  { %2995 = vpow2.f32 %v2839_v27 }
 0xca7   :  { %v887_v11 = vor.u32 1.1754944e-38, %v886_v7  ;;  %vm885_vm5 = vcmp.eq.f32.partialorder %v884_v8, 8.507059e+37 }
 0xcab   :  { %v2994_v0 = vpop.eup %2993 }
 0xcac   :  { %v876_v1 = vmul.f32 %v2994_v0, %v874_v63  ;;  %v2996_v2 = vpop.eup %2995  ;;  %vm881_vm14 = vweird.f32 %v2994_v0 }
 0xcad   :  { %v619_v4 = vadd.f32 1.0, %v2996_v2  ;;  %vm882_vm4 = vmor %vm880_vm15, %vm881_vm14 }
 0xcae   :  { %v877_v3 = vsub.f32 1.0, %v876_v1 }
 0xcaf   :  { %2997 = vrcp.f32 %v619_v4  ;;  %v631_v19 = vand.u32 2147483648, %v619_v4  ;;  %vm625_vm7 = vweird.f32 %v619_v4  ;;  %v629_v20 = vand.u32 2147483647, %v619_v4 }
 0xcb0   :  { %v878_v5 = vmul.f32 %v2994_v0, %v877_v3 }
 0xcb1   :  { %v632_v23 = vor.u32 1.1754944e-38, %v631_v19  ;;  %vm630_vm10 = vcmp.eq.f32.partialorder %v629_v20, 8.507059e+37 }
 0xcb2   :  { %v879_v6 = vadd.f32 %v2994_v0, %v878_v5 }
 0xcb4   :  { %v883_v10 = vsel %vm882_vm4, %v2994_v0, %v879_v6 }
 0xcb5   :  { %v2998_v9 = vpop.eup %2997  ;;  %v888_v14 = vsel %vm885_vm5, %v887_v11, %v883_v10 }
 0xcb6   :  { %v621_v12 = vmul.f32 %v2998_v9, %v619_v4  ;;  %vm626_vm6 = vweird.f32 %v2998_v9  ;;  %v891_v29 = vmul.f32 0.0, %v888_v14 }
 0xcb7   :  { %vm627_vm9 = vmor %vm625_vm7, %vm626_vm6 }
 0xcb8   :  { %v622_v16 = vsub.f32 1.0, %v621_v12 }
 0xcba   :  { %v623_v17 = vmul.f32 %v2998_v9, %v622_v16 }
 0xcbc   :  { %v624_v18 = vadd.f32 %v2998_v9, %v623_v17 }
 0xcbe   :  { %v628_v21 = vsel %vm627_vm9, %v2998_v9, %v624_v18 }
 0xcbf   :  { %v633_v26 = vsel %vm630_vm10, %v632_v23, %v628_v21 }
 0xcc0   :  { %v639_v34 = vmul.f32 %v637_v33, %v633_v26 }
 0xcfb   :  { %v894_v13 = vpop.permute.xlu2 %893 }
 0xcfc   :  { %v896_v15 = vmul.f32 %v894_v13, %v888_v14 }
 0xcfe   :  { %898 = vrot.lane.b32.xlu1 %v896_v15, %s3514_s0 }
 0xd0d   :  { %v642_v24 = vpop.permute.xlu1 %641 }
 0xd0e   :  { %v644_v28 = vmul.f32 %v642_v24, %v633_v26 }
 0xd10   :  { %646 = vrot.lane.b32.xlu0 %v644_v28, %s3511_s3 }
 0xd70   :  { %v899_v30 = vpop.permute.xlu1 %898 }
 0xd71   :  { %v3757_v31 = vadd.f32 %v899_v30, %v891_v29 }
 0xd73   :  { %2999 = vtanh.f32 %v3757_v31 }
 0xd79   :  { %v3000_v32 = vpop.eup %2999 }
 0xd7a   :  { %904 = vrot.lane.b32.xlu0 %v3000_v32, %s3514_s0  ;;  %v958_v32 = vrot.slane %v3757_v31, 6 }
 0xd82   :  { %v647_v35 = vpop.permute.xlu0 %646 }
 0xd83   :  { %v3762_v36 = vadd.f32 %v647_v35, %v639_v34 }
 0xd85   :  { %3001 = vtanh.f32 %v3762_v36  ;;  %v707_v24 = vrot.slane %v3762_v36, 6 }
 0xd8b   :  { %v3002_v37 = vpop.eup %3001 }
 0xd8c   :  { %652 = vrot.lane.b32.xlu2 %v3002_v37, %s3511_s3 }
 0xde6   :  { %v653_v38 = vpop.permute.xlu2 %652 }
 0xde7   :  { %v3766_v39 = vmul.f32 %v653_v38, %v633_v26 }
 0xde9   :  { %v657_v40 = vrot.slane %v3766_v39, 2 }
 0xdeb   :  { %658 = vrot.lane.b32.xlu1 %v657_v40, %s3512_s28  ;;  %v799_v40 = vsel %vm198_vm1, %v3718_v47, %v3766_v39 }
 0xdec   :  { %v905_v41 = vpop.permute.xlu0 %904 }
 0xded   :  { %v3770_v42 = vmul.f32 %v905_v41, %v888_v14 }
 0xdef   :  { %909 = vrot.lane.b32.xlu2 %v3770_v42, %s3515_s9 }
 0xe49   :  { %v910_v44 = vpop.permute.xlu2 %909 }
 0xe5d   :  { %v659_v43 = vpop.permute.xlu1 %658 }
 0xe5e   :  { %2840 = vmatmul.msk.f32.vlgmr.msrb.gmra.mxu0 %vm249_vm8, %v659_v43 }
 0xe5f   :  { %1137 = vmatpush.msrb.mxu0 %v3725_v48 }
 0xe61   :  { %1138 = vmatpush.msrb.mxu0 %v3730_v49 }
 0xe66   :  { %2847 = vmatmul.msk.f32.vlgmr.msra.gmra.mxu0 %vm847_vm11, %v910_v44 }
 0xedb   :  { %v679_v45 = vpop.f32.mrf.mxu0 }
 0xedc   :  { %v683_v46 = vrot.slane %v679_v45, 4 }
 0xede   :  { %v685_v50 = vadd.f32 %v683_v46, %v3674_v25 }
 0xee0   :  { %3003 = vtanh.f32 %v685_v50  ;;  %v2841_v58 = vmul.f32 -1.442695, %v685_v50 }
 0xee3   :  { %v930_v52 = vpop.f32.mrf.mxu0 }
 0xee4   :  { %v934_v53 = vrot.slane %v930_v52, 6 }
 0xee6   :  { %v3004_v55 = vpop.eup %3003  ;;  %v936_v56 = vadd.f32 %v934_v53, %v3750_v51 }
 0xee7   :  { %711 = vrot.lane.b32.xlu0 %v3004_v55, %s3511_s3 }
 0xee8   :  { %3005 = vtanh.f32 %v936_v56  ;;  %v2848_v59 = vmul.f32 -1.442695, %v936_v56 }
 0xee9   :  { %3007 = vpow2.f32 %v2841_v58 }
 0xeea   :  { %3009 = vpow2.f32 %v2848_v59 }
 0xeee   :  { %v3006_v57 = vpop.eup %3005 }
 0xeef   :  { %962 = vrot.lane.b32.xlu1 %v3006_v57, %s3513_s6  ;;  %v3008_v60 = vpop.eup %3007 }
 0xef0   :  { %v689_v61 = vadd.f32 1.0, %v3008_v60  ;;  %v3010_v62 = vpop.eup %3009 }
 0xef1   :  { %v940_v63 = vadd.f32 1.0, %v3010_v62 }
 0xef2   :  { %3011 = vrcp.f32 %v689_v61  ;;  %v701_v7 = vand.u32 2147483648, %v689_v61  ;;  %vm695_vm13 = vweird.f32 %v689_v61  ;;  %v699_v8 = vand.u32 2147483647, %v689_v61 }
 0xef3   :  { %3013 = vrcp.f32 %v940_v63  ;;  %v952_v16 = vand.u32 2147483648, %v940_v63  ;;  %vm946_vm5 = vweird.f32 %v940_v63  ;;  %v950_v17 = vand.u32 2147483647, %v940_v63 }
 0xef4   :  { %v702_v11 = vor.u32 1.1754944e-38, %v701_v7  ;;  %vm700_vm15 = vcmp.eq.f32.partialorder %v699_v8, 8.507059e+37 }
 0xef5   :  { %v953_v19 = vor.u32 1.1754944e-38, %v952_v16  ;;  %vm951_vm7 = vcmp.eq.f32.partialorder %v950_v17, 8.507059e+37 }
 0xef8   :  { %v3012_v27 = vpop.eup %3011 }
 0xef9   :  { %v691_v0 = vmul.f32 %v3012_v27, %v689_v61  ;;  %v3014_v2 = vpop.eup %3013  ;;  %vm696_vm12 = vweird.f32 %v3012_v27 }
 0xefa   :  { %v942_v4 = vmul.f32 %v3014_v2, %v940_v63  ;;  %vm697_vm14 = vmor %vm695_vm13, %vm696_vm12  ;;  %vm947_vm4 = vweird.f32 %v3014_v2 }
 0xefb   :  { %v692_v1 = vsub.f32 1.0, %v691_v0  ;;  %vm948_vm6 = vmor %vm946_vm5, %vm947_vm4 }
 0xefc   :  { %v943_v6 = vsub.f32 1.0, %v942_v4 }
 0xefd   :  { %v693_v3 = vmul.f32 %v3012_v27, %v692_v1 }
 0xefe   :  { %v944_v10 = vmul.f32 %v3014_v2, %v943_v6 }
 0xeff   :  { %v694_v5 = vadd.f32 %v3012_v27, %v693_v3 }
 0xf00   :  { %v945_v15 = vadd.f32 %v3014_v2, %v944_v10 }
 0xf01   :  { %v698_v9 = vsel %vm697_vm14, %v3012_v27, %v694_v5 }
 0xf02   :  { %v703_v13 = vsel %vm700_vm15, %v702_v11, %v698_v9  ;;  %v949_v18 = vsel %vm948_vm6, %v3014_v2, %v945_v15 }
 0xf03   :  { %v954_v21 = vsel %vm951_vm7, %v953_v19, %v949_v18  ;;  %v709_v26 = vmul.f32 %v707_v24, %v703_v13 }
 0xf04   :  { %v960_v33 = vmul.f32 %v958_v32, %v954_v21 }
 0xf59   :  { %v712_v12 = vpop.permute.xlu0 %711 }
 0xf5a   :  { %v714_v14 = vmul.f32 %v712_v12, %v703_v13 }
 0xf5c   :  { %716 = vrot.lane.b32.xlu2 %v714_v14, %s3511_s3 }
 0xf61   :  { %v963_v20 = vpop.permute.xlu1 %962 }
 0xf62   :  { %v965_v23 = vmul.f32 %v963_v20, %v954_v21 }
 0xf64   :  { %967 = vrot.lane.b32.xlu0 %v965_v23, %s3514_s0 }
 0xfb6   :  { %v717_v28 = vpop.permute.xlu2 %716 }
 0xfb7   :  { %v3785_v29 = vadd.f32 %v717_v28, %v709_v26 }
 0xfb9   :  { %3015 = vtanh.f32 %v3785_v29 }
 0xfbf   :  { %v3016_v30 = vpop.eup %3015 }
 0xfc0   :  { %722 = vrot.lane.b32.xlu1 %v3016_v30, %s3511_s3 }
 0xfd6   :  { %v968_v34 = vpop.permute.xlu0 %967 }
 0xfd7   :  { %v970_v35 = vadd.f32 %v968_v34, %v960_v33 }
 0xfd9   :  { %3017 = vtanh.f32 %v970_v35  ;;  %v1028_v7 = vrot.slane %v970_v35, 6 }
 0xfdf   :  { %v3018_v37 = vpop.eup %3017 }
 0xfe0   :  { %973 = vrot.lane.b32.xlu2 %v3018_v37, %s3514_s0 }
0x1032   :  { %v723_v38 = vpop.permute.xlu1 %722 }
0x1033   :  { %v725_v36 = vmul.f32 %v723_v38, %v703_v13 }
0x1035   :  { %v727_v41 = vrot.slane %v725_v36, 4  ;;  %v3795_v43 = vsel %vm200_vm0, %v799_v40, %v725_v36  ;;  %v777_v36 = vrot.slane %v3785_v29, 6 }
0x1037   :  { %728 = vrot.lane.b32.xlu0 %v727_v41, %s3512_s28 }
0x103a   :  { %v974_v31 = vpop.permute.xlu2 %973 }
0x103b   :  { %v3798_v44 = vmul.f32 %v974_v31, %v954_v21 }
0x103d   :  { %v978_v45 = vrot.slane %v3798_v44, 2 }
0x103f   :  { %979 = vrot.lane.b32.xlu1 %v978_v45, %s3515_s9 }
0x10a9   :  { %v729_v46 = vpop.permute.xlu0 %728 }
0x10aa   :  { %2842 = vmatmul.msk.f32.vlgmr.msrb.gmra.mxu1 %vm249_vm8, %v729_v46 }
0x10ab   :  { %1203 = vmatpush.msrb.mxu1 %v3725_v48 }
0x10ad   :  { %1204 = vmatpush.msrb.mxu1 %v3730_v49 }
0x10b1   :  { %v980_v47 = vpop.permute.xlu1 %979 }
0x10b2   :  { %2849 = vmatmul.msk.f32.vlgmr.msra.gmra.mxu1 %vm847_vm11, %v980_v47 }
0x1127   :  { %v749_v39 = vpop.f32.mrf.mxu1 }
0x1128   :  { %v753_v27 = vrot.slane %v749_v39, 2 }
0x112a   :  { %v755_v2 = vadd.f32 %v753_v27, %v3674_v25 }
0x112c   :  { %v2843_v25 = vmul.f32 -1.442695, %v755_v2 }
0x112f   :  { %v1000_v50 = vpop.f32.mrf.mxu1 }
0x1130   :  { %v1004_v52 = vrot.slane %v1000_v50, 4 }
0x1132   :  { %v1006_v53 = vadd.f32 %v1004_v52, %v3750_v51 }
0x1134   :  { %3019 = vtanh.f32 %v1006_v53  ;;  %v2850_v56 = vmul.f32 -1.442695, %v1006_v53 }
0x1136   :  { %3021 = vpow2.f32 %v2850_v56 }
0x113a   :  { %v3020_v55 = vpop.eup %3019 }
0x113b   :  { %1032 = vrot.lane.b32.xlu2 %v3020_v55, %s3513_s6 }
0x113c   :  { %v3022_v57 = vpop.eup %3021 }
0x113d   :  { %v1010_v58 = vadd.f32 1.0, %v3022_v57 }
0x113f   :  { %3023 = vrcp.f32 %v1010_v58  ;;  %v1022_v62 = vand.u32 2147483648, %v1010_v58  ;;  %vm1016_vm10 = vweird.f32 %v1010_v58  ;;  %v1020_v63 = vand.u32 2147483647, %v1010_v58 }
0x1140   :  { %3025 = vtanh.f32 %v755_v2 }
0x1141   :  { %v1023_v1 = vor.u32 1.1754944e-38, %v1022_v62  ;;  %vm1021_vm13 = vcmp.eq.f32.partialorder %v1020_v63, 8.507059e+37 }
0x1145   :  { %v3024_v48 = vpop.eup %3023 }
0x1146   :  { %v1012_v59 = vmul.f32 %v3024_v48, %v1010_v58  ;;  %vm1017_vm9 = vweird.f32 %v3024_v48  ;;  %v3026_v6 = vpop.eup %3025 }
0x1147   :  { %vm1018_vm12 = vmor %vm1016_vm10, %vm1017_vm9 }
0x1148   :  { %v1013_v49 = vsub.f32 1.0, %v1012_v59 }
0x114a   :  { %v1014_v60 = vmul.f32 %v3024_v48, %v1013_v49 }
0x114c   :  { %v1015_v61 = vadd.f32 %v3024_v48, %v1014_v60 }
0x114e   :  { %v1019_v0 = vsel %vm1018_vm12, %v3024_v48, %v1015_v61 }
0x114f   :  { %v1024_v4 = vsel %vm1021_vm13, %v1023_v1, %v1019_v0 }
0x1150   :  { %v1030_v8 = vmul.f32 %v1028_v7, %v1024_v4 }
0x1195   :  { %v1033_v3 = vpop.permute.xlu2 %1032 }
0x1196   :  { %v1035_v5 = vmul.f32 %v1033_v3, %v1024_v4 }
0x1198   :  { %1037 = vrot.lane.b32.xlu0 %v1035_v5, %s3514_s0 }
0x11a0   :  { %781 = vrot.lane.b32.xlu0 %v3026_v6, %s3511_s3 }
0x120a   :  { %v1038_v9 = vpop.permute.xlu0 %1037 }
0x120b   :  { %v3811_v10 = vadd.f32 %v1038_v9, %v1030_v8 }
0x120d   :  { %3027 = vtanh.f32 %v3811_v10  ;;  %v1098_v0 = vrot.slane %v3811_v10, 6 }
0x120e   :  { %3029 = vpow2.f32 %v2843_v25 }
0x1212   :  { %v782_v30 = vpop.permute.xlu0 %781 }
0x1213   :  { %v3028_v11 = vpop.eup %3027 }
0x1214   :  { %1043 = vrot.lane.b32.xlu1 %v3028_v11, %s3514_s0  ;;  %v3030_v12 = vpop.eup %3029 }
0x1215   :  { %v759_v13 = vadd.f32 1.0, %v3030_v12 }
0x1217   :  { %3031 = vrcp.f32 %v759_v13  ;;  %v771_v23 = vand.u32 2147483648, %v759_v13  ;;  %vm765_vm15 = vweird.f32 %v759_v13  ;;  %v769_v24 = vand.u32 2147483647, %v759_v13 }
0x1219   :  { %v772_v28 = vor.u32 1.1754944e-38, %v771_v23  ;;  %vm770_vm5 = vcmp.eq.f32.partialorder %v769_v24, 8.507059e+37 }
0x121d   :  { %v3032_v14 = vpop.eup %3031 }
0x121e   :  { %v761_v15 = vmul.f32 %v3032_v14, %v759_v13  ;;  %vm766_vm14 = vweird.f32 %v3032_v14 }
0x121f   :  { %vm767_vm4 = vmor %vm765_vm15, %vm766_vm14 }
0x1220   :  { %v762_v16 = vsub.f32 1.0, %v761_v15 }
0x1222   :  { %v763_v17 = vmul.f32 %v3032_v14, %v762_v16 }
0x1224   :  { %v764_v20 = vadd.f32 %v3032_v14, %v763_v17 }
0x1226   :  { %v768_v26 = vsel %vm767_vm4, %v3032_v14, %v764_v20 }
0x1227   :  { %v773_v32 = vsel %vm770_vm5, %v772_v28, %v768_v26 }
0x1228   :  { %v784_v33 = vmul.f32 %v782_v30, %v773_v32  ;;  %v779_v41 = vmul.f32 %v777_v36, %v773_v32 }
0x1286   :  { %v1044_v18 = vpop.permute.xlu1 %1043 }
0x1287   :  { %v3815_v19 = vmul.f32 %v1044_v18, %v1024_v4 }
0x1289   :  { %v1048_v21 = vrot.slane %v3815_v19, 4 }
0x128b   :  { %1049 = vrot.lane.b32.xlu2 %v1048_v21, %s3515_s9 }
0x1293   :  { %786 = vrot.lane.b32.xlu2 %v784_v33, %s3511_s3 }
0x12e5   :  { %v1050_v34 = vpop.permute.xlu2 %1049 }
0x12e6   :  { %2851 = vmatmul.msk.f32.vlgmr.msrb.gmra.mxu3 %vm847_vm11, %v1050_v34 }
0x12ed   :  { %v787_v40 = vpop.permute.xlu2 %786 }
0x12ee   :  { %v789_v31 = vadd.f32 %v787_v40, %v779_v41 }
0x1369   :  { %v1070_v35 = vpop.f32.mrf.mxu3 }
0x136a   :  { %v1074_v37 = vrot.slane %v1070_v35, 2 }
0x136c   :  { %v1076_v38 = vadd.f32 %v1074_v37, %v3750_v51 }
0x136e   :  { %3033 = vtanh.f32 %v1076_v38  ;;  %v2852_v47 = vmul.f32 -1.442695, %v1076_v38 }
0x136f   :  { %3035 = vtanh.f32 %v789_v31 }
0x1370   :  { %3037 = vpow2.f32 %v2852_v47 }
0x1374   :  { %v3034_v45 = vpop.eup %3033 }
0x1375   :  { %1102 = vrot.lane.b32.xlu1 %v3034_v45, %s3513_s6  ;;  %v3036_v46 = vpop.eup %3035 }
0x1376   :  { %v3038_v39 = vpop.eup %3037 }
0x1377   :  { %v1080_v50 = vadd.f32 1.0, %v3038_v39 }
0x1379   :  { %3039 = vrcp.f32 %v1080_v50  ;;  %v1092_v56 = vand.u32 2147483648, %v1080_v50  ;;  %vm1086_vm7 = vweird.f32 %v1080_v50  ;;  %v1090_v57 = vand.u32 2147483647, %v1080_v50 }
0x137b   :  { %v1093_v48 = vor.u32 1.1754944e-38, %v1092_v56  ;;  %vm1091_vm10 = vcmp.eq.f32.partialorder %v1090_v57, 8.507059e+37 }
0x137d   :  { %792 = vrot.lane.b32.xlu1 %v3036_v46, %s3511_s3 }
0x137f   :  { %v3040_v52 = vpop.eup %3039 }
0x1380   :  { %v1082_v51 = vmul.f32 %v3040_v52, %v1080_v50  ;;  %vm1087_vm6 = vweird.f32 %v3040_v52 }
0x1381   :  { %vm1088_vm9 = vmor %vm1086_vm7, %vm1087_vm6 }
0x1382   :  { %v1083_v53 = vsub.f32 1.0, %v1082_v51 }
0x1384   :  { %v1084_v29 = vmul.f32 %v3040_v52, %v1083_v53 }
0x1386   :  { %v1085_v55 = vadd.f32 %v3040_v52, %v1084_v29 }
0x1388   :  { %v1089_v58 = vsel %vm1088_vm9, %v3040_v52, %v1085_v55 }
0x1389   :  { %v1094_v49 = vsel %vm1091_vm10, %v1093_v48, %v1089_v58 }
0x138a   :  { %v1100_v1 = vmul.f32 %v1098_v0, %v1094_v49 }
0x13e7   :  { %v1103_v59 = vpop.permute.xlu1 %1102 }
0x13e8   :  { %v1105_v60 = vmul.f32 %v1103_v59, %v1094_v49 }
0x13ea   :  { %1107 = vrot.lane.b32.xlu0 %v1105_v60, %s3514_s0 }
0x13ef   :  { %v793_v61 = vpop.permute.xlu1 %792 }
0x13f0   :  { %v795_v62 = vmul.f32 %v793_v61, %v773_v32 }
0x13f2   :  { %v801_v63 = vsel %vm202_vm2, %v3795_v43, %v795_v62 }
0x13f3   :  { %3041 = vtanh.f32 %v801_v63 }
0x13f9   :  { %v3042_v27 = vpop.eup %3041 }
0x13fa   :  { %818 = vrot.lane.b32.xlu0 %v3042_v27, %s3512_s28 }
0x145c   :  { %v1108_v2 = vpop.permute.xlu0 %1107 }
0x145d   :  { %v1110_v3 = vadd.f32 %v1108_v2, %v1100_v1 }
0x145f   :  { %3043 = vtanh.f32 %v1110_v3  ;;  %v1165_v33 = vrot.slane %v1110_v3, 6 }
0x1465   :  { %v3044_v4 = vpop.eup %3043 }
0x1466   :  { %1113 = vrot.lane.b32.xlu2 %v3044_v4, %s3514_s0 }
0x146c   :  { %v819_v5 = vpop.permute.xlu0 %818 }
0x146d   :  { %2845 = vmatmul.msk.f32.gmra.mxu2 %vm249_vm8, %v819_v5 }
0x14c0   :  { %v1114_v6 = vpop.permute.xlu2 %1113 }
0x14c1   :  { %v3832_v7 = vmul.f32 %v1114_v6, %v1094_v49 }
0x14c3   :  { %v1118_v43 = vrot.slane %v3832_v7, 6 }
0x14c5   :  { %1119 = vrot.lane.b32.xlu1 %v1118_v43, %s3515_s9 }
0x14f0   :  { %v844_v9 = vpop.f32.mrf.mxu2 }
0x14f1   :  { %v3838_v10 = vadd.f32 %v3746_v54, %v844_v9 }
0x1537   :  { %v1120_v8 = vpop.permute.xlu1 %1119 }
0x1538   :  { %2853 = vmatmul.msk.f32.vlgmr.msrb.gmra.mxu0 %vm847_vm11, %v1120_v8 }
0x15b5   :  { %v1140_v11 = vpop.f32.mrf.mxu0 }
0x15b6   :  { %v1143_v25 = vadd.f32 %v1140_v11, %v3838_v10 }
0x15b8   :  { %3045 = vtanh.f32 %v1143_v25  ;;  %v2854_v13 = vmul.f32 -1.442695, %v1143_v25 }
0x15ba   :  { %3047 = vpow2.f32 %v2854_v13 }
0x15be   :  { %v3046_v12 = vpop.eup %3045 }
0x15bf   :  { %1169 = vrot.lane.b32.xlu2 %v3046_v12, %s3513_s6 }
0x15c0   :  { %v3048_v14 = vpop.eup %3047 }
0x15c1   :  { %v1147_v15 = vadd.f32 1.0, %v3048_v14 }
0x15c3   :  { %3049 = vrcp.f32 %v1147_v15  ;;  %v1159_v54 = vand.u32 2147483648, %v1147_v15  ;;  %vm1153_vm13 = vweird.f32 %v1147_v15  ;;  %v1157_v23 = vand.u32 2147483647, %v1147_v15 }
0x15c5   :  { %v1160_v26 = vor.u32 1.1754944e-38, %v1159_v54  ;;  %vm1158_vm15 = vcmp.eq.f32.partialorder %v1157_v23, 8.507059e+37 }
0x15c9   :  { %v3050_v16 = vpop.eup %3049 }
0x15ca   :  { %v1149_v17 = vmul.f32 %v3050_v16, %v1147_v15  ;;  %vm1154_vm12 = vweird.f32 %v3050_v16 }
0x15cb   :  { %vm1155_vm14 = vmor %vm1153_vm13, %vm1154_vm12 }
0x15cc   :  { %v1150_v18 = vsub.f32 1.0, %v1149_v17 }
0x15ce   :  { %v1151_v20 = vmul.f32 %v3050_v16, %v1150_v18 }
0x15d0   :  { %v1152_v21 = vadd.f32 %v3050_v16, %v1151_v20 }
0x15d2   :  { %v1156_v24 = vsel %vm1155_vm14, %v3050_v16, %v1152_v21 }
0x15d3   :  { %v1161_v30 = vsel %vm1158_vm15, %v1160_v26, %v1156_v24 }
0x15d4   :  { %v1167_v34 = vmul.f32 %v1165_v33, %v1161_v30 }
0x1619   :  { %v1170_v28 = vpop.permute.xlu2 %1169 }
0x161a   :  { %v1172_v32 = vmul.f32 %v1170_v28, %v1161_v30 }
0x161c   :  { %1174 = vrot.lane.b32.xlu0 %v1172_v32, %s3514_s0 }
0x168e   :  { %v1175_v35 = vpop.permute.xlu0 %1174 }
0x168f   :  { %v1177_v37 = vadd.f32 %v1175_v35, %v1167_v34 }
0x1691   :  { %3051 = vtanh.f32 %v1177_v37  ;;  %v1234_v62 = vrot.slane %v1177_v37, 6 }
0x1697   :  { %v3052_v38 = vpop.eup %3051 }
0x1698   :  { %1180 = vrot.lane.b32.xlu1 %v3052_v38, %s3514_s0 }
0x170a   :  { %v1181_v36 = vpop.permute.xlu1 %1180 }
0x170b   :  { %v3844_v40 = vmul.f32 %v1181_v36, %v1161_v30 }
0x170d   :  { %1185 = vrot.lane.b32.xlu2 %v3844_v40, %s3515_s9 }
0x1767   :  { %v1186_v41 = vpop.permute.xlu2 %1185 }
0x1768   :  { %2855 = vmatmul.msk.f32.vlgmr.msrb.gmra.mxu1 %vm847_vm11, %v1186_v41 }
0x17e5   :  { %v1206_v31 = vpop.f32.mrf.mxu1 }
0x17e6   :  { %v1210_v45 = vrot.slane %v1206_v31, 6 }
0x17e8   :  { %v1212_v46 = vadd.f32 %v1210_v45, %v3838_v10 }
0x17ea   :  { %3053 = vtanh.f32 %v1212_v46  ;;  %v2856_v39 = vmul.f32 -1.442695, %v1212_v46 }
0x17ec   :  { %3055 = vpow2.f32 %v2856_v39 }
0x17f0   :  { %v3054_v47 = vpop.eup %3053 }
0x17f1   :  { %1238 = vrot.lane.b32.xlu0 %v3054_v47, %s3513_s6 }
0x17f2   :  { %v3056_v50 = vpop.eup %3055 }
0x17f3   :  { %v1216_v52 = vadd.f32 1.0, %v3056_v50 }
0x17f5   :  { %3057 = vrcp.f32 %v1216_v52  ;;  %v1228_v57 = vand.u32 2147483648, %v1216_v52  ;;  %vm1222_vm5 = vweird.f32 %v1216_v52  ;;  %v1226_v58 = vand.u32 2147483647, %v1216_v52 }
0x17f7   :  { %v1229_v59 = vor.u32 1.1754944e-38, %v1228_v57  ;;  %vm1227_vm7 = vcmp.eq.f32.partialorder %v1226_v58, 8.507059e+37 }
0x17fb   :  { %v3058_v51 = vpop.eup %3057 }
0x17fc   :  { %v1218_v53 = vmul.f32 %v3058_v51, %v1216_v52  ;;  %vm1223_vm4 = vweird.f32 %v3058_v51 }
0x17fd   :  { %vm1224_vm6 = vmor %vm1222_vm5, %vm1223_vm4 }
0x17fe   :  { %v1219_v29 = vsub.f32 1.0, %v1218_v53 }
0x1800   :  { %v1220_v55 = vmul.f32 %v3058_v51, %v1219_v29 }
0x1802   :  { %v1221_v56 = vadd.f32 %v3058_v51, %v1220_v55 }
0x1804   :  { %v1225_v48 = vsel %vm1224_vm6, %v3058_v51, %v1221_v56  ;;  %vm1398_vm6 = vcmask 123904  }
0x1805   :  { %v1230_v60 = vsel %vm1227_vm7, %v1229_v59, %v1225_v48  ;;  %vm1405_vm7 = vcmask 257154  }
0x1806   :  { %v1236_v63 = vmul.f32 %v1234_v62, %v1230_v60 }
0x1863   :  { %v1239_v49 = vpop.permute.xlu0 %1238 }
0x1864   :  { %v1241_v61 = vmul.f32 %v1239_v49, %v1230_v60 }
0x1866   :  { %1243 = vrot.lane.b32.xlu1 %v1241_v61, %s3514_s0 }
0x18d8   :  { %v1244_v27 = vpop.permute.xlu1 %1243 }
0x18d9   :  { %v1246_v0 = vadd.f32 %v1244_v27, %v1236_v63 }
0x18db   :  { %3059 = vtanh.f32 %v1246_v0  ;;  %v1304_v28 = vrot.slane %v1246_v0, 6 }
0x18e1   :  { %v3060_v1 = vpop.eup %3059 }
0x18e2   :  { %1249 = vrot.lane.b32.xlu2 %v3060_v1, %s3514_s0 }
0x193c   :  { %v1250_v2 = vpop.permute.xlu2 %1249 }
0x193d   :  { %v3853_v3 = vmul.f32 %v1250_v2, %v1230_v60 }
0x193f   :  { %v1254_v4 = vrot.slane %v3853_v3, 2 }
0x1941   :  { %1255 = vrot.lane.b32.xlu0 %v1254_v4, %s3515_s9 }
0x19b3   :  { %v1256_v5 = vpop.permute.xlu0 %1255 }
0x19b4   :  { %2857 = vmatmul.msk.f32.vlgmr.msrb.gmra.mxu2 %vm847_vm11, %v1256_v5 }
0x1a37   :  { %v1276_v6 = vpop.f32.mrf.mxu2 }
0x1a38   :  { %v1280_v43 = vrot.slane %v1276_v6, 4 }
0x1a3a   :  { %v1282_v8 = vadd.f32 %v1280_v43, %v3838_v10 }
0x1a3c   :  { %3061 = vtanh.f32 %v1282_v8  ;;  %v2858_v11 = vmul.f32 -1.442695, %v1282_v8 }
0x1a3e   :  { %3063 = vpow2.f32 %v2858_v11 }
0x1a42   :  { %v3062_v9 = vpop.eup %3061 }
0x1a43   :  { %1308 = vrot.lane.b32.xlu1 %v3062_v9, %s3513_s6 }
0x1a44   :  { %v3064_v25 = vpop.eup %3063 }
0x1a45   :  { %v1286_v12 = vadd.f32 1.0, %v3064_v25 }
0x1a47   :  { %3065 = vrcp.f32 %v1286_v12  ;;  %v1298_v18 = vand.u32 2147483648, %v1286_v12  ;;  %vm1292_vm10 = vweird.f32 %v1286_v12  ;;  %v1296_v20 = vand.u32 2147483647, %v1286_v12 }
0x1a49   :  { %v1299_v54 = vor.u32 1.1754944e-38, %v1298_v18  ;;  %vm1297_vm13 = vcmp.eq.f32.partialorder %v1296_v20, 8.507059e+37 }
0x1a4d   :  { %v3066_v13 = vpop.eup %3065 }
0x1a4e   :  { %v1288_v14 = vmul.f32 %v3066_v13, %v1286_v12  ;;  %vm1293_vm9 = vweird.f32 %v3066_v13 }
0x1a4f   :  { %vm1294_vm12 = vmor %vm1292_vm10, %vm1293_vm9  ;;  %vm1408_vm9 = vcmask 390404   ;;  %vm1415_vm10 = vcmask 523654  }
0x1a50   :  { %v1289_v15 = vsub.f32 1.0, %v1288_v14 }
0x1a52   :  { %v1290_v16 = vmul.f32 %v3066_v13, %v1289_v15  ;;  %v1446_v15 = vld [vmem:[#allocation5] sm:$0x3] }
0x1a54   :  { %v1291_v17 = vadd.f32 %v3066_v13, %v1290_v16 }
0x1a56   :  { %v1295_v21 = vsel %vm1294_vm12, %v3066_v13, %v1291_v17  ;;  %vm1422_vm12 = vcmask 648704  }
0x1a57   :  { %v1300_v24 = vsel %vm1297_vm13, %v1299_v54, %v1295_v21  ;;  %vm1429_vm13 = vcmask 781954  }
0x1a58   :  { %v1306_v30 = vmul.f32 %v1304_v28, %v1300_v24  ;;  %v1487_v28 = vld [vmem:[#allocation14 + $0x10] sm:$0xff] }
0x1ab5   :  { %v1309_v23 = vpop.permute.xlu1 %1308 }
0x1ab6   :  { %v1311_v26 = vmul.f32 %v1309_v23, %v1300_v24  ;;  %v1484_v23 = vld [vmem:[#allocation13 + $0x8] sm:$0xff] }
0x1ab7   :  { %1513 = vmatpush.msra.mxu0 %v1484_v23 }
0x1ab8   :  { %1313 = vrot.lane.b32.xlu2 %v1311_v26, %s3514_s0  ;;  %v1483_v26 = vld [vmem:[#allocation13] sm:$0xff] }
0x1ab9   :  { %1514 = vmatpush.msra.mxu0 %v1483_v26 }
0x1b12   :  { %v1314_v32 = vpop.permute.xlu2 %1313 }
0x1b13   :  { %v1316_v33 = vadd.f32 %v1314_v32, %v1306_v30  ;;  %v1486_v30 = vld [vmem:[#allocation14 + $0x8] sm:$0xff]  ;;  %v1485_v32 = vld [vmem:[#allocation14] sm:$0xff] }
0x1b15   :  { %3067 = vtanh.f32 %v1316_v33  ;;  %v1374_v63 = vrot.slane %v1316_v33, 6 }
0x1b1b   :  { %v3068_v34 = vpop.eup %3067 }
0x1b1c   :  { %1319 = vrot.lane.b32.xlu0 %v3068_v34, %s3514_s0 }
0x1b8e   :  { %v1320_v35 = vpop.permute.xlu0 %1319 }
0x1b8f   :  { %v3862_v37 = vmul.f32 %v1320_v35, %v1300_v24  ;;  %v1488_v24 = vld [vmem:[#allocation14 + $0x18] sm:$0xff] }
0x1b90   :  { %1534 = vmatpush.msra.mxu1 %v1488_v24  ;;  %1597 = vmatpush.msra.mxu2 %v1488_v24 }
0x1b91   :  { %v1324_v38 = vrot.slane %v3862_v37, 4  ;;  %1667 = vmatpush.msrb.mxu3 %v1488_v24  ;;  %1943 = vmatpush.msrb.mxu0 %v1488_v24 }
0x1b92   :  { %1535 = vmatpush.msra.mxu1 %v1487_v28  ;;  %1598 = vmatpush.msra.mxu2 %v1487_v28 }
0x1b93   :  { %1325 = vrot.lane.b32.xlu1 %v1324_v38, %s3515_s9  ;;  %1668 = vmatpush.msrb.mxu3 %v1487_v28 }
0x1b94   :  { %1944 = vmatpush.msrb.mxu0 %v1487_v28  ;;  %1536 = vmatpush.msra.mxu1 %v1486_v30 }
0x1b95   :  { %1599 = vmatpush.msra.mxu2 %v1486_v30  ;;  %1669 = vmatpush.msrb.mxu3 %v1486_v30 }
0x1b96   :  { %1945 = vmatpush.msrb.mxu0 %v1486_v30  ;;  %1537 = vmatpush.msra.mxu1 %v1485_v32 }
0x1b97   :  { %1600 = vmatpush.msra.mxu2 %v1485_v32  ;;  %1538 = vmatmul.f32.vlgmr.msra.gmra.mxu1 %v3510_v22 }
0x1b98   :  { %1670 = vmatpush.msrb.mxu3 %v1485_v32  ;;  %1737 = vmatpush.msrb.mxu1 %v1488_v24 }
0x1b99   :  { %1807 = vmatpush.msrb.mxu2 %v1488_v24  ;;  %1946 = vmatpush.msrb.mxu0 %v1485_v32 }
0x1b9a   :  { %1738 = vmatpush.msrb.mxu1 %v1487_v28 }
0x1b9b   :  { %1808 = vmatpush.msrb.mxu2 %v1487_v28 }
0x1b9c   :  { %1739 = vmatpush.msrb.mxu1 %v1486_v30 }
0x1b9d   :  { %1809 = vmatpush.msrb.mxu2 %v1486_v30 }
0x1b9e   :  { %1740 = vmatpush.msrb.mxu1 %v1485_v32 }
0x1b9f   :  { %1810 = vmatpush.msrb.mxu2 %v1485_v32 }
0x1ba0   :  { %2013 = vmatpush.msra.mxu1 %v1488_v24 }
0x1ba2   :  { %2014 = vmatpush.msra.mxu1 %v1487_v28 }
0x1ba4   :  { %2015 = vmatpush.msra.mxu1 %v1486_v30 }
0x1ba6   :  { %2016 = vmatpush.msra.mxu1 %v1485_v32 }
0x1c05   :  { %v1326_v36 = vpop.permute.xlu1 %1325 }
0x1c06   :  { %2859 = vmatmul.msk.f32.vlgmr.msra.gmra.mxu3 %vm847_vm11, %v1326_v36 }
0x1c07   :  { %1873 = vmatpush.msra.mxu3 %v1488_v24 }
0x1c09   :  { %1874 = vmatpush.msra.mxu3 %v1487_v28 }
0x1c0b   :  { %1875 = vmatpush.msra.mxu3 %v1486_v30 }
0x1c0d   :  { %1876 = vmatpush.msra.mxu3 %v1485_v32 }
0x1c89   :  { %v1346_v41 = vpop.f32.mrf.mxu3 }
0x1c8a   :  { %v1350_v31 = vrot.slane %v1346_v41, 2  ;;  %v3908_v41 = vld [vmem:[%s4170_s10] ss:$0 sm:$0xff]  ;;  %s4183_s10 = sld [smem:[#allocation28_spill]] }
0x1c8c   :  { %v1352_v45 = vadd.f32 %v1350_v31, %v3838_v10 }
0x1c8e   :  { %3069 = vtanh.f32 %v1352_v45  ;;  %v2860_v50 = vmul.f32 -1.442695, %v1352_v45  ;;  %v1539_v45 = vpop.f32.mrf.mxu1 }
0x1c8f   :  { %3071 = vtanh.f32 %v3770_v42 }
0x1c90   :  { %3073 = vtanh.f32 %v3844_v40  ;;  %s2796_s18 = sshll.u32 %s4183_s10, 4  ;;  %s2797_s18 = int_to_ptr.hbm [resolvable:$true] %s2796_s18 }
0x1c91   :  { %3075 = vpow2.f32 %v2860_v50 }
0x1c94   :  { %v3070_v46 = vpop.eup %3069 }
0x1c95   :  { %1378 = vrot.lane.b32.xlu2 %v3070_v46, %s3513_s6  ;;  %v3072_v47 = vpop.eup %3071 }
0x1c96   :  { %v3074_v39 = vpop.eup %3073 }
0x1c97   :  { %v3076_v52 = vpop.eup %3075 }
0x1c98   :  { %v1356_v51 = vadd.f32 1.0, %v3076_v52 }
0x1c9a   :  { %3077 = vrcp.f32 %v1356_v51  ;;  %v1368_v42 = vand.u32 2147483648, %v1356_v51  ;;  %vm1362_vm15 = vweird.f32 %v1356_v51  ;;  %v1366_v57 = vand.u32 2147483647, %v1356_v51 }
0x1c9b   :  { %3079 = vtanh.f32 %v3798_v44 }
0x1c9c   :  { %v1369_v40 = vor.u32 1.1754944e-38, %v1368_v42  ;;  %vm1367_vm5 = vcmp.eq.f32.partialorder %v1366_v57, 8.507059e+37  ;;  %3081 = vtanh.f32 %v3853_v3 }
0x1c9d   :  { %1395 = vrot.lane.b32.xlu2 %v3072_v47, %s3515_s9  ;;  %3083 = vtanh.f32 %v3815_v19 }
0x1ca0   :  { %v3078_v10 = vpop.eup %3077 }
0x1ca1   :  { %v1358_v53 = vmul.f32 %v3078_v10, %v1356_v51  ;;  %vm1363_vm14 = vweird.f32 %v3078_v10  ;;  %v3080_v61 = vpop.eup %3079 }
0x1ca2   :  { %vm1364_vm4 = vmor %vm1362_vm15, %vm1363_vm14  ;;  %v3082_v62 = vpop.eup %3081  ;;  %vm1436_vm14 = vcmask 915204   ;;  %vm1443_vm15 = vcmask 1048454  }
0x1ca3   :  { %v1359_v29 = vsub.f32 1.0, %v1358_v53  ;;  %v3084_v44 = vpop.eup %3083 }
0x1ca5   :  { %1419 = vrot.lane.b32.xlu2 %v3074_v39, %s3511_s3  ;;  %v1360_v55 = vmul.f32 %v3078_v10, %v1359_v29 }
0x1ca7   :  { %v1361_v56 = vadd.f32 %v3078_v10, %v1360_v55 }
0x1ca9   :  { %v1365_v58 = vsel %vm1364_vm4, %v3078_v10, %v1361_v56 }
0x1caa   :  { %v1370_v59 = vsel %vm1367_vm5, %v1369_v40, %v1365_v58 }
0x1cab   :  { %v1376_v27 = vmul.f32 %v1374_v63, %v1370_v59 }
0x1cef   :  { %v1379_v48 = vpop.permute.xlu2 %1378 }
0x1cf0   :  { %v1381_v49 = vmul.f32 %v1379_v48, %v1370_v59 }
0x1cf2   :  { %1383 = vrot.lane.b32.xlu0 %v1381_v49, %s3514_s0 }
0x1cf7   :  { %v1396_v60 = vpop.permute.xlu2 %1395 }
0x1cf8   :  { %1399 = vst.msk [vmem:[#allocation17] sm:$0x3] %vm1398_vm6, %v1396_v60 }
0x1cfa   :  { %1402 = vrot.lane.b32.xlu0 %v3080_v61, %s3503_s8 }
0x1cff   :  { %v1420_v9 = vpop.permute.xlu2 %1419 }
0x1d02   :  { %1426 = vrot.lane.b32.xlu0 %v3082_v62, %s3516_s30 }
0x1d64   :  { %v1384_v0 = vpop.permute.xlu0 %1383 }
0x1d65   :  { %v1386_v1 = vadd.f32 %v1384_v0, %v1376_v27 }
0x1d67   :  { %3085 = vtanh.f32 %v1386_v1 }
0x1d68   :  { %3087 = vtanh.f32 %v3832_v7 }
0x1d69   :  { %3089 = vtanh.f32 %v3862_v37 }
0x1d6c   :  { %v1403_v2 = vpop.permute.xlu0 %1402 }
0x1d6d   :  { %v3086_v4 = vpop.eup %3085  ;;  %1406 = vst.msk [vmem:[#allocation17 - $0x2] sm:$0xc] %vm1405_vm7, %v1403_v2 }
0x1d6e   :  { %1389 = vrot.lane.b32.xlu1 %v3086_v4, %s3514_s0  ;;  %1409 = vst.msk [vmem:[#allocation17 - $0x4] sm:$0x30] %vm1408_vm9, %v3084_v44  ;;  %v3088_v3 = vpop.eup %3087 }
0x1d6f   :  { %v3090_v5 = vpop.eup %3089 }
0x1d74   :  { %v1427_v11 = vpop.permute.xlu0 %1426 }
0x1d76   :  { %1412 = vrot.lane.b32.xlu1 %v3088_v3, %s3514_s0 }
0x1d7e   :  { %1433 = vrot.lane.b32.xlu1 %v3090_v5, %s3512_s28 }
0x1de0   :  { %v1390_v19 = vpop.permute.xlu1 %1389 }
0x1de1   :  { %v1392_v6 = vmul.f32 %v1390_v19, %v1370_v59 }
0x1de3   :  { %3091 = vtanh.f32 %v1392_v6 }
0x1de8   :  { %v1413_v43 = vpop.permute.xlu1 %1412 }
0x1de9   :  { %v3092_v8 = vpop.eup %3091  ;;  %1416 = vst.msk [vmem:[#allocation17 - $0x6] sm:$0xc0] %vm1415_vm10, %v1413_v43 }
0x1dea   :  { %1423 = vst.msk [vmem:[#allocation17] sm:$0x3] %vm1422_vm12, %v1420_v9  ;;  %1440 = vrot.lane.b32.xlu2 %v3092_v8, %s3513_s6 }
0x1deb   :  { %1430 = vst.msk [vmem:[#allocation17 - $0x2] sm:$0xc] %vm1429_vm13, %v1427_v11 }
0x1df0   :  { %v1434_v7 = vpop.permute.xlu1 %1433 }
0x1df1   :  { %1437 = vst.msk [vmem:[#allocation17 - $0x4] sm:$0x30] %vm1436_vm14, %v1434_v7 }
0x1e44   :  { %v1441_v25 = vpop.permute.xlu2 %1440 }
0x1e45   :  { %1444 = vst.msk [vmem:[#allocation17 - $0x6] sm:$0xc0] %vm1443_vm15, %v1441_v25 }
0x1e4c   :  { %v1445_v12 = vld [vmem:[#allocation17] sm:$0x3] }
0x1e4d   :  { %v1447_v13 = vmul.f32 0.5, %v1445_v12 }
0x1e4f   :  { %v1448_v14 = vmul.f32 1.442695, %v1447_v13 }
0x1e51   :  { %3093 = vpow2.f32 %v1448_v14 }
0x1e57   :  { %v3094_v16 = vpop.eup %3093 }
0x1e58   :  { %v1450_v17 = vmul.f32 %v3094_v16, %v1446_v15 }
0x1e5a   :  { %v3885_v18 = vadd.f32 %v1450_v17, %v1445_v12 }
0x1e5c   :  { %v1461_v20 = vrot.slane %v3885_v18, 2  ;;  %v1457_v21 = vrot.slane %v3885_v18, 4  ;;  %v1453_v54 = vrot.slane %v3885_v18, 6 }
0x1e5e   :  { %1462 = vrot.lane.b32.xlu2 %v1461_v20, %s3513_s6  ;;  %1458 = vrot.lane.b32.xlu1 %v1457_v21, %s3515_s9  ;;  %s3521_s6 = smov 20   ;;  %s3522_s9 = smov 28  }
0x1e5f   :  { %1454 = vrot.lane.b32.xlu0 %v1453_v54, %s3503_s8 }
0x1eb8   :  { %v1463_v37 = vpop.permute.xlu2 %1462 }
0x1ed0   :  { %v1459_v33 = vpop.permute.xlu1 %1458 }
0x1ed1   :  { %v1455_v34 = vpop.permute.xlu0 %1454 }
0x1ed2   :  { %v1477_v35 = vsel %vm198_vm1, %v3885_v18, %v1455_v34 }
0x1ed3   :  { %v1478_v38 = vsel %vm200_vm0, %v1477_v35, %v1459_v33 }
0x1ed4   :  { %v1479_v36 = vsel %vm202_vm2, %v1478_v38, %v1463_v37 }
0x1ed5   :  { %2861 = vmatmul.msk.f32.vlgmr.msra.gmra.mxu0 %vm847_vm11, %v1479_v36 }
0x1f52   :  { %v1516_v31 = vpop.f32.mrf.mxu0 }
0x1f53   :  { %v3911_v46 = vadd.f32 %v3908_v41, %v1516_v31 }
0x1f55   :  { %v1542_v47 = vadd.f32 %v1539_v45, %v3911_v46 }
0x1f57   :  { %3095 = vtanh.f32 %v1542_v47  ;;  %v2863_v50 = vmul.f32 -1.442695, %v1542_v47 }
0x1f59   :  { %3097 = vpow2.f32 %v2863_v50 }
0x1f5d   :  { %v3096_v39 = vpop.eup %3095 }
0x1f5e   :  { %1565 = vrot.lane.b32.xlu0 %v3096_v39, %s3511_s3 }
0x1f5f   :  { %v3098_v52 = vpop.eup %3097 }
0x1f60   :  { %v1546_v51 = vadd.f32 1.0, %v3098_v52 }
0x1f62   :  { %3099 = vrcp.f32 %v1546_v51  ;;  %v1558_v42 = vand.u32 2147483648, %v1546_v51  ;;  %vm1552_vm5 = vweird.f32 %v1546_v51  ;;  %v1556_v57 = vand.u32 2147483647, %v1546_v51 }
0x1f64   :  { %v1559_v40 = vor.u32 1.1754944e-38, %v1558_v42  ;;  %vm1557_vm7 = vcmp.eq.f32.partialorder %v1556_v57, 8.507059e+37 }
0x1f68   :  { %v3100_v10 = vpop.eup %3099 }
0x1f69   :  { %v1548_v53 = vmul.f32 %v3100_v10, %v1546_v51  ;;  %vm1553_vm4 = vweird.f32 %v3100_v10 }
0x1f6a   :  { %vm1554_vm6 = vmor %vm1552_vm5, %vm1553_vm4 }
0x1f6b   :  { %v1549_v29 = vsub.f32 1.0, %v1548_v53 }
0x1f6d   :  { %v1550_v55 = vmul.f32 %v3100_v10, %v1549_v29 }
0x1f6f   :  { %v1551_v56 = vadd.f32 %v3100_v10, %v1550_v55 }
0x1f71   :  { %v1555_v58 = vsel %vm1554_vm6, %v3100_v10, %v1551_v56 }
0x1f72   :  { %v1560_v59 = vsel %vm1557_vm7, %v1559_v40, %v1555_v58 }
0x1f73   :  { %v1563_v60 = vmul.f32 0.0, %v1560_v59 }
0x1fd0   :  { %v1566_v48 = vpop.permute.xlu0 %1565 }
0x1fd1   :  { %v1568_v49 = vmul.f32 %v1566_v48, %v1560_v59 }
0x1fd3   :  { %1570 = vrot.lane.b32.xlu1 %v1568_v49, %s3511_s3 }
0x2045   :  { %v1571_v61 = vpop.permute.xlu1 %1570 }
0x2046   :  { %v1573_v62 = vadd.f32 %v1571_v61, %v1563_v60 }
0x2048   :  { %3101 = vtanh.f32 %v1573_v62  ;;  %v1630_v23 = vrot.slane %v1573_v62, 6 }
0x204e   :  { %v3102_v63 = vpop.eup %3101 }
0x204f   :  { %1576 = vrot.lane.b32.xlu2 %v3102_v63, %s3511_s3 }
0x20a9   :  { %v1577_v27 = vpop.permute.xlu2 %1576 }
0x20aa   :  { %v3917_v0 = vmul.f32 %v1577_v27, %v1560_v59 }
0x20ac   :  { %1581 = vrot.lane.b32.xlu0 %v3917_v0, %s3512_s28 }
0x211e   :  { %v1582_v1 = vpop.permute.xlu0 %1581 }
0x211f   :  { %2864 = vmatmul.msk.f32.vlgmr.msra.gmra.mxu2 %vm249_vm8, %v1582_v1 }
0x21a2   :  { %v1602_v44 = vpop.f32.mrf.mxu2 }
0x21a3   :  { %v1606_v2 = vrot.slane %v1602_v44, 6 }
0x21a5   :  { %v1608_v4 = vadd.f32 %v1606_v2, %v3911_v46 }
0x21a7   :  { %3103 = vtanh.f32 %v1608_v4  ;;  %v2865_v5 = vmul.f32 -1.442695, %v1608_v4 }
0x21a9   :  { %3105 = vpow2.f32 %v2865_v5 }
0x21ad   :  { %v3104_v3 = vpop.eup %3103 }
0x21ae   :  { %1634 = vrot.lane.b32.xlu1 %v3104_v3, %s3511_s3 }
0x21af   :  { %v3106_v19 = vpop.eup %3105 }
0x21b0   :  { %v1612_v6 = vadd.f32 1.0, %v3106_v19 }
0x21b2   :  { %3107 = vrcp.f32 %v1612_v6  ;;  %v1624_v25 = vand.u32 2147483648, %v1612_v6  ;;  %vm1618_vm10 = vweird.f32 %v1612_v6  ;;  %v1622_v12 = vand.u32 2147483647, %v1612_v6 }
0x21b4   :  { %v1625_v14 = vor.u32 1.1754944e-38, %v1624_v25  ;;  %vm1623_vm13 = vcmp.eq.f32.partialorder %v1622_v12, 8.507059e+37 }
0x21b8   :  { %v3108_v43 = vpop.eup %3107 }
0x21b9   :  { %v1614_v8 = vmul.f32 %v3108_v43, %v1612_v6  ;;  %vm1619_vm9 = vweird.f32 %v3108_v43 }
0x21ba   :  { %vm1620_vm12 = vmor %vm1618_vm10, %vm1619_vm9 }
0x21bb   :  { %v1615_v9 = vsub.f32 1.0, %v1614_v8 }
0x21bd   :  { %v1616_v11 = vmul.f32 %v3108_v43, %v1615_v9 }
0x21bf   :  { %v1617_v7 = vadd.f32 %v3108_v43, %v1616_v11 }
0x21c1   :  { %v1621_v13 = vsel %vm1620_vm12, %v3108_v43, %v1617_v7 }
0x21c2   :  { %v1626_v16 = vsel %vm1623_vm13, %v1625_v14, %v1621_v13 }
0x21c3   :  { %v1632_v24 = vmul.f32 %v1630_v23, %v1626_v16 }
0x2220   :  { %v1635_v15 = vpop.permute.xlu1 %1634 }
0x2221   :  { %v1637_v17 = vmul.f32 %v1635_v15, %v1626_v16 }
0x2223   :  { %1639 = vrot.lane.b32.xlu2 %v1637_v17, %s3511_s3 }
0x227d   :  { %v1640_v26 = vpop.permute.xlu2 %1639 }
0x227e   :  { %v1642_v28 = vadd.f32 %v1640_v26, %v1632_v24 }
0x2280   :  { %3109 = vtanh.f32 %v1642_v28  ;;  %v1700_v48 = vrot.slane %v1642_v28, 6 }
0x2286   :  { %v3110_v30 = vpop.eup %3109 }
0x2287   :  { %1645 = vrot.lane.b32.xlu0 %v3110_v30, %s3511_s3 }
0x22f9   :  { %v1646_v32 = vpop.permute.xlu0 %1645 }
0x22fa   :  { %v1648_v33 = vmul.f32 %v1646_v32, %v1626_v16 }
0x22fc   :  { %v1650_v34 = vrot.slane %v1648_v33, 2  ;;  %v2065_v27 = vsel %vm198_vm1, %v3917_v0, %v1648_v33 }
0x22fe   :  { %1651 = vrot.lane.b32.xlu1 %v1650_v34, %s3512_s28 }
0x2370   :  { %v1652_v35 = vpop.permute.xlu1 %1651 }
0x2371   :  { %2866 = vmatmul.msk.f32.vlgmr.msrb.gmra.mxu3 %vm249_vm8, %v1652_v35 }
0x23f4   :  { %v1672_v37 = vpop.f32.mrf.mxu3 }
0x23f5   :  { %v1676_v38 = vrot.slane %v1672_v37, 4 }
0x23f7   :  { %v1678_v36 = vadd.f32 %v1676_v38, %v3911_v46 }
0x23f9   :  { %3111 = vtanh.f32 %v1678_v36  ;;  %v2867_v45 = vmul.f32 -1.442695, %v1678_v36 }
0x23fb   :  { %3113 = vpow2.f32 %v2867_v45 }
0x23ff   :  { %v3112_v31 = vpop.eup %3111 }
0x2400   :  { %1704 = vrot.lane.b32.xlu2 %v3112_v31, %s3511_s3 }
0x2401   :  { %v3114_v47 = vpop.eup %3113 }
0x2402   :  { %v1682_v39 = vadd.f32 1.0, %v3114_v47 }
0x2404   :  { %3115 = vrcp.f32 %v1682_v39  ;;  %v1694_v29 = vand.u32 2147483648, %v1682_v39  ;;  %vm1688_vm15 = vweird.f32 %v1682_v39  ;;  %v1692_v55 = vand.u32 2147483647, %v1682_v39 }
0x2406   :  { %v1695_v42 = vor.u32 1.1754944e-38, %v1694_v29  ;;  %vm1693_vm5 = vcmp.eq.f32.partialorder %v1692_v55, 8.507059e+37 }
0x240a   :  { %v3116_v50 = vpop.eup %3115 }
0x240b   :  { %v1684_v52 = vmul.f32 %v3116_v50, %v1682_v39  ;;  %vm1689_vm14 = vweird.f32 %v3116_v50 }
0x240c   :  { %vm1690_vm4 = vmor %vm1688_vm15, %vm1689_vm14 }
0x240d   :  { %v1685_v51 = vsub.f32 1.0, %v1684_v52 }
0x240f   :  { %v1686_v10 = vmul.f32 %v3116_v50, %v1685_v51 }
0x2411   :  { %v1687_v53 = vadd.f32 %v3116_v50, %v1686_v10 }
0x2413   :  { %v1691_v56 = vsel %vm1690_vm4, %v3116_v50, %v1687_v53 }
0x2414   :  { %v1696_v58 = vsel %vm1693_vm5, %v1695_v42, %v1691_v56 }
0x2415   :  { %v1702_v59 = vmul.f32 %v1700_v48, %v1696_v58 }
0x245a   :  { %v1705_v57 = vpop.permute.xlu2 %1704 }
0x245b   :  { %v1707_v40 = vmul.f32 %v1705_v57, %v1696_v58 }
0x245d   :  { %1709 = vrot.lane.b32.xlu0 %v1707_v40, %s3511_s3 }
0x24cf   :  { %v1710_v49 = vpop.permute.xlu0 %1709 }
0x24d0   :  { %v1712_v60 = vadd.f32 %v1710_v49, %v1702_v59 }
0x24d2   :  { %3117 = vtanh.f32 %v1712_v60  ;;  %v1770_v23 = vrot.slane %v1712_v60, 6 }
0x24d8   :  { %v3118_v61 = vpop.eup %3117 }
0x24d9   :  { %1715 = vrot.lane.b32.xlu1 %v3118_v61, %s3511_s3 }
0x254b   :  { %v1716_v62 = vpop.permute.xlu1 %1715 }
0x254c   :  { %v1718_v63 = vmul.f32 %v1716_v62, %v1696_v58  ;;  %v2076_v62 = vld [vmem:[%s4171_s11 + $0x18] sm:$0xff] }
0x254d   :  { %2104 = vmatpush.msra.mxu2 %v2076_v62 }
0x254e   :  { %v1720_v1 = vrot.slane %v1718_v63, 4  ;;  %v2066_v44 = vsel %vm200_vm0, %v2065_v27, %v1718_v63  ;;  %v2075_v63 = vld [vmem:[%s4171_s11 + $0x10] sm:$0xff]  ;;  %v2074_v27 = vld [vmem:[%s4171_s11 + $0x8] sm:$0xff] }
0x254f   :  { %2105 = vmatpush.msra.mxu2 %v2075_v63 }
0x2550   :  { %1721 = vrot.lane.b32.xlu2 %v1720_v1, %s3512_s28  ;;  %v2073_v1 = vld [vmem:[%s4171_s11] sm:$0xff] }
0x2551   :  { %2106 = vmatpush.msra.mxu2 %v2074_v27 }
0x2553   :  { %2107 = vmatpush.msra.mxu2 %v2073_v1 }
0x25aa   :  { %v1722_v2 = vpop.permute.xlu2 %1721 }
0x25ab   :  { %2868 = vmatmul.msk.f32.vlgmr.msrb.gmra.mxu1 %vm249_vm8, %v1722_v2 }
0x2628   :  { %v1742_v4 = vpop.f32.mrf.mxu1 }
0x2629   :  { %v1746_v3 = vrot.slane %v1742_v4, 2 }
0x262b   :  { %v1748_v5 = vadd.f32 %v1746_v3, %v3911_v46 }
0x262d   :  { %3119 = vtanh.f32 %v1748_v5  ;;  %v2869_v6 = vmul.f32 -1.442695, %v1748_v5 }
0x262f   :  { %3121 = vpow2.f32 %v2869_v6 }
0x2633   :  { %v3120_v19 = vpop.eup %3119 }
0x2634   :  { %1774 = vrot.lane.b32.xlu0 %v3120_v19, %s3511_s3 }
0x2635   :  { %v3122_v43 = vpop.eup %3121 }
0x2636   :  { %v1752_v0 = vadd.f32 1.0, %v3122_v43 }
0x2638   :  { %3123 = vrcp.f32 %v1752_v0  ;;  %v1764_v12 = vand.u32 2147483648, %v1752_v0  ;;  %vm1758_vm7 = vweird.f32 %v1752_v0  ;;  %v1762_v13 = vand.u32 2147483647, %v1752_v0 }
0x263a   :  { %v1765_v14 = vor.u32 1.1754944e-38, %v1764_v12  ;;  %vm1763_vm10 = vcmp.eq.f32.partialorder %v1762_v13, 8.507059e+37 }
0x263e   :  { %v3124_v8 = vpop.eup %3123 }
0x263f   :  { %v1754_v9 = vmul.f32 %v3124_v8, %v1752_v0  ;;  %vm1759_vm6 = vweird.f32 %v3124_v8  ;;  %v3994_v0 = vld [vmem:[%s4172_s12] sm:$0xf] }
0x2640   :  { %vm1760_vm9 = vmor %vm1758_vm7, %vm1759_vm6  ;;  %2880 = vmatpush.msk.msrb.mxu3 %vm200_vm0, %v3994_v0  ;;  %2882 = vmatpush.msk.msra.mxu0 %vm200_vm0, %v3994_v0 }
0x2641   :  { %v1755_v11 = vsub.f32 1.0, %v1754_v9  ;;  %2885 = vmatpush.msk.msrb.mxu1 %vm200_vm0, %v3994_v0 }
0x2643   :  { %v1756_v7 = vmul.f32 %v3124_v8, %v1755_v11 }
0x2645   :  { %v1757_v25 = vadd.f32 %v3124_v8, %v1756_v7  ;;  %v4013_v7 = vld [vmem:[%s4173_s13] ss:$0 sm:$0xff]  ;;  %s3517_s13 = smov 4  }
0x2647   :  { %v1761_v46 = vsel %vm1760_vm9, %v3124_v8, %v1757_v25 }
0x2648   :  { %v1766_v16 = vsel %vm1763_vm10, %v1765_v14, %v1761_v46 }
0x2649   :  { %v1772_v24 = vmul.f32 %v1770_v23, %v1766_v16 }
0x26a6   :  { %v1775_v15 = vpop.permute.xlu0 %1774 }
0x26a7   :  { %v1777_v17 = vmul.f32 %v1775_v15, %v1766_v16 }
0x26a9   :  { %1779 = vrot.lane.b32.xlu1 %v1777_v17, %s3511_s3 }
0x26b1   :  { %1465 = vrot.lane.b32.xlu1 %v3885_v18, %s3512_s28 }
0x26b9   :  { %1474 = vrot.lane.b32.xlu1 %v1461_v20, %s3514_s0 }
0x271b   :  { %v1780_v26 = vpop.permute.xlu1 %1779 }
0x271c   :  { %v3945_v28 = vadd.f32 %v1780_v26, %v1772_v24 }
0x271e   :  { %3125 = vtanh.f32 %v3945_v28 }
0x2723   :  { %v1466_v20 = vpop.permute.xlu1 %1465 }
0x2724   :  { %v3126_v30 = vpop.eup %3125 }
0x2725   :  { %1785 = vrot.lane.b32.xlu2 %v3126_v30, %s3511_s3 }
0x272d   :  { %1468 = vrot.lane.b32.xlu2 %v1453_v54, %s3516_s30  ;;  %v1475_v54 = vpop.permute.xlu1 %1474  ;;  %s2794_s30 = sshll.u32 %s3523_s17, 4  ;;  %s2795_s30 = int_to_ptr.vmem [resolvable:$true] %s2794_s30 }
0x277f   :  { %v1786_v32 = vpop.permute.xlu2 %1785 }
0x2780   :  { %v1788_v33 = vmul.f32 %v1786_v32, %v1766_v16 }
0x2782   :  { %v1790_v34 = vrot.slane %v1788_v33, 6  ;;  %v2067_v35 = vsel %vm202_vm2, %v2066_v44, %v1788_v33  ;;  %v1837_v44 = vrot.slane %v3945_v28, 6 }
0x2784   :  { %1791 = vrot.lane.b32.xlu0 %v1790_v34, %s3512_s28 }
0x2787   :  { %v1469_v38 = vpop.permute.xlu2 %1468 }
0x2788   :  { %v1480_v36 = vsel %vm198_vm1, %v1466_v20, %v1469_v38 }
0x278c   :  { %1471 = vrot.lane.b32.xlu0 %v1457_v21, %s3511_s3 }
0x27f6   :  { %v1792_v37 = vpop.permute.xlu0 %1791 }
0x27f7   :  { %2870 = vmatmul.msk.f32.vlgmr.msrb.gmra.mxu2 %vm249_vm8, %v1792_v37 }
0x27f8   :  { %2897 = vmatpush.msk.msrb.mxu2 %vm200_vm0, %v3994_v0 }
0x27fe   :  { %v1472_v31 = vpop.permute.xlu0 %1471 }
0x27ff   :  { %v1481_v45 = vsel %vm200_vm0, %v1480_v36, %v1472_v31 }
0x2800   :  { %v1482_v47 = vsel %vm202_vm2, %v1481_v45, %v1475_v54 }
0x2801   :  { %2862 = vmatmul.msk.f32.gmra.mxu0 %vm847_vm11, %v1482_v47 }
0x287a   :  { %v1812_v18 = vpop.f32.mrf.mxu2 }
0x287e   :  { %v1519_v39 = vpop.f32.mrf.mxu0 }
0x287f   :  { %v3963_v50 = vadd.f32 %v3908_v41, %v1519_v39 }
0x2881   :  { %v1815_v21 = vadd.f32 %v1812_v18, %v3963_v50 }
0x2883   :  { %3127 = vtanh.f32 %v1815_v21  ;;  %v2871_v51 = vmul.f32 -1.442695, %v1815_v21 }
0x2885   :  { %3129 = vpow2.f32 %v2871_v51 }
0x2889   :  { %v3128_v52 = vpop.eup %3127 }
0x288a   :  { %1841 = vrot.lane.b32.xlu2 %v3128_v52, %s3511_s3 }
0x288b   :  { %v3130_v10 = vpop.eup %3129 }
0x288c   :  { %v1819_v53 = vadd.f32 1.0, %v3130_v10 }
0x288e   :  { %3131 = vrcp.f32 %v1819_v53  ;;  %v1831_v41 = vand.u32 2147483648, %v1819_v53  ;;  %vm1825_vm12 = vweird.f32 %v1819_v53  ;;  %v1829_v58 = vand.u32 2147483647, %v1819_v53 }
0x288f   :  { %3133 = vtanh.f32 %v2067_v35 }
0x2890   :  { %v1832_v48 = vor.u32 1.1754944e-38, %v1831_v41  ;;  %vm1830_vm14 = vcmp.eq.f32.partialorder %v1829_v58, 8.507059e+37 }
0x2894   :  { %v3132_v29 = vpop.eup %3131 }
0x2895   :  { %v1821_v55 = vmul.f32 %v3132_v29, %v1819_v53  ;;  %vm1826_vm11 = vweird.f32 %v3132_v29  ;;  %v3134_v61 = vpop.eup %3133 }
0x2896   :  { %vm1827_vm13 = vmor %vm1825_vm12, %vm1826_vm11 }
0x2897   :  { %v1822_v56 = vsub.f32 1.0, %v1821_v55 }
0x2899   :  { %v1823_v42 = vmul.f32 %v3132_v29, %v1822_v56 }
0x289b   :  { %v1824_v57 = vadd.f32 %v3132_v29, %v1823_v42 }
0x289d   :  { %v1828_v40 = vsel %vm1827_vm13, %v3132_v29, %v1824_v57 }
0x289e   :  { %v1833_v49 = vsel %vm1830_vm14, %v1832_v48, %v1828_v40 }
0x289f   :  { %v1839_v2 = vmul.f32 %v1837_v44, %v1833_v49 }
0x28e4   :  { %v1842_v59 = vpop.permute.xlu2 %1841 }
0x28e5   :  { %v1844_v60 = vmul.f32 %v1842_v59, %v1833_v49 }
0x28e7   :  { %1846 = vrot.lane.b32.xlu0 %v1844_v60, %s3511_s3 }
0x28ef   :  { %2084 = vrot.lane.b32.xlu0 %v3134_v61, %s3512_s28 }
0x2959   :  { %v1847_v4 = vpop.permute.xlu0 %1846 }
0x295a   :  { %v3982_v3 = vadd.f32 %v1847_v4, %v1839_v2 }
0x295c   :  { %3135 = vtanh.f32 %v3982_v3  ;;  %v1906_v48 = vrot.slane %v3982_v3, 6 }
0x2961   :  { %v2085_v5 = vpop.permute.xlu0 %2084 }
0x2962   :  { %v3136_v19 = vpop.eup %3135  ;;  %2878 = vmatmul.msk.f32.vlgmr.msra.gmra.mxu2 %vm249_vm8, %v2085_v5 }
0x2963   :  { %1852 = vrot.lane.b32.xlu1 %v3136_v19, %s3511_s3 }
0x29d5   :  { %v1853_v6 = vpop.permute.xlu1 %1852 }
0x29d6   :  { %v3987_v43 = vmul.f32 %v1853_v6, %v1833_v49 }
0x29d8   :  { %1857 = vrot.lane.b32.xlu2 %v3987_v43, %s3512_s28 }
0x29e5   :  { %v2109_v12 = vpop.f32.mrf.mxu2 }
0x29e6   :  { %v4017_v13 = vadd.f32 %v4013_v7, %v2109_v12 }
0x2a32   :  { %v1858_v8 = vpop.permute.xlu2 %1857 }
0x2a33   :  { %2872 = vmatmul.msk.f32.vlgmr.msra.gmra.mxu3 %vm249_vm8, %v1858_v8 }
0x2a34   :  { %2888 = vmatpush.msk.msra.mxu3 %vm200_vm0, %v3994_v0 }
0x2a3b   :  { %2136 = vmatmul.f32.vlgmr.msrb.gmra.mxu3 %v3510_v22 }
0x2a3c   :  { %2900 = vmatpush.msk.msrb.mxu3 %vm200_vm0, %v3994_v0 }
0x2ab6   :  { %v1878_v9 = vpop.f32.mrf.mxu3 }
0x2ab7   :  { %v1882_v11 = vrot.slane %v1878_v9, 6 }
0x2ab9   :  { %v1884_v25 = vadd.f32 %v1882_v11, %v3963_v50 }
0x2abb   :  { %3137 = vtanh.f32 %v1884_v25  ;;  %v2873_v24 = vmul.f32 -1.442695, %v1884_v25 }
0x2abe   :  { %v2137_v46 = vpop.f32.mrf.mxu3 }
0x2abf   :  { %v2140_v22 = vadd.f32 %v2137_v46, %v4017_v13 }
0x2ac1   :  { %v3138_v14 = vpop.eup %3137  ;;  %3139 = vtanh.f32 %v2140_v22  ;;  %v2881_v16 = vmul.f32 -1.442695, %v2140_v22 }
0x2ac2   :  { %1910 = vrot.lane.b32.xlu1 %v3138_v14, %s3511_s3 }
0x2ac3   :  { %3141 = vpow2.f32 %v2881_v16 }
0x2ac7   :  { %v3140_v15 = vpop.eup %3139 }
0x2ac8   :  { %2163 = vrot.lane.b32.xlu2 %v3140_v15, %s3509_s1 }
0x2ac9   :  { %v3142_v17 = vpop.eup %3141 }
0x2aca   :  { %v2144_v23 = vadd.f32 1.0, %v3142_v17 }
0x2acc   :  { %3143 = vrcp.f32 %v2144_v23  ;;  %v2156_v20 = vand.u32 2147483648, %v2144_v23  ;;  %vm2150_vm4 = vweird.f32 %v2144_v23  ;;  %v2154_v37 = vand.u32 2147483647, %v2144_v23 }
0x2acd   :  { %3145 = vpow2.f32 %v2873_v24 }
0x2ace   :  { %v2157_v31 = vor.u32 1.1754944e-38, %v2156_v20  ;;  %vm2155_vm6 = vcmp.eq.f32.partialorder %v2154_v37, 8.507059e+37 }
0x2ad2   :  { %v3144_v26 = vpop.eup %3143 }
0x2ad3   :  { %v2146_v28 = vmul.f32 %v3144_v26, %v2144_v23  ;;  %v3146_v30 = vpop.eup %3145  ;;  %vm2151_vm15 = vweird.f32 %v3144_v26 }
0x2ad4   :  { %v1888_v33 = vadd.f32 1.0, %v3146_v30  ;;  %vm2152_vm5 = vmor %vm2150_vm4, %vm2151_vm15 }
0x2ad5   :  { %v2147_v32 = vsub.f32 1.0, %v2146_v28 }
0x2ad6   :  { %3147 = vrcp.f32 %v1888_v33  ;;  %v1900_v51 = vand.u32 2147483648, %v1888_v33  ;;  %vm1894_vm9 = vweird.f32 %v1888_v33  ;;  %v1898_v10 = vand.u32 2147483647, %v1888_v33 }
0x2ad7   :  { %v2148_v34 = vmul.f32 %v3144_v26, %v2147_v32 }
0x2ad8   :  { %v1901_v29 = vor.u32 1.1754944e-38, %v1900_v51  ;;  %vm1899_vm11 = vcmp.eq.f32.partialorder %v1898_v10, 8.507059e+37 }
0x2ad9   :  { %v2149_v35 = vadd.f32 %v3144_v26, %v2148_v34 }
0x2adb   :  { %v2153_v36 = vsel %vm2152_vm5, %v3144_v26, %v2149_v35 }
0x2adc   :  { %v3148_v38 = vpop.eup %3147  ;;  %v2158_v47 = vsel %vm2155_vm6, %v2157_v31, %v2153_v36 }
0x2add   :  { %v1890_v54 = vmul.f32 %v3148_v38, %v1888_v33  ;;  %vm1895_vm7 = vweird.f32 %v3148_v38  ;;  %v2161_v57 = vmul.f32 0.0, %v2158_v47 }
0x2ade   :  { %vm1896_vm10 = vmor %vm1894_vm9, %vm1895_vm7 }
0x2adf   :  { %v1891_v18 = vsub.f32 1.0, %v1890_v54 }
0x2ae1   :  { %v1892_v21 = vmul.f32 %v3148_v38, %v1891_v18 }
0x2ae3   :  { %v1893_v52 = vadd.f32 %v3148_v38, %v1892_v21 }
0x2ae5   :  { %v1897_v53 = vsel %vm1896_vm10, %v3148_v38, %v1893_v52 }
0x2ae6   :  { %v1902_v56 = vsel %vm1899_vm11, %v1901_v29, %v1897_v53 }
0x2ae7   :  { %v1908_v59 = vmul.f32 %v1906_v48, %v1902_v56 }
0x2b22   :  { %v2164_v45 = vpop.permute.xlu2 %2163 }
0x2b23   :  { %v2166_v39 = vmul.f32 %v2164_v45, %v2158_v47 }
0x2b25   :  { %2168 = vrot.lane.b32.xlu1 %v2166_v39, %s3517_s13 }
0x2b34   :  { %v1911_v55 = vpop.permute.xlu1 %1910 }
0x2b35   :  { %v1913_v42 = vmul.f32 %v1911_v55, %v1902_v56 }
0x2b37   :  { %1915 = vrot.lane.b32.xlu0 %v1913_v42, %s3511_s3 }
0x2b97   :  { %v2169_v41 = vpop.permute.xlu1 %2168 }
0x2b98   :  { %v4024_v58 = vadd.f32 %v2169_v41, %v2161_v57 }
0x2b9a   :  { %3149 = vtanh.f32 %v4024_v58  ;;  %v2228_v57 = vrot.slane %v4024_v58, 6 }
0x2ba0   :  { %v3150_v40 = vpop.eup %3149 }
0x2ba1   :  { %2174 = vrot.lane.b32.xlu0 %v3150_v40, %s3517_s13 }
0x2ba9   :  { %v1916_v49 = vpop.permute.xlu0 %1915 }
0x2baa   :  { %v4029_v60 = vadd.f32 %v1916_v49, %v1908_v59 }
0x2bac   :  { %3151 = vtanh.f32 %v4029_v60  ;;  %v1976_v53 = vrot.slane %v4029_v60, 6 }
0x2bb2   :  { %v3152_v61 = vpop.eup %3151 }
0x2bb3   :  { %1921 = vrot.lane.b32.xlu2 %v3152_v61, %s3511_s3 }
0x2c0d   :  { %v1922_v62 = vpop.permute.xlu2 %1921 }
0x2c0e   :  { %v4033_v63 = vmul.f32 %v1922_v62, %v1902_v56 }
0x2c10   :  { %v1926_v27 = vrot.slane %v4033_v63, 2  ;;  %v2068_v61 = vsel %vm198_vm1, %v3987_v43, %v4033_v63 }
0x2c12   :  { %1927 = vrot.lane.b32.xlu1 %v1926_v27, %s3512_s28 }
0x2c13   :  { %v2175_v1 = vpop.permute.xlu0 %2174 }
0x2c14   :  { %v4037_v44 = vmul.f32 %v2175_v1, %v2158_v47 }
0x2c16   :  { %2179 = vrot.lane.b32.xlu2 %v4037_v44, %s3508_s19 }
0x2c70   :  { %v2180_v4 = vpop.permute.xlu2 %2179 }
0x2c84   :  { %v1928_v2 = vpop.permute.xlu1 %1927 }
0x2c85   :  { %2874 = vmatmul.msk.f32.vlgmr.msrb.gmra.mxu0 %vm249_vm8, %v1928_v2 }
0x2c86   :  { %2891 = vmatpush.msk.msrb.mxu0 %vm200_vm0, %v3994_v0 }
0x2c8d   :  { %2883 = vmatmul.msk.f32.vlgmr.msra.gmra.mxu0 %vm216_vm3, %v2180_v4 }
0x2d02   :  { %v1948_v3 = vpop.f32.mrf.mxu0 }
0x2d03   :  { %v1952_v5 = vrot.slane %v1948_v3, 4 }
0x2d05   :  { %v1954_v19 = vadd.f32 %v1952_v5, %v3963_v50 }
0x2d07   :  { %3153 = vtanh.f32 %v1954_v19  ;;  %v2875_v12 = vmul.f32 -1.442695, %v1954_v19 }
0x2d0a   :  { %v2200_v6 = vpop.f32.mrf.mxu0 }
0x2d0b   :  { %v2204_v8 = vrot.slane %v2200_v6, 6 }
0x2d0d   :  { %v3154_v9 = vpop.eup %3153  ;;  %v2206_v11 = vadd.f32 %v2204_v8, %v4017_v13 }
0x2d0e   :  { %1980 = vrot.lane.b32.xlu0 %v3154_v9, %s3511_s3 }
0x2d0f   :  { %3155 = vtanh.f32 %v2206_v11  ;;  %v2884_v46 = vmul.f32 -1.442695, %v2206_v11 }
0x2d10   :  { %3157 = vpow2.f32 %v2875_v12 }
0x2d11   :  { %3159 = vpow2.f32 %v2884_v46 }
0x2d15   :  { %v3156_v25 = vpop.eup %3155 }
0x2d16   :  { %2232 = vrot.lane.b32.xlu1 %v3156_v25, %s3509_s1  ;;  %v3158_v22 = vpop.eup %3157 }
0x2d17   :  { %v1958_v14 = vadd.f32 1.0, %v3158_v22  ;;  %v3160_v15 = vpop.eup %3159 }
0x2d18   :  { %v2210_v16 = vadd.f32 1.0, %v3160_v15 }
0x2d19   :  { %3161 = vrcp.f32 %v1958_v14  ;;  %v1970_v34 = vand.u32 2147483648, %v1958_v14  ;;  %vm1964_vm13 = vweird.f32 %v1958_v14  ;;  %v1968_v35 = vand.u32 2147483647, %v1958_v14 }
0x2d1a   :  { %3163 = vrcp.f32 %v2210_v16  ;;  %v2222_v47 = vand.u32 2147483648, %v2210_v16  ;;  %vm2216_vm5 = vweird.f32 %v2210_v16  ;;  %v2220_v39 = vand.u32 2147483647, %v2210_v16 }
0x2d1b   :  { %v1971_v38 = vor.u32 1.1754944e-38, %v1970_v34  ;;  %vm1969_vm15 = vcmp.eq.f32.partialorder %v1968_v35, 8.507059e+37 }
0x2d1c   :  { %v2223_v21 = vor.u32 1.1754944e-38, %v2222_v47  ;;  %vm2221_vm7 = vcmp.eq.f32.partialorder %v2220_v39, 8.507059e+37 }
0x2d1f   :  { %v3162_v17 = vpop.eup %3161 }
0x2d20   :  { %v1960_v23 = vmul.f32 %v3162_v17, %v1958_v14  ;;  %v3164_v26 = vpop.eup %3163  ;;  %vm1965_vm12 = vweird.f32 %v3162_v17 }
0x2d21   :  { %v2212_v30 = vmul.f32 %v3164_v26, %v2210_v16  ;;  %vm1966_vm14 = vmor %vm1964_vm13, %vm1965_vm12  ;;  %vm2217_vm4 = vweird.f32 %v3164_v26 }
0x2d22   :  { %v1961_v24 = vsub.f32 1.0, %v1960_v23  ;;  %vm2218_vm6 = vmor %vm2216_vm5, %vm2217_vm4 }
0x2d23   :  { %v2213_v33 = vsub.f32 1.0, %v2212_v30 }
0x2d24   :  { %v1962_v28 = vmul.f32 %v3162_v17, %v1961_v24 }
0x2d25   :  { %v2214_v37 = vmul.f32 %v3164_v26, %v2213_v33 }
0x2d26   :  { %v1963_v32 = vadd.f32 %v3162_v17, %v1962_v28 }
0x2d27   :  { %v2215_v45 = vadd.f32 %v3164_v26, %v2214_v37 }
0x2d28   :  { %v1967_v20 = vsel %vm1966_vm14, %v3162_v17, %v1963_v32 }
0x2d29   :  { %v1972_v31 = vsel %vm1969_vm15, %v1971_v38, %v1967_v20  ;;  %v2219_v18 = vsel %vm2218_vm6, %v3164_v26, %v2215_v45 }
0x2d2a   :  { %v2224_v51 = vsel %vm2221_vm7, %v2223_v21, %v2219_v18  ;;  %v1978_v29 = vmul.f32 %v1976_v53, %v1972_v31 }
0x2d2b   :  { %v2230_v41 = vmul.f32 %v2228_v57, %v2224_v51 }
0x2d80   :  { %v1981_v36 = vpop.permute.xlu0 %1980 }
0x2d81   :  { %v1983_v54 = vmul.f32 %v1981_v36, %v1972_v31 }
0x2d83   :  { %1985 = vrot.lane.b32.xlu2 %v1983_v54, %s3511_s3 }
0x2d88   :  { %v2233_v52 = vpop.permute.xlu1 %2232 }
0x2d89   :  { %v2235_v10 = vmul.f32 %v2233_v52, %v2224_v51 }
0x2d8b   :  { %2237 = vrot.lane.b32.xlu0 %v2235_v10, %s3517_s13 }
0x2ddd   :  { %v1986_v55 = vpop.permute.xlu2 %1985 }
0x2dde   :  { %v4052_v56 = vadd.f32 %v1986_v55, %v1978_v29 }
0x2de0   :  { %3165 = vtanh.f32 %v4052_v56 }
0x2de6   :  { %v3166_v42 = vpop.eup %3165 }
0x2de7   :  { %1991 = vrot.lane.b32.xlu1 %v3166_v42, %s3511_s3 }
0x2dfd   :  { %v2238_v40 = vpop.permute.xlu0 %2237 }
0x2dfe   :  { %v2240_v48 = vadd.f32 %v2238_v40, %v2230_v41 }
0x2e00   :  { %3167 = vtanh.f32 %v2240_v48  ;;  %v2298_v33 = vrot.slane %v2240_v48, 6 }
0x2e06   :  { %v3168_v59 = vpop.eup %3167 }
0x2e07   :  { %2243 = vrot.lane.b32.xlu2 %v3168_v59, %s3517_s13 }
0x2e59   :  { %v1992_v49 = vpop.permute.xlu1 %1991 }
0x2e5a   :  { %v1994_v60 = vmul.f32 %v1992_v49, %v1972_v31 }
0x2e5c   :  { %v1996_v62 = vrot.slane %v1994_v60, 4  ;;  %v4062_v27 = vsel %vm200_vm0, %v2068_v61, %v1994_v60  ;;  %v2046_v60 = vrot.slane %v4052_v56, 6 }
0x2e5e   :  { %1997 = vrot.lane.b32.xlu0 %v1996_v62, %s3512_s28 }
0x2e61   :  { %v2244_v58 = vpop.permute.xlu2 %2243 }
0x2e62   :  { %v2246_v1 = vmul.f32 %v2244_v58, %v2224_v51 }
0x2e64   :  { %v2248_v2 = vrot.slane %v2246_v1, 2  ;;  %v2663_v21 = vsel %vm198_vm1, %v4037_v44, %v2246_v1 }
0x2e66   :  { %2249 = vrot.lane.b32.xlu1 %v2248_v2, %s3508_s19 }
0x2ed0   :  { %v1998_v4 = vpop.permute.xlu0 %1997 }
0x2ed1   :  { %2876 = vmatmul.msk.f32.vlgmr.msra.gmra.mxu1 %vm249_vm8, %v1998_v4 }
0x2ed2   :  { %2894 = vmatpush.msk.msra.mxu1 %vm200_vm0, %v3994_v0 }
0x2ed8   :  { %v2250_v3 = vpop.permute.xlu1 %2249 }
0x2ed9   :  { %2886 = vmatmul.msk.f32.vlgmr.msrb.gmra.mxu1 %vm216_vm3, %v2250_v3 }
0x2f4e   :  { %v2018_v43 = vpop.f32.mrf.mxu1 }
0x2f4f   :  { %v2022_v16 = vrot.slane %v2018_v43, 2 }
0x2f51   :  { %v2024_v24 = vadd.f32 %v2022_v16, %v3963_v50 }
0x2f53   :  { %v2877_v50 = vmul.f32 -1.442695, %v2024_v24 }
0x2f56   :  { %v2270_v63 = vpop.f32.mrf.mxu1 }
0x2f57   :  { %v2274_v5 = vrot.slane %v2270_v63, 4 }
0x2f59   :  { %v2276_v19 = vadd.f32 %v2274_v5, %v4017_v13 }
0x2f5b   :  { %3169 = vtanh.f32 %v2276_v19  ;;  %v2887_v8 = vmul.f32 -1.442695, %v2276_v19 }
0x2f5d   :  { %3171 = vpow2.f32 %v2887_v8 }
0x2f61   :  { %v3170_v6 = vpop.eup %3169 }
0x2f62   :  { %2302 = vrot.lane.b32.xlu2 %v3170_v6, %s3509_s1 }
0x2f63   :  { %v3172_v9 = vpop.eup %3171 }
0x2f64   :  { %v2280_v11 = vadd.f32 1.0, %v3172_v9 }
0x2f66   :  { %3173 = vrcp.f32 %v2280_v11  ;;  %v2292_v14 = vand.u32 2147483648, %v2280_v11  ;;  %vm2286_vm10 = vweird.f32 %v2280_v11  ;;  %v2290_v15 = vand.u32 2147483647, %v2280_v11 }
0x2f67   :  { %3175 = vtanh.f32 %v2024_v24 }
0x2f68   :  { %v2293_v23 = vor.u32 1.1754944e-38, %v2292_v14  ;;  %vm2291_vm12 = vcmp.eq.f32.partialorder %v2290_v15, 8.507059e+37 }
0x2f6c   :  { %v3174_v25 = vpop.eup %3173 }
0x2f6d   :  { %v2282_v12 = vmul.f32 %v3174_v25, %v2280_v11  ;;  %vm2287_vm9 = vweird.f32 %v3174_v25  ;;  %v3176_v32 = vpop.eup %3175 }
0x2f6e   :  { %vm2288_vm11 = vmor %vm2286_vm10, %vm2287_vm9 }
0x2f6f   :  { %v2283_v0 = vsub.f32 1.0, %v2282_v12 }
0x2f71   :  { %v2284_v46 = vmul.f32 %v3174_v25, %v2283_v0 }
0x2f73   :  { %v2285_v22 = vadd.f32 %v3174_v25, %v2284_v46 }
0x2f75   :  { %v2289_v17 = vsel %vm2288_vm11, %v3174_v25, %v2285_v22 }
0x2f76   :  { %v2294_v28 = vsel %vm2291_vm12, %v2293_v23, %v2289_v17 }
0x2f77   :  { %v2300_v34 = vmul.f32 %v2298_v33, %v2294_v28 }
0x2fbc   :  { %v2303_v26 = vpop.permute.xlu2 %2302 }
0x2fbd   :  { %v2305_v30 = vmul.f32 %v2303_v26, %v2294_v28 }
0x2fbf   :  { %2307 = vrot.lane.b32.xlu0 %v2305_v30, %s3517_s13 }
0x2fc7   :  { %2050 = vrot.lane.b32.xlu0 %v3176_v32, %s3511_s3 }
0x3031   :  { %v2308_v35 = vpop.permute.xlu0 %2307 }
0x3032   :  { %v4075_v20 = vadd.f32 %v2308_v35, %v2300_v34 }
0x3034   :  { %3177 = vtanh.f32 %v4075_v20  ;;  %v2368_v16 = vrot.slane %v4075_v20, 6 }
0x3035   :  { %3179 = vpow2.f32 %v2877_v50 }
0x3039   :  { %v2051_v57 = vpop.permute.xlu0 %2050 }
0x303a   :  { %v3178_v37 = vpop.eup %3177 }
0x303b   :  { %2313 = vrot.lane.b32.xlu1 %v3178_v37, %s3517_s13  ;;  %v3180_v38 = vpop.eup %3179 }
0x303c   :  { %v2028_v36 = vadd.f32 1.0, %v3180_v38 }
0x303e   :  { %3181 = vrcp.f32 %v2028_v36  ;;  %v2040_v53 = vand.u32 2147483648, %v2028_v36  ;;  %vm2034_vm14 = vweird.f32 %v2028_v36  ;;  %v2038_v29 = vand.u32 2147483647, %v2028_v36 }
0x3040   :  { %v2041_v42 = vor.u32 1.1754944e-38, %v2040_v53  ;;  %vm2039_vm4 = vcmp.eq.f32.partialorder %v2038_v29, 8.507059e+37 }
0x3044   :  { %v3182_v31 = vpop.eup %3181 }
0x3045   :  { %v2030_v54 = vmul.f32 %v3182_v31, %v2028_v36  ;;  %vm2035_vm13 = vweird.f32 %v3182_v31 }
0x3046   :  { %vm2036_vm15 = vmor %vm2034_vm14, %vm2035_vm13 }
0x3047   :  { %v2031_v45 = vsub.f32 1.0, %v2030_v54 }
0x3049   :  { %v2032_v47 = vmul.f32 %v3182_v31, %v2031_v45 }
0x304b   :  { %v2033_v52 = vadd.f32 %v3182_v31, %v2032_v47 }
0x304d   :  { %v2037_v55 = vsel %vm2036_vm15, %v3182_v31, %v2033_v52 }
0x304e   :  { %v2042_v41 = vsel %vm2039_vm4, %v2041_v42, %v2037_v55 }
0x304f   :  { %v2053_v40 = vmul.f32 %v2051_v57, %v2042_v41  ;;  %v2048_v62 = vmul.f32 %v2046_v60, %v2042_v41 }
0x30ad   :  { %v2314_v39 = vpop.permute.xlu1 %2313 }
0x30ae   :  { %v2316_v18 = vmul.f32 %v2314_v39, %v2294_v28 }
0x30b0   :  { %v2318_v51 = vrot.slane %v2316_v18, 4  ;;  %v4082_v10 = vsel %vm200_vm0, %v2663_v21, %v2316_v18 }
0x30b2   :  { %2319 = vrot.lane.b32.xlu2 %v2318_v51, %s3508_s19 }
0x30ba   :  { %2055 = vrot.lane.b32.xlu2 %v2053_v40, %s3511_s3 }
0x310c   :  { %v2320_v44 = vpop.permute.xlu2 %2319 }
0x310d   :  { %2889 = vmatmul.msk.f32.vlgmr.msra.gmra.mxu3 %vm216_vm3, %v2320_v44 }
0x3114   :  { %v2056_v61 = vpop.permute.xlu2 %2055 }
0x3115   :  { %v2058_v58 = vadd.f32 %v2056_v61, %v2048_v62 }
0x3190   :  { %v2340_v48 = vpop.f32.mrf.mxu3 }
0x3191   :  { %v2344_v59 = vrot.slane %v2340_v48, 2 }
0x3193   :  { %v2346_v49 = vadd.f32 %v2344_v59, %v4017_v13 }
0x3195   :  { %3183 = vtanh.f32 %v2346_v49  ;;  %v2890_v4 = vmul.f32 -1.442695, %v2346_v49 }
0x3196   :  { %3185 = vtanh.f32 %v2058_v58 }
0x3197   :  { %3187 = vpow2.f32 %v2890_v4 }
0x319b   :  { %v3184_v1 = vpop.eup %3183 }
0x319c   :  { %2372 = vrot.lane.b32.xlu1 %v3184_v1, %s3509_s1  ;;  %v3186_v2 = vpop.eup %3185 }
0x319d   :  { %v3188_v3 = vpop.eup %3187 }
0x319e   :  { %v2350_v43 = vadd.f32 1.0, %v3188_v3 }
0x31a0   :  { %3189 = vrcp.f32 %v2350_v43  ;;  %v2362_v6 = vand.u32 2147483648, %v2350_v43  ;;  %vm2356_vm6 = vweird.f32 %v2350_v43  ;;  %v2360_v8 = vand.u32 2147483647, %v2350_v43 }
0x31a2   :  { %v2363_v11 = vor.u32 1.1754944e-38, %v2362_v6  ;;  %vm2361_vm9 = vcmp.eq.f32.partialorder %v2360_v8, 8.507059e+37 }
0x31a4   :  { %2061 = vrot.lane.b32.xlu1 %v3186_v2, %s3511_s3 }
0x31a6   :  { %v3190_v63 = vpop.eup %3189 }
0x31a7   :  { %v2352_v13 = vmul.f32 %v3190_v63, %v2350_v43  ;;  %vm2357_vm5 = vweird.f32 %v3190_v63 }
0x31a8   :  { %vm2358_vm7 = vmor %vm2356_vm6, %vm2357_vm5 }
0x31a9   :  { %v2353_v5 = vsub.f32 1.0, %v2352_v13 }
0x31ab   :  { %v2354_v56 = vmul.f32 %v3190_v63, %v2353_v5 }
0x31ad   :  { %v2355_v19 = vadd.f32 %v3190_v63, %v2354_v56 }
0x31af   :  { %v2359_v9 = vsel %vm2358_vm7, %v3190_v63, %v2355_v19 }
0x31b0   :  { %v2364_v12 = vsel %vm2361_vm9, %v2363_v11, %v2359_v9 }
0x31b1   :  { %v2370_v17 = vmul.f32 %v2368_v16, %v2364_v12 }
0x320e   :  { %v2373_v25 = vpop.permute.xlu1 %2372 }
0x320f   :  { %v2375_v0 = vmul.f32 %v2373_v25, %v2364_v12 }
0x3211   :  { %2377 = vrot.lane.b32.xlu0 %v2375_v0, %s3517_s13 }
0x3216   :  { %v2062_v46 = vpop.permute.xlu1 %2061 }
0x3217   :  { %v2064_v22 = vmul.f32 %v2062_v46, %v2042_v41 }
0x3219   :  { %v2070_v14 = vsel %vm202_vm2, %v4062_v27, %v2064_v22 }
0x321a   :  { %3191 = vtanh.f32 %v2070_v14 }
0x3220   :  { %v3192_v15 = vpop.eup %3191 }
0x3221   :  { %2086 = vrot.lane.b32.xlu0 %v3192_v15, %s3512_s28 }
0x3283   :  { %v2378_v23 = vpop.permute.xlu0 %2377 }
0x3284   :  { %v2380_v24 = vadd.f32 %v2378_v23, %v2370_v17 }
0x3286   :  { %3193 = vtanh.f32 %v2380_v24  ;;  %v2435_v42 = vrot.slane %v2380_v24, 6 }
0x328c   :  { %v3194_v26 = vpop.eup %3193 }
0x328d   :  { %2383 = vrot.lane.b32.xlu2 %v3194_v26, %s3517_s13 }
0x3293   :  { %v2087_v28 = vpop.permute.xlu0 %2086 }
0x3294   :  { %2879 = vmatmul.msk.f32.gmra.mxu2 %vm249_vm8, %v2087_v28 }
0x32e7   :  { %v2384_v30 = vpop.permute.xlu2 %2383 }
0x32e8   :  { %v2386_v32 = vmul.f32 %v2384_v30, %v2364_v12 }
0x32ea   :  { %v2388_v33 = vrot.slane %v2386_v32, 6  ;;  %v4100_v27 = vsel %vm202_vm2, %v4082_v10, %v2386_v32 }
0x32ec   :  { %2389 = vrot.lane.b32.xlu1 %v2388_v33, %s3508_s19 }
0x3317   :  { %v2112_v35 = vpop.f32.mrf.mxu2 }
0x3318   :  { %v4105_v20 = vadd.f32 %v4013_v7, %v2112_v35 }
0x335e   :  { %v2390_v34 = vpop.permute.xlu1 %2389 }
0x335f   :  { %2892 = vmatmul.msk.f32.vlgmr.msrb.gmra.mxu0 %vm216_vm3, %v2390_v34 }
0x33dc   :  { %v2410_v37 = vpop.f32.mrf.mxu0 }
0x33dd   :  { %v2413_v50 = vadd.f32 %v2410_v37, %v4105_v20 }
0x33df   :  { %3195 = vtanh.f32 %v2413_v50  ;;  %v2893_v36 = vmul.f32 -1.442695, %v2413_v50 }
0x33e1   :  { %3197 = vpow2.f32 %v2893_v36 }
0x33e5   :  { %v3196_v38 = vpop.eup %3195 }
0x33e6   :  { %2439 = vrot.lane.b32.xlu2 %v3196_v38, %s3509_s1 }
0x33e7   :  { %v3198_v31 = vpop.eup %3197 }
0x33e8   :  { %v2417_v54 = vadd.f32 1.0, %v3198_v31 }
0x33ea   :  { %3199 = vrcp.f32 %v2417_v54  ;;  %v2429_v7 = vand.u32 2147483648, %v2417_v54  ;;  %vm2423_vm10 = vweird.f32 %v2417_v54  ;;  %v2427_v52 = vand.u32 2147483647, %v2417_v54 }
0x33ec   :  { %v2430_v10 = vor.u32 1.1754944e-38, %v2429_v7  ;;  %vm2428_vm12 = vcmp.eq.f32.partialorder %v2427_v52, 8.507059e+37 }
0x33f0   :  { %v3200_v45 = vpop.eup %3199 }
0x33f1   :  { %v2419_v47 = vmul.f32 %v3200_v45, %v2417_v54  ;;  %vm2424_vm8 = vweird.f32 %v3200_v45 }
0x33f2   :  { %vm2425_vm11 = vmor %vm2423_vm10, %vm2424_vm8 }
0x33f3   :  { %v2420_v39 = vsub.f32 1.0, %v2419_v47 }
0x33f5   :  { %v2421_v18 = vmul.f32 %v3200_v45, %v2420_v39 }
0x33f7   :  { %v2422_v21 = vadd.f32 %v3200_v45, %v2421_v18 }
0x33f9   :  { %v2426_v51 = vsel %vm2425_vm11, %v3200_v45, %v2422_v21 }
0x33fa   :  { %v2431_v29 = vsel %vm2428_vm12, %v2430_v10, %v2426_v51 }
0x33fb   :  { %v2437_v57 = vmul.f32 %v2435_v42, %v2431_v29 }
0x3440   :  { %v2440_v53 = vpop.permute.xlu2 %2439 }
0x3441   :  { %v2442_v55 = vmul.f32 %v2440_v53, %v2431_v29 }
0x3443   :  { %2444 = vrot.lane.b32.xlu0 %v2442_v55, %s3517_s13 }
0x34b5   :  { %v2445_v41 = vpop.permute.xlu0 %2444 }
0x34b6   :  { %v2447_v40 = vadd.f32 %v2445_v41, %v2437_v57 }
0x34b8   :  { %3201 = vtanh.f32 %v2447_v40  ;;  %v2504_v12 = vrot.slane %v2447_v40, 6 }
0x34be   :  { %v3202_v44 = vpop.eup %3201 }
0x34bf   :  { %2450 = vrot.lane.b32.xlu1 %v3202_v44, %s3517_s13 }
0x3531   :  { %v2451_v48 = vpop.permute.xlu1 %2450 }
0x3532   :  { %v4111_v59 = vmul.f32 %v2451_v48, %v2431_v29 }
0x3534   :  { %2455 = vrot.lane.b32.xlu2 %v4111_v59, %s3508_s19 }
0x358e   :  { %v2456_v49 = vpop.permute.xlu2 %2455 }
0x358f   :  { %2895 = vmatmul.msk.f32.vlgmr.msra.gmra.mxu1 %vm216_vm3, %v2456_v49 }
0x360c   :  { %v2476_v60 = vpop.f32.mrf.mxu1 }
0x360d   :  { %v2480_v61 = vrot.slane %v2476_v60, 6 }
0x360f   :  { %v2482_v62 = vadd.f32 %v2480_v61, %v4105_v20 }
0x3611   :  { %3203 = vtanh.f32 %v2482_v62  ;;  %v2896_v1 = vmul.f32 -1.442695, %v2482_v62 }
0x3613   :  { %3205 = vpow2.f32 %v2896_v1  ;;  %v2671_v1 = vld [vmem:[%s4174_s14] sm:$0xf] }
0x3614   :  { %2903 = vmatpush.msk.msra.mxu0 %vm200_vm0, %v2671_v1 }
0x3617   :  { %v3204_v58 = vpop.eup %3203 }
0x3618   :  { %2508 = vrot.lane.b32.xlu0 %v3204_v58, %s3509_s1 }
0x3619   :  { %v3206_v2 = vpop.eup %3205 }
0x361a   :  { %v2486_v4 = vadd.f32 1.0, %v3206_v2 }
0x361c   :  { %3207 = vrcp.f32 %v2486_v4  ;;  %v2498_v56 = vand.u32 2147483648, %v2486_v4  ;;  %vm2492_vm14 = vweird.f32 %v2486_v4  ;;  %v2496_v19 = vand.u32 2147483647, %v2486_v4 }
0x361e   :  { %v2499_v8 = vor.u32 1.1754944e-38, %v2498_v56  ;;  %vm2497_vm4 = vcmp.eq.f32.partialorder %v2496_v19, 8.507059e+37 }
0x3622   :  { %v3208_v3 = vpop.eup %3207 }
0x3623   :  { %v2488_v43 = vmul.f32 %v3208_v3, %v2486_v4  ;;  %vm2493_vm13 = vweird.f32 %v3208_v3 }
0x3624   :  { %vm2494_vm15 = vmor %vm2492_vm14, %vm2493_vm13  ;;  %vm2750_vm14 = vcmask 25600  }
0x3625   :  { %v2489_v63 = vsub.f32 1.0, %v2488_v43 }
0x3627   :  { %v2490_v13 = vmul.f32 %v3208_v3, %v2489_v63 }
0x3629   :  { %v2491_v5 = vadd.f32 %v3208_v3, %v2490_v13 }
0x362b   :  { %v2495_v6 = vsel %vm2494_vm15, %v3208_v3, %v2491_v5 }
0x362c   :  { %v2500_v11 = vsel %vm2497_vm4, %v2499_v8, %v2495_v6  ;;  %vm2756_vm4 = vcmask 60450  }
0x362d   :  { %v2506_v0 = vmul.f32 %v2504_v12, %v2500_v11 }
0x368a   :  { %v2509_v9 = vpop.permute.xlu0 %2508 }
0x368b   :  { %v2511_v25 = vmul.f32 %v2509_v9, %v2500_v11 }
0x368d   :  { %2513 = vrot.lane.b32.xlu1 %v2511_v25, %s3517_s13 }
0x36ff   :  { %v2514_v46 = vpop.permute.xlu1 %2513 }
0x3700   :  { %v2516_v22 = vadd.f32 %v2514_v46, %v2506_v0  ;;  %v2944_v46 = vld [vmem:[%s4175_s15] ss:$0 sm:$0xff]  ;;  %s3518_s15 = smov 12  }
0x3702   :  { %3209 = vtanh.f32 %v2516_v22  ;;  %v2574_v7 = vrot.slane %v2516_v22, 6 }
0x3708   :  { %v3210_v14 = vpop.eup %3209 }
0x3709   :  { %2519 = vrot.lane.b32.xlu2 %v3210_v14, %s3517_s13 }
0x3763   :  { %v2520_v15 = vpop.permute.xlu2 %2519 }
0x3764   :  { %v2522_v16 = vmul.f32 %v2520_v15, %v2500_v11 }
0x3766   :  { %v2524_v17 = vrot.slane %v2522_v16, 2  ;;  %v2666_v42 = vsel %vm198_vm1, %v4111_v59, %v2522_v16 }
0x3768   :  { %2525 = vrot.lane.b32.xlu0 %v2524_v17, %s3508_s19 }
0x37da   :  { %v2526_v23 = vpop.permute.xlu0 %2525 }
0x37db   :  { %2898 = vmatmul.msk.f32.vlgmr.msrb.gmra.mxu2 %vm216_vm3, %v2526_v23 }
0x385e   :  { %v2546_v24 = vpop.f32.mrf.mxu2 }
0x385f   :  { %v2550_v26 = vrot.slane %v2546_v24, 4 }
0x3861   :  { %v2552_v28 = vadd.f32 %v2550_v26, %v4105_v20 }
0x3863   :  { %3211 = vtanh.f32 %v2552_v28  ;;  %v2899_v32 = vmul.f32 -1.442695, %v2552_v28 }
0x3865   :  { %3213 = vpow2.f32 %v2899_v32 }
0x3869   :  { %v3212_v30 = vpop.eup %3211 }
0x386a   :  { %2578 = vrot.lane.b32.xlu1 %v3212_v30, %s3509_s1 }
0x386b   :  { %v3214_v33 = vpop.eup %3213 }
0x386c   :  { %v2556_v34 = vadd.f32 1.0, %v3214_v33 }
0x386e   :  { %3215 = vrcp.f32 %v2556_v34  ;;  %v2568_v31 = vand.u32 2147483648, %v2556_v34  ;;  %vm2562_vm6 = vweird.f32 %v2556_v34  ;;  %v2566_v54 = vand.u32 2147483647, %v2556_v34 }
0x3870   :  { %v2569_v47 = vor.u32 1.1754944e-38, %v2568_v31  ;;  %vm2567_vm9 = vcmp.eq.f32.partialorder %v2566_v54, 8.507059e+37 }
0x3874   :  { %v3216_v35 = vpop.eup %3215 }
0x3875   :  { %v2558_v37 = vmul.f32 %v3216_v35, %v2556_v34  ;;  %vm2563_vm5 = vweird.f32 %v3216_v35 }
0x3876   :  { %vm2564_vm7 = vmor %vm2562_vm6, %vm2563_vm5  ;;  %vm2761_vm5 = vcmask 95300   ;;  %vm2766_vm6 = vcmask 130150  }
0x3877   :  { %v2559_v50 = vsub.f32 1.0, %v2558_v37 }
0x3879   :  { %v2560_v38 = vmul.f32 %v3216_v35, %v2559_v50 }
0x387b   :  { %v2561_v36 = vadd.f32 %v3216_v35, %v2560_v38 }
0x387d   :  { %v2565_v45 = vsel %vm2564_vm7, %v3216_v35, %v2561_v36 }
0x387e   :  { %v2570_v18 = vsel %vm2567_vm9, %v2569_v47, %v2565_v45 }
0x387f   :  { %v2576_v52 = vmul.f32 %v2574_v7, %v2570_v18 }
0x38dc   :  { %v2579_v39 = vpop.permute.xlu1 %2578 }
0x38dd   :  { %v2581_v21 = vmul.f32 %v2579_v39, %v2570_v18 }
0x38df   :  { %2583 = vrot.lane.b32.xlu2 %v2581_v21, %s3517_s13 }
0x3939   :  { %v2584_v51 = vpop.permute.xlu2 %2583 }
0x393a   :  { %v2586_v10 = vadd.f32 %v2584_v51, %v2576_v52 }
0x393c   :  { %3217 = vtanh.f32 %v2586_v10  ;;  %v2644_v9 = vrot.slane %v2586_v10, 6 }
0x3942   :  { %v3218_v53 = vpop.eup %3217 }
0x3943   :  { %2589 = vrot.lane.b32.xlu0 %v3218_v53, %s3517_s13 }
0x39b5   :  { %v2590_v29 = vpop.permute.xlu0 %2589 }
0x39b6   :  { %v2592_v55 = vmul.f32 %v2590_v29, %v2570_v18 }
0x39b8   :  { %v2594_v57 = vrot.slane %v2592_v55, 4  ;;  %v4129_v41 = vsel %vm200_vm0, %v2666_v42, %v2592_v55 }
0x39ba   :  { %2595 = vrot.lane.b32.xlu1 %v2594_v57, %s3508_s19 }
0x3a2c   :  { %v2596_v40 = vpop.permute.xlu1 %2595 }
0x3a2d   :  { %2901 = vmatmul.msk.f32.vlgmr.msrb.gmra.mxu3 %vm216_vm3, %v2596_v40 }
0x3ab0   :  { %v2616_v44 = vpop.f32.mrf.mxu3 }
0x3ab1   :  { %v2620_v48 = vrot.slane %v2616_v44, 2 }
0x3ab3   :  { %v2622_v49 = vadd.f32 %v2620_v48, %v4105_v20 }
0x3ab5   :  { %3219 = vtanh.f32 %v2622_v49  ;;  %v2902_v61 = vmul.f32 -1.442695, %v2622_v49 }
0x3ab6   :  { %3221 = vtanh.f32 %v4100_v27 }
0x3ab7   :  { %3223 = vpow2.f32 %v2902_v61 }
0x3abb   :  { %v3220_v60 = vpop.eup %3219 }
0x3abc   :  { %2648 = vrot.lane.b32.xlu2 %v3220_v60, %s3509_s1  ;;  %v3222_v59 = vpop.eup %3221 }
0x3abd   :  { %v3224_v62 = vpop.eup %3223 }
0x3abe   :  { %v2626_v58 = vadd.f32 1.0, %v3224_v62 }
0x3ac0   :  { %3225 = vrcp.f32 %v2626_v58  ;;  %v2638_v27 = vand.u32 2147483648, %v2626_v58  ;;  %vm2632_vm8 = vweird.f32 %v2626_v58  ;;  %v2636_v63 = vand.u32 2147483647, %v2626_v58 }
0x3ac2   :  { %v2639_v5 = vor.u32 1.1754944e-38, %v2638_v27  ;;  %vm2637_vm11 = vcmp.eq.f32.partialorder %v2636_v63, 8.507059e+37 }
0x3ac4   :  { %2678 = vrot.lane.b32.xlu2 %v3222_v59, %s3508_s19 }
0x3ac6   :  { %v3226_v20 = vpop.eup %3225 }
0x3ac7   :  { %v2628_v2 = vmul.f32 %v3226_v20, %v2626_v58  ;;  %vm2633_vm1 = vweird.f32 %v3226_v20 }
0x3ac8   :  { %vm2634_vm10 = vmor %vm2632_vm8, %vm2633_vm1  ;;  %vm2772_vm1 = vcmask 156800   ;;  %vm2777_vm8 = vcmask 191650  }
0x3ac9   :  { %v2629_v4 = vsub.f32 1.0, %v2628_v2 }
0x3acb   :  { %v2630_v3 = vmul.f32 %v3226_v20, %v2629_v4 }
0x3acd   :  { %v2631_v43 = vadd.f32 %v3226_v20, %v2630_v3 }
0x3acf   :  { %v2635_v13 = vsel %vm2634_vm10, %v3226_v20, %v2631_v43  ;;  %vm2782_vm10 = vcmask 226500  }
0x3ad0   :  { %v2640_v19 = vsel %vm2637_vm11, %v2639_v5, %v2635_v13  ;;  %vm2787_vm11 = vcmask 261350  }
0x3ad1   :  { %v2646_v11 = vmul.f32 %v2644_v9, %v2640_v19 }
0x3b16   :  { %v2649_v56 = vpop.permute.xlu2 %2648 }
0x3b17   :  { %v2651_v6 = vmul.f32 %v2649_v56, %v2640_v19 }
0x3b19   :  { %2653 = vrot.lane.b32.xlu0 %v2651_v6, %s3517_s13 }
0x3b1e   :  { %v2679_v8 = vpop.permute.xlu2 %2678 }
0x3b1f   :  { %2904 = vmatmul.msk.f32.vlgmr.msra.gmra.mxu0 %vm216_vm3, %v2679_v8 }
0x3b8b   :  { %v2654_v25 = vpop.permute.xlu0 %2653 }
0x3b8c   :  { %v2656_v12 = vadd.f32 %v2654_v25, %v2646_v11 }
0x3b8e   :  { %3227 = vtanh.f32 %v2656_v12 }
0x3b94   :  { %v3228_v0 = vpop.eup %3227 }
0x3b95   :  { %2659 = vrot.lane.b32.xlu1 %v3228_v0, %s3517_s13 }
0x3b9c   :  { %v2706_v22 = vpop.f32.mrf.mxu0 }
0x3b9d   :  { %v2707_v14 = vadd.f32 %v2944_v46, %v2706_v22 }
0x3b9f   :  { %v2906_v15 = vmul.f32 -1.442695, %v2707_v14 }
0x3ba1   :  { %3229 = vpow2.f32 %v2906_v15 }
0x3ba7   :  { %v3230_v16 = vpop.eup %3229 }
0x3ba8   :  { %v2718_v17 = vadd.f32 1.0, %v3230_v16 }
0x3baa   :  { %3231 = vrcp.f32 %v2718_v17  ;;  %v2731_v28 = vand.u32 2147483648, %v2718_v17  ;;  %v2729_v32 = vand.u32 2147483647, %v2718_v17  ;;  %vm2725_vm12 = vweird.f32 %v2718_v17 }
0x3bac   :  { %v2732_v34 = vor.u32 1.1754944e-38, %v2731_v28  ;;  %vm2730_vm15 = vcmp.eq.f32.partialorder %v2729_v32, 8.507059e+37 }
0x3bb0   :  { %v3232_v23 = vpop.eup %3231 }
0x3bb1   :  { %v2721_v24 = vmul.f32 %v3232_v23, %v2718_v17  ;;  %vm2726_vm0 = vweird.f32 %v3232_v23 }
0x3bb2   :  { %vm2727_vm13 = vmor %vm2725_vm12, %vm2726_vm0 }
0x3bb3   :  { %v2722_v26 = vsub.f32 1.0, %v2721_v24 }
0x3bb5   :  { %v2723_v30 = vmul.f32 %v3232_v23, %v2722_v26 }
0x3bb7   :  { %v2724_v33 = vadd.f32 %v3232_v23, %v2723_v30 }
0x3bb9   :  { %v2728_v35 = vsel %vm2727_vm13, %v3232_v23, %v2724_v33 }
0x3bba   :  { %v2733_v37 = vsel %vm2730_vm15, %v2732_v34, %v2728_v35 }
0x3bbb   :  { %2758 = vrot.lane.b32.xlu2 %v2733_v37, %s3500_s23  ;;  %2753 = vrot.lane.b32.xlu1 %v2733_v37, %s3517_s13  ;;  %2751 = vst.msk [vmem:[#allocation16] sm:$0x3] %vm2750_vm14, %v2733_v37  ;;  %s3519_s23 = smov [#allocation17]  }
0x3c07   :  { %v2660_v50 = vpop.permute.xlu1 %2659 }
0x3c08   :  { %v2662_v38 = vmul.f32 %v2660_v50, %v2640_v19 }
0x3c0a   :  { %v2668_v36 = vsel %vm202_vm2, %v4129_v41, %v2662_v38 }
0x3c0b   :  { %3233 = vtanh.f32 %v2668_v36 }
0x3c11   :  { %v3234_v31 = vpop.eup %3233 }
0x3c12   :  { %2680 = vrot.lane.b32.xlu0 %v3234_v31, %s3508_s19  ;;  %s2805_s19 = sshll.u32 %s3519_s23, 4  ;;  %s2806_s19 = int_to_ptr.vmem [resolvable:$true] %s2805_s19 }
0x3c13   :  { %2810 = dma.vmem_to_hbm [thread:$0]  %s2806_s19, 32, %s2808_s27, [#allocation18]  }
0x3c15   :  { %v2759_v45 = vpop.permute.xlu2 %2758 }
0x3c1a   :  { %2763 = vrot.lane.b32.xlu0 %v2733_v37, %s3518_s15 }
0x3c2d   :  { %v2754_v54 = vpop.permute.xlu1 %2753 }
0x3c2e   :  { %2757 = vst.msk [vmem:[#allocation16 - $0x2] sm:$0xc] %vm2756_vm4, %v2754_v54 }
0x3c2f   :  { %2762 = vst.msk [vmem:[#allocation16 - $0x4] sm:$0x30] %vm2761_vm5, %v2759_v45 }
0x3c84   :  { %v2681_v47 = vpop.permute.xlu0 %2680 }
0x3c85   :  { %2905 = vmatmul.msk.f32.gmra.mxu0 %vm216_vm3, %v2681_v47 }
0x3c8c   :  { %v2764_v39 = vpop.permute.xlu0 %2763 }
0x3c8d   :  { %2767 = vst.msk [vmem:[#allocation16 - $0x6] sm:$0xc0] %vm2766_vm6, %v2764_v39 }
0x3d02   :  { %v2709_v18 = vpop.f32.mrf.mxu0 }
0x3d03   :  { %v2710_v21 = vadd.f32 %v2944_v46, %v2709_v18 }
0x3d05   :  { %v2907_v7 = vmul.f32 -1.442695, %v2710_v21 }
0x3d07   :  { %3235 = vpow2.f32 %v2907_v7 }
0x3d0d   :  { %v3236_v52 = vpop.eup %3235 }
0x3d0e   :  { %v2719_v51 = vadd.f32 1.0, %v3236_v52 }
0x3d10   :  { %3237 = vrcp.f32 %v2719_v51  ;;  %v2746_v55 = vand.u32 2147483648, %v2719_v51  ;;  %v2744_v57 = vand.u32 2147483647, %v2719_v51  ;;  %vm2740_vm7 = vweird.f32 %v2719_v51 }
0x3d12   :  { %v2747_v40 = vor.u32 1.1754944e-38, %v2746_v55  ;;  %vm2745_vm9 = vcmp.eq.f32.partialorder %v2744_v57, 8.507059e+37 }
0x3d16   :  { %v3238_v10 = vpop.eup %3237 }
0x3d17   :  { %v2736_v53 = vmul.f32 %v3238_v10, %v2719_v51  ;;  %vm2741_vm2 = vweird.f32 %v3238_v10 }
0x3d18   :  { %vm2742_vm3 = vmor %vm2740_vm7, %vm2741_vm2 }
0x3d19   :  { %v2737_v29 = vsub.f32 1.0, %v2736_v53 }
0x3d1b   :  { %v2738_v42 = vmul.f32 %v3238_v10, %v2737_v29 }
0x3d1d   :  { %v2739_v41 = vadd.f32 %v3238_v10, %v2738_v42 }
0x3d1f   :  { %v2743_v44 = vsel %vm2742_vm3, %v3238_v10, %v2739_v41 }
0x3d20   :  { %v2748_v48 = vsel %vm2745_vm9, %v2747_v40, %v2743_v44 }
0x3d21   :  { %2779 = vrot.lane.b32.xlu0 %v2748_v48, %s3520_s29  ;;  %2774 = vrot.lane.b32.xlu2 %v2748_v48, %s3521_s6 }
0x3d22   :  { %2769 = vrot.lane.b32.xlu1 %v2748_v48, %s3514_s0 }
0x3d2a   :  { %2784 = vrot.lane.b32.xlu1 %v2748_v48, %s3522_s9 }
0x3d7b   :  { %v2775_v60 = vpop.permute.xlu2 %2774 }
0x3d93   :  { %v2780_v59 = vpop.permute.xlu0 %2779 }
0x3d94   :  { %v2770_v49 = vpop.permute.xlu1 %2769 }
0x3d95   :  { %2773 = vst.msk [vmem:[#allocation16] sm:$0x3] %vm2772_vm1, %v2770_v49 }
0x3d96   :  { %2778 = vst.msk [vmem:[#allocation16 - $0x2] sm:$0xc] %vm2777_vm8, %v2775_v60 }
0x3d97   :  { %2783 = vst.msk [vmem:[#allocation16 - $0x4] sm:$0x30] %vm2782_vm10, %v2780_v59 }
0x3d9c   :  { %v2785_v61 = vpop.permute.xlu1 %2784 }
0x3d9d   :  { %2788 = vst.msk [vmem:[#allocation16 - $0x6] sm:$0xc0] %vm2787_vm11, %v2785_v61 }
0x3d9e   :  { %2799 = dma.vmem_to_hbm [thread:$0]  %s2795_s30, 32, %s2797_s18, [#allocation4]  }
0x3d9f   :  { %3489 = dma.done.wait [#allocation4], 32  }
0x3da0   :  { %3490 = vsyncadd [#allocation4], 4294967264 }
0x3da1   :  { %3491 = dma.done.wait [#allocation18], 32  }
0x3da2   :  { %3492 = vsyncadd [#allocation18], 4294967264 }
0x3da3   :  { %2819 = vsyncpa [#allocation3], 1 }
0x3da4   :  { %2820 = vsyncpa [#allocation6], 1 }
0x3da5   :  { %2821 = vsyncpa [#allocation9], 1 }
0x3da6   :  { %2822 = vsyncpa [#allocation12], 1 }
0x3da7   :  { %2823 = vsyncpa [#allocation15], 1 }
0x3da8   :  { %2824 = vsyncpa [#allocation4], 1 }
0x3da9   :  { %2825 = vsyncpa [#allocation18], 1 }

</bundles_post_ra>
